<compile_context>
chip_gen: v7x
topology: tpu7x:2x2x1
jax: 0.10.0
libtpu: 0.0.40
codegen_flags: <defaults>
</compile_context>

<pallas_src>
import jax
import jax.numpy as jnp
from jax.experimental import pallas as pl
from jax.experimental.pallas import tpu as pltpu


_KS = (3, 5, 3)
_STACK1_C = (16, 16, 64)
_STACK2_C = (32, 32, 64)


# --------------------------------------------------------------------------- #
# In-kernel helpers (traced inside the fused Pallas kernel).
# --------------------------------------------------------------------------- #
def _fill_padded(pad_ref, act, p):
    """Fill a (Hp, Wp, C) 'same'-padding VMEM buffer.

    Zeros only the four border strips (top/bottom rows, left/right columns) and
    writes the interior with one bulk store — no full-buffer memset.
    """
    hp, wp, c = pad_ref.shape
    h, w = hp - 2 * p, wp - 2 * p
    zrow = jnp.zeros((p, wp, c), jnp.float32)
    pad_ref[0:p, :, :] = zrow
    pad_ref[hp - p:hp, :, :] = zrow
    zcol = jnp.zeros((h, p, c), jnp.float32)
    pad_ref[p:p + h, 0:p, :] = zcol
    pad_ref[p:p + h, wp - p:wp, :] = zcol
    pad_ref[p:p + h, p:p + w, :] = act


def _conv_accum(pad_ref, w_ref, b_ref, *, k, relu):
    """'same'-padded stride-1 conv as K*K per-tap dots accumulated in f32.

    pad_ref: (Hp, Wp, Cin) padded activation (already filled)
    w_ref:   (K*K*Cin, Cout), row order = (dh, dw, cin)
    b_ref:   (1, Cout)
    returns  (H*W, Cout) float32, rows ordered (i, j).
    No im2col scratch: each tap is a static slice of the padded input.
    """
    hp, wp, cin = pad_ref.shape
    p = k // 2
    h, w = hp - 2 * p, wp - 2 * p
    rows = h * w
    cout = w_ref.shape[-1]
    acc = jnp.zeros((rows, cout), jnp.float32)
    t = 0
    for dh in range(k):                       # static, fully unrolled taps
        for dw in range(k):
            tap = pad_ref[dh:dh + h, dw:dw + w, :].reshape(rows, cin)
            acc = acc + jnp.dot(tap, w_ref[t * cin:(t + 1) * cin, :],
                                preferred_element_type=jnp.float32)
            t += 1
    acc = acc + b_ref[...]
    if relu:
        acc = jnp.maximum(acc, 0.0)
    return acc


# --------------------------------------------------------------------------- #
# Fused encoder kernel (one image per grid step):
#   ConvStack1 -> SpaceToDepth(2) -> ConvStack2 -> ReLU.
# --------------------------------------------------------------------------- #
def _encoder_kernel(
    x_ref,
    w11, b11, w12, b12, w13, b13,
    w21, b21, w22, b22, w23, b23,
    o_ref,
    pad11, pad12, pad13, a1_ref, pad21, pad22, pad23,
):
    _, h1, w1sz, cin1 = x_ref.shape
    h2, w2sz = h1 // 2, w1sz // 2

    # ---- ConvStack 1: Conv3x3+ReLU -> Conv5x5+ReLU -> Conv3x3 ----
    _fill_padded(pad11, x_ref[...].reshape(h1, w1sz, cin1), 1)
    y = _conv_accum(pad11, w11, b11, k=3, relu=True)
    _fill_padded(pad12, y.reshape(h1, w1sz, y.shape[-1]), 2)
    y = _conv_accum(pad12, w12, b12, k=5, relu=True)
    _fill_padded(pad13, y.reshape(h1, w1sz, y.shape[-1]), 1)
    y = _conv_accum(pad13, w13, b13, k=3, relu=False)       # (h1*w1, 64)
    c1 = y.shape[-1]

    # ---- SpaceToDepth(2), folded into conv2_1's padded input buffer ----
    # a1_ref rows are (i1, j1)-ordered; pixel (2i+bh, 2j+bw) = row
    # (2i+bh)*w1 + 2j+bw.  For each (i, bh, bw) the w2 source pixels are a
    # stride-2 run of rows -> one bulk strided read + one bulk store.
    a1_ref[...] = y
    zrow = jnp.zeros((1, w2sz + 2, 4 * c1), jnp.float32)
    pad21[0:1, :, :] = zrow
    pad21[h2 + 1:h2 + 2, :, :] = zrow
    zcol = jnp.zeros((h2, 1, 4 * c1), jnp.float32)
    pad21[1:1 + h2, 0:1, :] = zcol
    pad21[1:1 + h2, w2sz + 1:w2sz + 2, :] = zcol
    for i in range(h2):
        for bh in range(2):
            for bw in range(2):
                c0 = (bh * 2 + bw) * c1          # channel order (bh, bw, c)
                start = (2 * i + bh) * w1sz + bw
                src = a1_ref[pl.ds(start, w2sz, 2), :]        # (w2, 64)
                pad21[1 + i:2 + i, 1:1 + w2sz, c0:c0 + c1] = (
                    src.reshape(1, w2sz, c1))

    # ---- ConvStack 2: Conv3x3+ReLU -> Conv5x5+ReLU -> Conv3x3 (+final ReLU) ----
    y = _conv_accum(pad21, w21, b21, k=3, relu=True)
    _fill_padded(pad22, y.reshape(h2, w2sz, y.shape[-1]), 2)
    y = _conv_accum(pad22, w22, b22, k=5, relu=True)
    _fill_padded(pad23, y.reshape(h2, w2sz, y.shape[-1]), 1)
    y = _conv_accum(pad23, w23, b23, k=3, relu=True)         # final nn.ReLU fused

    # ---- single bulk writeback ----
    o_ref[...] = y.reshape(1, h2, w2sz, y.shape[-1])


def _tiled_bytes(shape, elem_bytes=4):
    """Approximate VMEM footprint of an f32 buffer with (8,128) minor tiling."""
    s = list(shape)
    s[-1] = -(-s[-1] // 128) * 128
    if len(s) >= 2:
        s[-2] = -(-s[-2] // 8) * 8
    n = elem_bytes
    for d in s:
        n *= d
    return n


def _fused_encoder(x_s2d, params):
    """x_s2d: (N, H/4, W/4, 16*C) f32 NHWC (already SpaceToDepth(4)-ed)."""
    n, h1, w1, c1in = x_s2d.shape
    h2, w2 = h1 // 2, w1 // 2
    c_out = _STACK2_C[-1]
    f32 = jnp.float32

    # Per-image VMEM scratch: padded-input buffer per conv + SpaceToDepth source.
    scratch_dims = [
        (h1 + 2, w1 + 2, c1in),                 # pad11 (k=3)
        (h1 + 4, w1 + 4, _STACK1_C[0]),         # pad12 (k=5)
        (h1 + 2, w1 + 2, _STACK1_C[1]),         # pad13 (k=3)
        (h1 * w1, _STACK1_C[2]),                # a1 (conv1_3 output, s2d source)
        (h2 + 2, w2 + 2, 4 * _STACK1_C[2]),     # pad21 (k=3, 256 ch, lane-dense)
        (h2 + 4, w2 + 4, _STACK2_C[0]),         # pad22 (k=5)
        (h2 + 2, w2 + 2, _STACK2_C[1]),         # pad23 (k=3)
    ]
    scratch = [pltpu.VMEM(s, f32) for s in scratch_dims]

    weight_keys = ("s1_w0", "s1_b0", "s1_w1", "s1_b1", "s1_w2", "s1_b2",
                   "s2_w0", "s2_b0", "s2_w1", "s2_b1", "s2_w2", "s2_b2")
    w_args = [params[k] for k in weight_keys]

    def const_spec(a):
        return pl.BlockSpec(a.shape, lambda b: (0,) * a.ndim)

    in_specs = [pl.BlockSpec((1, h1, w1, c1in), lambda b: (b, 0, 0, 0))]
    in_specs += [const_spec(a) for a in w_args]
    out_spec = pl.BlockSpec((1, h2, w2, c_out), lambda b: (b, 0, 0, 0))

    # Explicit VMEM budget: scratch + weights + double-buffered I/O blocks.
    est = sum(_tiled_bytes(s) for s in scratch_dims)
    est += sum(_tiled_bytes(a.shape) for a in w_args)
    est += 2 * (_tiled_bytes((1, h1, w1, c1in)) + _tiled_bytes((1, h2, w2, c_out)))
    vmem_limit = int(min(64 * 2**20, max(32 * 2**20, 4 * est)))

    grid_spec = pltpu.PrefetchScalarGridSpec(
        num_scalar_prefetch=0,
        grid=(n,),
        in_specs=in_specs,
        out_specs=out_spec,
        scratch_shapes=scratch,
    )
    return pl.pallas_call(
        _encoder_kernel,
        out_shape=jax.ShapeDtypeStruct((n, h2, w2, c_out), f32),
        grid_spec=grid_spec,
        compiler_params=pltpu.CompilerParams(
            dimension_semantics=("parallel",),
            vmem_limit_bytes=vmem_limit),
    )(x_s2d, *w_args)


# --------------------------------------------------------------------------- #
# Plain-JAX edge glue (pure layout rearrangement, no FLOPs).
# --------------------------------------------------------------------------- #
def space_to_depth_nhwc(x, b):
    """SpaceToDepth on NHWC with (block_h, block_w, C) channel ordering."""
    n, h, w, c = x.shape
    x = x.reshape(n, h // b, b, w // b, b, c)
    x = jnp.transpose(x, (0, 1, 3, 2, 4, 5))
    return x.reshape(n, h // b, w // b, b * b * c)


# --------------------------------------------------------------------------- #
# Deterministic parameter construction (PyTorch Conv2d default init style).
# --------------------------------------------------------------------------- #
def _make_conv_params(key, cin, cout, k):
    w_key, b_key = jax.random.split(key)
    bound = 1.0 / (cin * k * k) ** 0.5
    w_oihw = jax.random.uniform(
        w_key, (cout, cin, k, k), jnp.float32, minval=-bound, maxval=bound)
    b = jax.random.uniform(
        b_key, (cout,), jnp.float32, minval=-bound, maxval=bound)
    # OIHW (PyTorch) -> HWIO -> (K*K*Cin, Cout); row = (dh*K + dw)*Cin + cin,
    # matching the kernel's per-tap weight-slice ordering.
    w_mat = jnp.transpose(w_oihw, (2, 3, 1, 0)).reshape(k * k * cin, cout)
    return w_mat, b.reshape(1, cout)


def make_encoder_params(input_shape, key):
    c_in = input_shape[0]
    s1_cin = c_in * 4 * 4            # after SpaceToDepth(4)
    s2_cin = _STACK1_C[-1] * 2 * 2   # after SpaceToDepth(2)
    keys = jax.random.split(key, 6)
    params = {}
    prev = s1_cin
    for i, (k, c) in enumerate(zip(_KS, _STACK1_C)):
        params[f"s1_w{i}"], params[f"s1_b{i}"] = _make_conv_params(keys[i], prev, c, k)
        prev = c
    prev = s2_cin
    for i, (k, c) in enumerate(zip(_KS, _STACK2_C)):
        params[f"s2_w{i}"], params[f"s2_b{i}"] = _make_conv_params(keys[3 + i], prev, c, k)
        prev = c
    return params


# --------------------------------------------------------------------------- #
# EncoderModule.forward
# --------------------------------------------------------------------------- #
@jax.jit
def encoder_forward(obs_nchw, params):
    n, c, h, w = obs_nchw.shape
    # Input edge glue: NCHW -> NHWC, SpaceToDepth(4).
    x = jnp.transpose(obs_nchw, (0, 2, 3, 1))
    x = space_to_depth_nhwc(x, 4)                      # (N, H/4, W/4, 16*C)
    # Fused kernel: ConvStack1 -> SpaceToDepth(2) -> ConvStack2 -> ReLU.
    out_nhwc = _fused_encoder(x, params)               # (N, H/8, W/8, 64)
    return jnp.transpose(out_nhwc, (0, 3, 1, 2))       # -> NCHW (PyTorch output)


# --------------------------------------------------------------------------- #
# Pure-JAX reference (same math, XLA convs) for a correctness cross-check.
# --------------------------------------------------------------------------- #
def _reference_forward(obs_nchw, params):
    def conv(x, w_mat, b, k, relu):
        cin = w_mat.shape[0] // (k * k)
        w = w_mat.reshape(k, k, cin, -1)
        y = jax.lax.conv_general_dilated(
            x, w, window_strides=(1, 1), padding="SAME",
            dimension_numbers=("NHWC", "HWIO", "NHWC"))
        y = y + b.reshape(1, 1, 1, -1)
        return jnp.maximum(y, 0.0) if relu else y

    x = jnp.transpose(obs_nchw, (0, 2, 3, 1))
    x = space_to_depth_nhwc(x, 4)
    for i, (k, r) in enumerate(zip(_KS, (True, True, False))):
        x = conv(x, params[f"s1_w{i}"], params[f"s1_b{i}"], k, r)
    x = space_to_depth_nhwc(x, 2)
    for i, k in enumerate(_KS):
        x = conv(x, params[f"s2_w{i}"], params[f"s2_b{i}"], k, True)
    return jnp.transpose(x, (0, 3, 1, 2))


if __name__ == "__main__":
    input_shape = (4, 16, 16)        # (C, H, W); H, W divisible by 4*2 = 8
    batch = 2

    key = jax.random.PRNGKey(0)
    obs_key, param_key = jax.random.split(key)
    obs = jax.random.normal(obs_key, (batch,) + input_shape, dtype=jnp.float32)
    params = make_encoder_params(input_shape, param_key)

    out = jax.block_until_ready(encoder_forward(obs, params))

    expected = (batch, 64, input_shape[1] // 8, input_shape[2] // 8)
    assert out.shape == expected, (out.shape, expected)
    assert bool(jnp.all(out >= 0.0))              # final ReLU
    assert bool(jnp.all(jnp.isfinite(out)))

    # Cross-check the fused Pallas kernel against the pure-JAX reference.
    ref = _reference_forward(obs, params)
    err = float(jnp.max(jnp.abs(out - ref)))
    assert err < 5e-3, f"max abs error vs reference: {err}"

    print("KERNEL_OK")
</pallas_src>

<mosaic_0001>
module attributes {stable_mosaic.version = 11 : i64} {
  func.func @_encoder_kernel(%arg0: i32, %arg1: memref<1x4x4x64xf32, #tpu.memory_space<vmem>>, %arg2: memref<576x16xf32, #tpu.memory_space<vmem>>, %arg3: memref<1x16xf32, #tpu.memory_space<vmem>>, %arg4: memref<400x16xf32, #tpu.memory_space<vmem>>, %arg5: memref<1x16xf32, #tpu.memory_space<vmem>>, %arg6: memref<144x64xf32, #tpu.memory_space<vmem>>, %arg7: memref<1x64xf32, #tpu.memory_space<vmem>>, %arg8: memref<2304x32xf32, #tpu.memory_space<vmem>>, %arg9: memref<1x32xf32, #tpu.memory_space<vmem>>, %arg10: memref<800x32xf32, #tpu.memory_space<vmem>>, %arg11: memref<1x32xf32, #tpu.memory_space<vmem>>, %arg12: memref<288x64xf32, #tpu.memory_space<vmem>>, %arg13: memref<1x64xf32, #tpu.memory_space<vmem>>, %arg14: memref<1x2x2x64xf32, #tpu.memory_space<vmem>>, %arg15: memref<6x6x64xf32, #tpu.memory_space<vmem>>, %arg16: memref<8x8x16xf32, #tpu.memory_space<vmem>>, %arg17: memref<6x6x16xf32, #tpu.memory_space<vmem>>, %arg18: memref<16x64xf32, #tpu.memory_space<vmem>>, %arg19: memref<4x4x256xf32, #tpu.memory_space<vmem>>, %arg20: memref<6x6x32xf32, #tpu.memory_space<vmem>>, %arg21: memref<4x4x32xf32, #tpu.memory_space<vmem>>) attributes {dimension_semantics = [#tpu.dimension_semantics<parallel>], iteration_bounds = array<i64: 2>, scalar_prefetch = 0 : i64, scratch_operands = 7 : i64, tpu.core_type = #tpu.core_type<tc>, window_params = [{transform_indices = @transform_0, window_bounds = array<i64: 1, 4, 4, 64>}, {pipeline_mode = #tpu.pipeline_mode<synchronous>, transform_indices = @transform_1, window_bounds = array<i64: 576, 16>}, {pipeline_mode = #tpu.pipeline_mode<synchronous>, transform_indices = @transform_2, window_bounds = array<i64: 1, 16>}, {pipeline_mode = #tpu.pipeline_mode<synchronous>, transform_indices = @transform_3, window_bounds = array<i64: 400, 16>}, {pipeline_mode = #tpu.pipeline_mode<synchronous>, transform_indices = @transform_4, window_bounds = array<i64: 1, 16>}, {pipeline_mode = #tpu.pipeline_mode<synchronous>, transform_indices = @transform_5, window_bounds = array<i64: 144, 64>}, {pipeline_mode = #tpu.pipeline_mode<synchronous>, transform_indices = @transform_6, window_bounds = array<i64: 1, 64>}, {pipeline_mode = #tpu.pipeline_mode<synchronous>, transform_indices = @transform_7, window_bounds = array<i64: 2304, 32>}, {pipeline_mode = #tpu.pipeline_mode<synchronous>, transform_indices = @transform_8, window_bounds = array<i64: 1, 32>}, {pipeline_mode = #tpu.pipeline_mode<synchronous>, transform_indices = @transform_9, window_bounds = array<i64: 800, 32>}, {pipeline_mode = #tpu.pipeline_mode<synchronous>, transform_indices = @transform_10, window_bounds = array<i64: 1, 32>}, {pipeline_mode = #tpu.pipeline_mode<synchronous>, transform_indices = @transform_11, window_bounds = array<i64: 288, 64>}, {pipeline_mode = #tpu.pipeline_mode<synchronous>, transform_indices = @transform_12, window_bounds = array<i64: 1, 64>}, {transform_indices = @transform_13, window_bounds = array<i64: 1, 2, 2, 64>}]} {
    %c0 = arith.constant 0 : index
    %c0_0 = arith.constant 0 : index
    %c0_1 = arith.constant 0 : index
    %c0_2 = arith.constant 0 : index
    %0 = vector.load %arg1[%c0, %c0_0, %c0_1, %c0_2] : memref<1x4x4x64xf32, #tpu.memory_space<vmem>>, vector<1x4x4x64xf32>
    %1 = vector.shape_cast %0 : vector<1x4x4x64xf32> to vector<4x4x64xf32>
    %cst = arith.constant 0.000000e+00 : f32
    %2 = vector.broadcast %cst : f32 to vector<1x6x64xf32>
    %c0_3 = arith.constant 0 : index
    %c0_4 = arith.constant 0 : index
    %c0_5 = arith.constant 0 : index
    %3 = vector.load %arg15[%c0_3, %c0_4, %c0_5] : memref<6x6x64xf32, #tpu.memory_space<vmem>>, vector<1x6x64xf32>
    tpu.vector_store %arg15[%c0_3, %c0_4, %c0_5], %2 {strides = array<i32>} : memref<6x6x64xf32, #tpu.memory_space<vmem>>, vector<1x6x64xf32>,
    %c5 = arith.constant 5 : index
    %c0_6 = arith.constant 0 : index
    %c0_7 = arith.constant 0 : index
    %4 = vector.load %arg15[%c5, %c0_6, %c0_7] : memref<6x6x64xf32, #tpu.memory_space<vmem>>, vector<1x6x64xf32>
    tpu.vector_store %arg15[%c5, %c0_6, %c0_7], %2 {strides = array<i32>} : memref<6x6x64xf32, #tpu.memory_space<vmem>>, vector<1x6x64xf32>,
    %cst_8 = arith.constant 0.000000e+00 : f32
    %5 = vector.broadcast %cst_8 : f32 to vector<4x1x64xf32>
    %c1 = arith.constant 1 : index
    %c0_9 = arith.constant 0 : index
    %c0_10 = arith.constant 0 : index
    %6 = vector.load %arg15[%c1, %c0_9, %c0_10] : memref<6x6x64xf32, #tpu.memory_space<vmem>>, vector<4x1x64xf32>
    tpu.vector_store %arg15[%c1, %c0_9, %c0_10], %5 {strides = array<i32>} : memref<6x6x64xf32, #tpu.memory_space<vmem>>, vector<4x1x64xf32>,
    %c1_11 = arith.constant 1 : index
    %c5_12 = arith.constant 5 : index
    %c0_13 = arith.constant 0 : index
    %7 = vector.load %arg15[%c1_11, %c5_12, %c0_13] : memref<6x6x64xf32, #tpu.memory_space<vmem>>, vector<4x1x64xf32>
    tpu.vector_store %arg15[%c1_11, %c5_12, %c0_13], %5 {strides = array<i32>} : memref<6x6x64xf32, #tpu.memory_space<vmem>>, vector<4x1x64xf32>,
    %c1_14 = arith.constant 1 : index
    %c1_15 = arith.constant 1 : index
    %c0_16 = arith.constant 0 : index
    %8 = vector.load %arg15[%c1_14, %c1_15, %c0_16] : memref<6x6x64xf32, #tpu.memory_space<vmem>>, vector<4x4x64xf32>
    tpu.vector_store %arg15[%c1_14, %c1_15, %c0_16], %1 {strides = array<i32>} : memref<6x6x64xf32, #tpu.memory_space<vmem>>, vector<4x4x64xf32>,
    %cst_17 = arith.constant 0.000000e+00 : f32
    %9 = vector.broadcast %cst_17 : f32 to vector<16x16xf32>
    %c0_18 = arith.constant 0 : index
    %c0_19 = arith.constant 0 : index
    %c0_20 = arith.constant 0 : index
    %10 = vector.load %arg15[%c0_18, %c0_19, %c0_20] : memref<6x6x64xf32, #tpu.memory_space<vmem>>, vector<4x4x64xf32>
    %11 = vector.shape_cast %10 : vector<4x4x64xf32> to vector<16x64xf32>
    %c0_21 = arith.constant 0 : index
    %c0_22 = arith.constant 0 : index
    %12 = vector.load %arg2[%c0_21, %c0_22] : memref<576x16xf32, #tpu.memory_space<vmem>>, vector<64x16xf32>
    %cst_23 = arith.constant dense<0.000000e+00> : vector<16x16xf32>
    %13 = tpu.matmul %11, %12, %cst_23 {dimension_numbers = #tpu.dot_dimension_numbers<[1], [0], [0], [1], [0, 0, 1, 1], [], []>} : vector<16x64xf32>, vector<64x16xf32>, vector<16x16xf32> -> vector<16x16xf32>
    %14 = arith.addf %9, %13 : vector<16x16xf32>
    %c0_24 = arith.constant 0 : index
    %c1_25 = arith.constant 1 : index
    %c0_26 = arith.constant 0 : index
    %15 = vector.load %arg15[%c0_24, %c1_25, %c0_26] : memref<6x6x64xf32, #tpu.memory_space<vmem>>, vector<4x4x64xf32>
    %16 = vector.shape_cast %15 : vector<4x4x64xf32> to vector<16x64xf32>
    %c64 = arith.constant 64 : index
    %c0_27 = arith.constant 0 : index
    %17 = vector.load %arg2[%c64, %c0_27] : memref<576x16xf32, #tpu.memory_space<vmem>>, vector<64x16xf32>
    %cst_28 = arith.constant dense<0.000000e+00> : vector<16x16xf32>
    %18 = tpu.matmul %16, %17, %cst_28 {dimension_numbers = #tpu.dot_dimension_numbers<[1], [0], [0], [1], [0, 0, 1, 1], [], []>} : vector<16x64xf32>, vector<64x16xf32>, vector<16x16xf32> -> vector<16x16xf32>
    %19 = arith.addf %14, %18 : vector<16x16xf32>
    %c0_29 = arith.constant 0 : index
    %c2 = arith.constant 2 : index
    %c0_30 = arith.constant 0 : index
    %20 = vector.load %arg15[%c0_29, %c2, %c0_30] : memref<6x6x64xf32, #tpu.memory_space<vmem>>, vector<4x4x64xf32>
    %21 = vector.shape_cast %20 : vector<4x4x64xf32> to vector<16x64xf32>
    %c128 = arith.constant 128 : index
    %c0_31 = arith.constant 0 : index
    %22 = vector.load %arg2[%c128, %c0_31] : memref<576x16xf32, #tpu.memory_space<vmem>>, vector<64x16xf32>
    %cst_32 = arith.constant dense<0.000000e+00> : vector<16x16xf32>
    %23 = tpu.matmul %21, %22, %cst_32 {dimension_numbers = #tpu.dot_dimension_numbers<[1], [0], [0], [1], [0, 0, 1, 1], [], []>} : vector<16x64xf32>, vector<64x16xf32>, vector<16x16xf32> -> vector<16x16xf32>
    %24 = arith.addf %19, %23 : vector<16x16xf32>
    %c1_33 = arith.constant 1 : index
    %c0_34 = arith.constant 0 : index
    %c0_35 = arith.constant 0 : index
    %25 = vector.load %arg15[%c1_33, %c0_34, %c0_35] : memref<6x6x64xf32, #tpu.memory_space<vmem>>, vector<4x4x64xf32>
    %26 = vector.shape_cast %25 : vector<4x4x64xf32> to vector<16x64xf32>
    %c192 = arith.constant 192 : index
    %c0_36 = arith.constant 0 : index
    %27 = vector.load %arg2[%c192, %c0_36] : memref<576x16xf32, #tpu.memory_space<vmem>>, vector<64x16xf32>
    %cst_37 = arith.constant dense<0.000000e+00> : vector<16x16xf32>
    %28 = tpu.matmul %26, %27, %cst_37 {dimension_numbers = #tpu.dot_dimension_numbers<[1], [0], [0], [1], [0, 0, 1, 1], [], []>} : vector<16x64xf32>, vector<64x16xf32>, vector<16x16xf32> -> vector<16x16xf32>
    %29 = arith.addf %24, %28 : vector<16x16xf32>
    %c1_38 = arith.constant 1 : index
    %c1_39 = arith.constant 1 : index
    %c0_40 = arith.constant 0 : index
    %30 = vector.load %arg15[%c1_38, %c1_39, %c0_40] : memref<6x6x64xf32, #tpu.memory_space<vmem>>, vector<4x4x64xf32>
    %31 = vector.shape_cast %30 : vector<4x4x64xf32> to vector<16x64xf32>
    %c256 = arith.constant 256 : index
    %c0_41 = arith.constant 0 : index
    %32 = vector.load %arg2[%c256, %c0_41] : memref<576x16xf32, #tpu.memory_space<vmem>>, vector<64x16xf32>
    %cst_42 = arith.constant dense<0.000000e+00> : vector<16x16xf32>
    %33 = tpu.matmul %31, %32, %cst_42 {dimension_numbers = #tpu.dot_dimension_numbers<[1], [0], [0], [1], [0, 0, 1, 1], [], []>} : vector<16x64xf32>, vector<64x16xf32>, vector<16x16xf32> -> vector<16x16xf32>
    %34 = arith.addf %29, %33 : vector<16x16xf32>
    %c1_43 = arith.constant 1 : index
    %c2_44 = arith.constant 2 : index
    %c0_45 = arith.constant 0 : index
    %35 = vector.load %arg15[%c1_43, %c2_44, %c0_45] : memref<6x6x64xf32, #tpu.memory_space<vmem>>, vector<4x4x64xf32>
    %36 = vector.shape_cast %35 : vector<4x4x64xf32> to vector<16x64xf32>
    %c320 = arith.constant 320 : index
    %c0_46 = arith.constant 0 : index
    %37 = vector.load %arg2[%c320, %c0_46] : memref<576x16xf32, #tpu.memory_space<vmem>>, vector<64x16xf32>
    %cst_47 = arith.constant dense<0.000000e+00> : vector<16x16xf32>
    %38 = tpu.matmul %36, %37, %cst_47 {dimension_numbers = #tpu.dot_dimension_numbers<[1], [0], [0], [1], [0, 0, 1, 1], [], []>} : vector<16x64xf32>, vector<64x16xf32>, vector<16x16xf32> -> vector<16x16xf32>
    %39 = arith.addf %34, %38 : vector<16x16xf32>
    %c2_48 = arith.constant 2 : index
    %c0_49 = arith.constant 0 : index
    %c0_50 = arith.constant 0 : index
    %40 = vector.load %arg15[%c2_48, %c0_49, %c0_50] : memref<6x6x64xf32, #tpu.memory_space<vmem>>, vector<4x4x64xf32>
    %41 = vector.shape_cast %40 : vector<4x4x64xf32> to vector<16x64xf32>
    %c384 = arith.constant 384 : index
    %c0_51 = arith.constant 0 : index
    %42 = vector.load %arg2[%c384, %c0_51] : memref<576x16xf32, #tpu.memory_space<vmem>>, vector<64x16xf32>
    %cst_52 = arith.constant dense<0.000000e+00> : vector<16x16xf32>
    %43 = tpu.matmul %41, %42, %cst_52 {dimension_numbers = #tpu.dot_dimension_numbers<[1], [0], [0], [1], [0, 0, 1, 1], [], []>} : vector<16x64xf32>, vector<64x16xf32>, vector<16x16xf32> -> vector<16x16xf32>
    %44 = arith.addf %39, %43 : vector<16x16xf32>
    %c2_53 = arith.constant 2 : index
    %c1_54 = arith.constant 1 : index
    %c0_55 = arith.constant 0 : index
    %45 = vector.load %arg15[%c2_53, %c1_54, %c0_55] : memref<6x6x64xf32, #tpu.memory_space<vmem>>, vector<4x4x64xf32>
    %46 = vector.shape_cast %45 : vector<4x4x64xf32> to vector<16x64xf32>
    %c448 = arith.constant 448 : index
    %c0_56 = arith.constant 0 : index
    %47 = vector.load %arg2[%c448, %c0_56] : memref<576x16xf32, #tpu.memory_space<vmem>>, vector<64x16xf32>
    %cst_57 = arith.constant dense<0.000000e+00> : vector<16x16xf32>
    %48 = tpu.matmul %46, %47, %cst_57 {dimension_numbers = #tpu.dot_dimension_numbers<[1], [0], [0], [1], [0, 0, 1, 1], [], []>} : vector<16x64xf32>, vector<64x16xf32>, vector<16x16xf32> -> vector<16x16xf32>
    %49 = arith.addf %44, %48 : vector<16x16xf32>
    %c2_58 = arith.constant 2 : index
    %c2_59 = arith.constant 2 : index
    %c0_60 = arith.constant 0 : index
    %50 = vector.load %arg15[%c2_58, %c2_59, %c0_60] : memref<6x6x64xf32, #tpu.memory_space<vmem>>, vector<4x4x64xf32>
    %51 = vector.shape_cast %50 : vector<4x4x64xf32> to vector<16x64xf32>
    %c512 = arith.constant 512 : index
    %c0_61 = arith.constant 0 : index
    %52 = vector.load %arg2[%c512, %c0_61] : memref<576x16xf32, #tpu.memory_space<vmem>>, vector<64x16xf32>
    %cst_62 = arith.constant dense<0.000000e+00> : vector<16x16xf32>
    %53 = tpu.matmul %51, %52, %cst_62 {dimension_numbers = #tpu.dot_dimension_numbers<[1], [0], [0], [1], [0, 0, 1, 1], [], []>} : vector<16x64xf32>, vector<64x16xf32>, vector<16x16xf32> -> vector<16x16xf32>
    %54 = arith.addf %49, %53 : vector<16x16xf32>
    %c0_63 = arith.constant 0 : index
    %c0_64 = arith.constant 0 : index
    %55 = vector.load %arg3[%c0_63, %c0_64] : memref<1x16xf32, #tpu.memory_space<vmem>>, vector<1x16xf32>
    %56 = vector.broadcast %55 : vector<1x16xf32> to vector<16x16xf32>
    %57 = arith.addf %54, %56 : vector<16x16xf32>
    %cst_65 = arith.constant 0.000000e+00 : f32
    %58 = vector.broadcast %cst_65 : f32 to vector<16x16xf32>
    %59 = arith.maximumf %57, %58 : vector<16x16xf32>
    %60 = vector.shape_cast %59 : vector<16x16xf32> to vector<4x4x16xf32>
    %cst_66 = arith.constant 0.000000e+00 : f32
    %61 = vector.broadcast %cst_66 : f32 to vector<2x8x16xf32>
    %c0_67 = arith.constant 0 : index
    %c0_68 = arith.constant 0 : index
    %c0_69 = arith.constant 0 : index
    %62 = vector.load %arg16[%c0_67, %c0_68, %c0_69] : memref<8x8x16xf32, #tpu.memory_space<vmem>>, vector<2x8x16xf32>
    tpu.vector_store %arg16[%c0_67, %c0_68, %c0_69], %61 {strides = array<i32>} : memref<8x8x16xf32, #tpu.memory_space<vmem>>, vector<2x8x16xf32>,
    %c6 = arith.constant 6 : index
    %c0_70 = arith.constant 0 : index
    %c0_71 = arith.constant 0 : index
    %63 = vector.load %arg16[%c6, %c0_70, %c0_71] : memref<8x8x16xf32, #tpu.memory_space<vmem>>, vector<2x8x16xf32>
    tpu.vector_store %arg16[%c6, %c0_70, %c0_71], %61 {strides = array<i32>} : memref<8x8x16xf32, #tpu.memory_space<vmem>>, vector<2x8x16xf32>,
    %cst_72 = arith.constant 0.000000e+00 : f32
    %64 = vector.broadcast %cst_72 : f32 to vector<4x2x16xf32>
    %c2_73 = arith.constant 2 : index
    %c0_74 = arith.constant 0 : index
    %c0_75 = arith.constant 0 : index
    %65 = vector.load %arg16[%c2_73, %c0_74, %c0_75] : memref<8x8x16xf32, #tpu.memory_space<vmem>>, vector<4x2x16xf32>
    tpu.vector_store %arg16[%c2_73, %c0_74, %c0_75], %64 {strides = array<i32>} : memref<8x8x16xf32, #tpu.memory_space<vmem>>, vector<4x2x16xf32>,
    %c2_76 = arith.constant 2 : index
    %c6_77 = arith.constant 6 : index
    %c0_78 = arith.constant 0 : index
    %66 = vector.load %arg16[%c2_76, %c6_77, %c0_78] : memref<8x8x16xf32, #tpu.memory_space<vmem>>, vector<4x2x16xf32>
    tpu.vector_store %arg16[%c2_76, %c6_77, %c0_78], %64 {strides = array<i32>} : memref<8x8x16xf32, #tpu.memory_space<vmem>>, vector<4x2x16xf32>,
    %c2_79 = arith.constant 2 : index
    %c2_80 = arith.constant 2 : index
    %c0_81 = arith.constant 0 : index
    %67 = vector.load %arg16[%c2_79, %c2_80, %c0_81] : memref<8x8x16xf32, #tpu.memory_space<vmem>>, vector<4x4x16xf32>
    tpu.vector_store %arg16[%c2_79, %c2_80, %c0_81], %60 {strides = array<i32>} : memref<8x8x16xf32, #tpu.memory_space<vmem>>, vector<4x4x16xf32>,
    %cst_82 = arith.constant 0.000000e+00 : f32
    %68 = vector.broadcast %cst_82 : f32 to vector<16x16xf32>
    %c0_83 = arith.constant 0 : index
    %c0_84 = arith.constant 0 : index
    %c0_85 = arith.constant 0 : index
    %69 = vector.load %arg16[%c0_83, %c0_84, %c0_85] : memref<8x8x16xf32, #tpu.memory_space<vmem>>, vector<4x4x16xf32>
    %70 = vector.shape_cast %69 : vector<4x4x16xf32> to vector<16x16xf32>
    %c0_86 = arith.constant 0 : index
    %c0_87 = arith.constant 0 : index
    %71 = vector.load %arg4[%c0_86, %c0_87] : memref<400x16xf32, #tpu.memory_space<vmem>>, vector<16x16xf32>
    %cst_88 = arith.constant dense<0.000000e+00> : vector<16x16xf32>
    %72 = tpu.matmul %70, %71, %cst_88 {dimension_numbers = #tpu.dot_dimension_numbers<[1], [0], [0], [1], [0, 0, 1, 1], [], []>} : vector<16x16xf32>, vector<16x16xf32>, vector<16x16xf32> -> vector<16x16xf32>
    %73 = arith.addf %68, %72 : vector<16x16xf32>
    %c0_89 = arith.constant 0 : index
    %c1_90 = arith.constant 1 : index
    %c0_91 = arith.constant 0 : index
    %74 = vector.load %arg16[%c0_89, %c1_90, %c0_91] : memref<8x8x16xf32, #tpu.memory_space<vmem>>, vector<4x4x16xf32>
    %75 = vector.shape_cast %74 : vector<4x4x16xf32> to vector<16x16xf32>
    %c16 = arith.constant 16 : index
    %c0_92 = arith.constant 0 : index
    %76 = vector.load %arg4[%c16, %c0_92] : memref<400x16xf32, #tpu.memory_space<vmem>>, vector<16x16xf32>
    %cst_93 = arith.constant dense<0.000000e+00> : vector<16x16xf32>
    %77 = tpu.matmul %75, %76, %cst_93 {dimension_numbers = #tpu.dot_dimension_numbers<[1], [0], [0], [1], [0, 0, 1, 1], [], []>} : vector<16x16xf32>, vector<16x16xf32>, vector<16x16xf32> -> vector<16x16xf32>
    %78 = arith.addf %73, %77 : vector<16x16xf32>
    %c0_94 = arith.constant 0 : index
    %c2_95 = arith.constant 2 : index
    %c0_96 = arith.constant 0 : index
    %79 = vector.load %arg16[%c0_94, %c2_95, %c0_96] : memref<8x8x16xf32, #tpu.memory_space<vmem>>, vector<4x4x16xf32>
    %80 = vector.shape_cast %79 : vector<4x4x16xf32> to vector<16x16xf32>
    %c32 = arith.constant 32 : index
    %c0_97 = arith.constant 0 : index
    %81 = vector.load %arg4[%c32, %c0_97] : memref<400x16xf32, #tpu.memory_space<vmem>>, vector<16x16xf32>
    %cst_98 = arith.constant dense<0.000000e+00> : vector<16x16xf32>
    %82 = tpu.matmul %80, %81, %cst_98 {dimension_numbers = #tpu.dot_dimension_numbers<[1], [0], [0], [1], [0, 0, 1, 1], [], []>} : vector<16x16xf32>, vector<16x16xf32>, vector<16x16xf32> -> vector<16x16xf32>
    %83 = arith.addf %78, %82 : vector<16x16xf32>
    %c0_99 = arith.constant 0 : index
    %c3 = arith.constant 3 : index
    %c0_100 = arith.constant 0 : index
    %84 = vector.load %arg16[%c0_99, %c3, %c0_100] : memref<8x8x16xf32, #tpu.memory_space<vmem>>, vector<4x4x16xf32>
    %85 = vector.shape_cast %84 : vector<4x4x16xf32> to vector<16x16xf32>
    %c48 = arith.constant 48 : index
    %c0_101 = arith.constant 0 : index
    %86 = vector.load %arg4[%c48, %c0_101] : memref<400x16xf32, #tpu.memory_space<vmem>>, vector<16x16xf32>
    %cst_102 = arith.constant dense<0.000000e+00> : vector<16x16xf32>
    %87 = tpu.matmul %85, %86, %cst_102 {dimension_numbers = #tpu.dot_dimension_numbers<[1], [0], [0], [1], [0, 0, 1, 1], [], []>} : vector<16x16xf32>, vector<16x16xf32>, vector<16x16xf32> -> vector<16x16xf32>
    %88 = arith.addf %83, %87 : vector<16x16xf32>
    %c0_103 = arith.constant 0 : index
    %c4 = arith.constant 4 : index
    %c0_104 = arith.constant 0 : index
    %89 = vector.load %arg16[%c0_103, %c4, %c0_104] : memref<8x8x16xf32, #tpu.memory_space<vmem>>, vector<4x4x16xf32>
    %90 = vector.shape_cast %89 : vector<4x4x16xf32> to vector<16x16xf32>
    %c64_105 = arith.constant 64 : index
    %c0_106 = arith.constant 0 : index
    %91 = vector.load %arg4[%c64_105, %c0_106] : memref<400x16xf32, #tpu.memory_space<vmem>>, vector<16x16xf32>
    %cst_107 = arith.constant dense<0.000000e+00> : vector<16x16xf32>
    %92 = tpu.matmul %90, %91, %cst_107 {dimension_numbers = #tpu.dot_dimension_numbers<[1], [0], [0], [1], [0, 0, 1, 1], [], []>} : vector<16x16xf32>, vector<16x16xf32>, vector<16x16xf32> -> vector<16x16xf32>
    %93 = arith.addf %88, %92 : vector<16x16xf32>
    %c1_108 = arith.constant 1 : index
    %c0_109 = arith.constant 0 : index
    %c0_110 = arith.constant 0 : index
    %94 = vector.load %arg16[%c1_108, %c0_109, %c0_110] : memref<8x8x16xf32, #tpu.memory_space<vmem>>, vector<4x4x16xf32>
    %95 = vector.shape_cast %94 : vector<4x4x16xf32> to vector<16x16xf32>
    %c80 = arith.constant 80 : index
    %c0_111 = arith.constant 0 : index
    %96 = vector.load %arg4[%c80, %c0_111] : memref<400x16xf32, #tpu.memory_space<vmem>>, vector<16x16xf32>
    %cst_112 = arith.constant dense<0.000000e+00> : vector<16x16xf32>
    %97 = tpu.matmul %95, %96, %cst_112 {dimension_numbers = #tpu.dot_dimension_numbers<[1], [0], [0], [1], [0, 0, 1, 1], [], []>} : vector<16x16xf32>, vector<16x16xf32>, vector<16x16xf32> -> vector<16x16xf32>
    %98 = arith.addf %93, %97 : vector<16x16xf32>
    %c1_113 = arith.constant 1 : index
    %c1_114 = arith.constant 1 : index
    %c0_115 = arith.constant 0 : index
    %99 = vector.load %arg16[%c1_113, %c1_114, %c0_115] : memref<8x8x16xf32, #tpu.memory_space<vmem>>, vector<4x4x16xf32>
    %100 = vector.shape_cast %99 : vector<4x4x16xf32> to vector<16x16xf32>
    %c96 = arith.constant 96 : index
    %c0_116 = arith.constant 0 : index
    %101 = vector.load %arg4[%c96, %c0_116] : memref<400x16xf32, #tpu.memory_space<vmem>>, vector<16x16xf32>
    %cst_117 = arith.constant dense<0.000000e+00> : vector<16x16xf32>
    %102 = tpu.matmul %100, %101, %cst_117 {dimension_numbers = #tpu.dot_dimension_numbers<[1], [0], [0], [1], [0, 0, 1, 1], [], []>} : vector<16x16xf32>, vector<16x16xf32>, vector<16x16xf32> -> vector<16x16xf32>
    %103 = arith.addf %98, %102 : vector<16x16xf32>
    %c1_118 = arith.constant 1 : index
    %c2_119 = arith.constant 2 : index
    %c0_120 = arith.constant 0 : index
    %104 = vector.load %arg16[%c1_118, %c2_119, %c0_120] : memref<8x8x16xf32, #tpu.memory_space<vmem>>, vector<4x4x16xf32>
    %105 = vector.shape_cast %104 : vector<4x4x16xf32> to vector<16x16xf32>
    %c112 = arith.constant 112 : index
    %c0_121 = arith.constant 0 : index
    %106 = vector.load %arg4[%c112, %c0_121] : memref<400x16xf32, #tpu.memory_space<vmem>>, vector<16x16xf32>
    %cst_122 = arith.constant dense<0.000000e+00> : vector<16x16xf32>
    %107 = tpu.matmul %105, %106, %cst_122 {dimension_numbers = #tpu.dot_dimension_numbers<[1], [0], [0], [1], [0, 0, 1, 1], [], []>} : vector<16x16xf32>, vector<16x16xf32>, vector<16x16xf32> -> vector<16x16xf32>
    %108 = arith.addf %103, %107 : vector<16x16xf32>
    %c1_123 = arith.constant 1 : index
    %c3_124 = arith.constant 3 : index
    %c0_125 = arith.constant 0 : index
    %109 = vector.load %arg16[%c1_123, %c3_124, %c0_125] : memref<8x8x16xf32, #tpu.memory_space<vmem>>, vector<4x4x16xf32>
    %110 = vector.shape_cast %109 : vector<4x4x16xf32> to vector<16x16xf32>
    %c128_126 = arith.constant 128 : index
    %c0_127 = arith.constant 0 : index
    %111 = vector.load %arg4[%c128_126, %c0_127] : memref<400x16xf32, #tpu.memory_space<vmem>>, vector<16x16xf32>
    %cst_128 = arith.constant dense<0.000000e+00> : vector<16x16xf32>
    %112 = tpu.matmul %110, %111, %cst_128 {dimension_numbers = #tpu.dot_dimension_numbers<[1], [0], [0], [1], [0, 0, 1, 1], [], []>} : vector<16x16xf32>, vector<16x16xf32>, vector<16x16xf32> -> vector<16x16xf32>
    %113 = arith.addf %108, %112 : vector<16x16xf32>
    %c1_129 = arith.constant 1 : index
    %c4_130 = arith.constant 4 : index
    %c0_131 = arith.constant 0 : index
    %114 = vector.load %arg16[%c1_129, %c4_130, %c0_131] : memref<8x8x16xf32, #tpu.memory_space<vmem>>, vector<4x4x16xf32>
    %115 = vector.shape_cast %114 : vector<4x4x16xf32> to vector<16x16xf32>
    %c144 = arith.constant 144 : index
    %c0_132 = arith.constant 0 : index
    %116 = vector.load %arg4[%c144, %c0_132] : memref<400x16xf32, #tpu.memory_space<vmem>>, vector<16x16xf32>
    %cst_133 = arith.constant dense<0.000000e+00> : vector<16x16xf32>
    %117 = tpu.matmul %115, %116, %cst_133 {dimension_numbers = #tpu.dot_dimension_numbers<[1], [0], [0], [1], [0, 0, 1, 1], [], []>} : vector<16x16xf32>, vector<16x16xf32>, vector<16x16xf32> -> vector<16x16xf32>
    %118 = arith.addf %113, %117 : vector<16x16xf32>
    %c2_134 = arith.constant 2 : index
    %c0_135 = arith.constant 0 : index
    %c0_136 = arith.constant 0 : index
    %119 = vector.load %arg16[%c2_134, %c0_135, %c0_136] : memref<8x8x16xf32, #tpu.memory_space<vmem>>, vector<4x4x16xf32>
    %120 = vector.shape_cast %119 : vector<4x4x16xf32> to vector<16x16xf32>
    %c160 = arith.constant 160 : index
    %c0_137 = arith.constant 0 : index
    %121 = vector.load %arg4[%c160, %c0_137] : memref<400x16xf32, #tpu.memory_space<vmem>>, vector<16x16xf32>
    %cst_138 = arith.constant dense<0.000000e+00> : vector<16x16xf32>
    %122 = tpu.matmul %120, %121, %cst_138 {dimension_numbers = #tpu.dot_dimension_numbers<[1], [0], [0], [1], [0, 0, 1, 1], [], []>} : vector<16x16xf32>, vector<16x16xf32>, vector<16x16xf32> -> vector<16x16xf32>
    %123 = arith.addf %118, %122 : vector<16x16xf32>
    %c2_139 = arith.constant 2 : index
    %c1_140 = arith.constant 1 : index
    %c0_141 = arith.constant 0 : index
    %124 = vector.load %arg16[%c2_139, %c1_140, %c0_141] : memref<8x8x16xf32, #tpu.memory_space<vmem>>, vector<4x4x16xf32>
    %125 = vector.shape_cast %124 : vector<4x4x16xf32> to vector<16x16xf32>
    %c176 = arith.constant 176 : index
    %c0_142 = arith.constant 0 : index
    %126 = vector.load %arg4[%c176, %c0_142] : memref<400x16xf32, #tpu.memory_space<vmem>>, vector<16x16xf32>
    %cst_143 = arith.constant dense<0.000000e+00> : vector<16x16xf32>
    %127 = tpu.matmul %125, %126, %cst_143 {dimension_numbers = #tpu.dot_dimension_numbers<[1], [0], [0], [1], [0, 0, 1, 1], [], []>} : vector<16x16xf32>, vector<16x16xf32>, vector<16x16xf32> -> vector<16x16xf32>
    %128 = arith.addf %123, %127 : vector<16x16xf32>
    %c2_144 = arith.constant 2 : index
    %c2_145 = arith.constant 2 : index
    %c0_146 = arith.constant 0 : index
    %129 = vector.load %arg16[%c2_144, %c2_145, %c0_146] : memref<8x8x16xf32, #tpu.memory_space<vmem>>, vector<4x4x16xf32>
    %130 = vector.shape_cast %129 : vector<4x4x16xf32> to vector<16x16xf32>
    %c192_147 = arith.constant 192 : index
    %c0_148 = arith.constant 0 : index
    %131 = vector.load %arg4[%c192_147, %c0_148] : memref<400x16xf32, #tpu.memory_space<vmem>>, vector<16x16xf32>
    %cst_149 = arith.constant dense<0.000000e+00> : vector<16x16xf32>
    %132 = tpu.matmul %130, %131, %cst_149 {dimension_numbers = #tpu.dot_dimension_numbers<[1], [0], [0], [1], [0, 0, 1, 1], [], []>} : vector<16x16xf32>, vector<16x16xf32>, vector<16x16xf32> -> vector<16x16xf32>
    %133 = arith.addf %128, %132 : vector<16x16xf32>
    %c2_150 = arith.constant 2 : index
    %c3_151 = arith.constant 3 : index
    %c0_152 = arith.constant 0 : index
    %134 = vector.load %arg16[%c2_150, %c3_151, %c0_152] : memref<8x8x16xf32, #tpu.memory_space<vmem>>, vector<4x4x16xf32>
    %135 = vector.shape_cast %134 : vector<4x4x16xf32> to vector<16x16xf32>
    %c208 = arith.constant 208 : index
    %c0_153 = arith.constant 0 : index
    %136 = vector.load %arg4[%c208, %c0_153] : memref<400x16xf32, #tpu.memory_space<vmem>>, vector<16x16xf32>
    %cst_154 = arith.constant dense<0.000000e+00> : vector<16x16xf32>
    %137 = tpu.matmul %135, %136, %cst_154 {dimension_numbers = #tpu.dot_dimension_numbers<[1], [0], [0], [1], [0, 0, 1, 1], [], []>} : vector<16x16xf32>, vector<16x16xf32>, vector<16x16xf32> -> vector<16x16xf32>
    %138 = arith.addf %133, %137 : vector<16x16xf32>
    %c2_155 = arith.constant 2 : index
    %c4_156 = arith.constant 4 : index
    %c0_157 = arith.constant 0 : index
    %139 = vector.load %arg16[%c2_155, %c4_156, %c0_157] : memref<8x8x16xf32, #tpu.memory_space<vmem>>, vector<4x4x16xf32>
    %140 = vector.shape_cast %139 : vector<4x4x16xf32> to vector<16x16xf32>
    %c224 = arith.constant 224 : index
    %c0_158 = arith.constant 0 : index
    %141 = vector.load %arg4[%c224, %c0_158] : memref<400x16xf32, #tpu.memory_space<vmem>>, vector<16x16xf32>
    %cst_159 = arith.constant dense<0.000000e+00> : vector<16x16xf32>
    %142 = tpu.matmul %140, %141, %cst_159 {dimension_numbers = #tpu.dot_dimension_numbers<[1], [0], [0], [1], [0, 0, 1, 1], [], []>} : vector<16x16xf32>, vector<16x16xf32>, vector<16x16xf32> -> vector<16x16xf32>
    %143 = arith.addf %138, %142 : vector<16x16xf32>
    %c3_160 = arith.constant 3 : index
    %c0_161 = arith.constant 0 : index
    %c0_162 = arith.constant 0 : index
    %144 = vector.load %arg16[%c3_160, %c0_161, %c0_162] : memref<8x8x16xf32, #tpu.memory_space<vmem>>, vector<4x4x16xf32>
    %145 = vector.shape_cast %144 : vector<4x4x16xf32> to vector<16x16xf32>
    %c240 = arith.constant 240 : index
    %c0_163 = arith.constant 0 : index
    %146 = vector.load %arg4[%c240, %c0_163] : memref<400x16xf32, #tpu.memory_space<vmem>>, vector<16x16xf32>
    %cst_164 = arith.constant dense<0.000000e+00> : vector<16x16xf32>
    %147 = tpu.matmul %145, %146, %cst_164 {dimension_numbers = #tpu.dot_dimension_numbers<[1], [0], [0], [1], [0, 0, 1, 1], [], []>} : vector<16x16xf32>, vector<16x16xf32>, vector<16x16xf32> -> vector<16x16xf32>
    %148 = arith.addf %143, %147 : vector<16x16xf32>
    %c3_165 = arith.constant 3 : index
    %c1_166 = arith.constant 1 : index
    %c0_167 = arith.constant 0 : index
    %149 = vector.load %arg16[%c3_165, %c1_166, %c0_167] : memref<8x8x16xf32, #tpu.memory_space<vmem>>, vector<4x4x16xf32>
    %150 = vector.shape_cast %149 : vector<4x4x16xf32> to vector<16x16xf32>
    %c256_168 = arith.constant 256 : index
    %c0_169 = arith.constant 0 : index
    %151 = vector.load %arg4[%c256_168, %c0_169] : memref<400x16xf32, #tpu.memory_space<vmem>>, vector<16x16xf32>
    %cst_170 = arith.constant dense<0.000000e+00> : vector<16x16xf32>
    %152 = tpu.matmul %150, %151, %cst_170 {dimension_numbers = #tpu.dot_dimension_numbers<[1], [0], [0], [1], [0, 0, 1, 1], [], []>} : vector<16x16xf32>, vector<16x16xf32>, vector<16x16xf32> -> vector<16x16xf32>
    %153 = arith.addf %148, %152 : vector<16x16xf32>
    %c3_171 = arith.constant 3 : index
    %c2_172 = arith.constant 2 : index
    %c0_173 = arith.constant 0 : index
    %154 = vector.load %arg16[%c3_171, %c2_172, %c0_173] : memref<8x8x16xf32, #tpu.memory_space<vmem>>, vector<4x4x16xf32>
    %155 = vector.shape_cast %154 : vector<4x4x16xf32> to vector<16x16xf32>
    %c272 = arith.constant 272 : index
    %c0_174 = arith.constant 0 : index
    %156 = vector.load %arg4[%c272, %c0_174] : memref<400x16xf32, #tpu.memory_space<vmem>>, vector<16x16xf32>
    %cst_175 = arith.constant dense<0.000000e+00> : vector<16x16xf32>
    %157 = tpu.matmul %155, %156, %cst_175 {dimension_numbers = #tpu.dot_dimension_numbers<[1], [0], [0], [1], [0, 0, 1, 1], [], []>} : vector<16x16xf32>, vector<16x16xf32>, vector<16x16xf32> -> vector<16x16xf32>
    %158 = arith.addf %153, %157 : vector<16x16xf32>
    %c3_176 = arith.constant 3 : index
    %c3_177 = arith.constant 3 : index
    %c0_178 = arith.constant 0 : index
    %159 = vector.load %arg16[%c3_176, %c3_177, %c0_178] : memref<8x8x16xf32, #tpu.memory_space<vmem>>, vector<4x4x16xf32>
    %160 = vector.shape_cast %159 : vector<4x4x16xf32> to vector<16x16xf32>
    %c288 = arith.constant 288 : index
    %c0_179 = arith.constant 0 : index
    %161 = vector.load %arg4[%c288, %c0_179] : memref<400x16xf32, #tpu.memory_space<vmem>>, vector<16x16xf32>
    %cst_180 = arith.constant dense<0.000000e+00> : vector<16x16xf32>
    %162 = tpu.matmul %160, %161, %cst_180 {dimension_numbers = #tpu.dot_dimension_numbers<[1], [0], [0], [1], [0, 0, 1, 1], [], []>} : vector<16x16xf32>, vector<16x16xf32>, vector<16x16xf32> -> vector<16x16xf32>
    %163 = arith.addf %158, %162 : vector<16x16xf32>
    %c3_181 = arith.constant 3 : index
    %c4_182 = arith.constant 4 : index
    %c0_183 = arith.constant 0 : index
    %164 = vector.load %arg16[%c3_181, %c4_182, %c0_183] : memref<8x8x16xf32, #tpu.memory_space<vmem>>, vector<4x4x16xf32>
    %165 = vector.shape_cast %164 : vector<4x4x16xf32> to vector<16x16xf32>
    %c304 = arith.constant 304 : index
    %c0_184 = arith.constant 0 : index
    %166 = vector.load %arg4[%c304, %c0_184] : memref<400x16xf32, #tpu.memory_space<vmem>>, vector<16x16xf32>
    %cst_185 = arith.constant dense<0.000000e+00> : vector<16x16xf32>
    %167 = tpu.matmul %165, %166, %cst_185 {dimension_numbers = #tpu.dot_dimension_numbers<[1], [0], [0], [1], [0, 0, 1, 1], [], []>} : vector<16x16xf32>, vector<16x16xf32>, vector<16x16xf32> -> vector<16x16xf32>
    %168 = arith.addf %163, %167 : vector<16x16xf32>
    %c4_186 = arith.constant 4 : index
    %c0_187 = arith.constant 0 : index
    %c0_188 = arith.constant 0 : index
    %169 = vector.load %arg16[%c4_186, %c0_187, %c0_188] : memref<8x8x16xf32, #tpu.memory_space<vmem>>, vector<4x4x16xf32>
    %170 = vector.shape_cast %169 : vector<4x4x16xf32> to vector<16x16xf32>
    %c320_189 = arith.constant 320 : index
    %c0_190 = arith.constant 0 : index
    %171 = vector.load %arg4[%c320_189, %c0_190] : memref<400x16xf32, #tpu.memory_space<vmem>>, vector<16x16xf32>
    %cst_191 = arith.constant dense<0.000000e+00> : vector<16x16xf32>
    %172 = tpu.matmul %170, %171, %cst_191 {dimension_numbers = #tpu.dot_dimension_numbers<[1], [0], [0], [1], [0, 0, 1, 1], [], []>} : vector<16x16xf32>, vector<16x16xf32>, vector<16x16xf32> -> vector<16x16xf32>
    %173 = arith.addf %168, %172 : vector<16x16xf32>
    %c4_192 = arith.constant 4 : index
    %c1_193 = arith.constant 1 : index
    %c0_194 = arith.constant 0 : index
    %174 = vector.load %arg16[%c4_192, %c1_193, %c0_194] : memref<8x8x16xf32, #tpu.memory_space<vmem>>, vector<4x4x16xf32>
    %175 = vector.shape_cast %174 : vector<4x4x16xf32> to vector<16x16xf32>
    %c336 = arith.constant 336 : index
    %c0_195 = arith.constant 0 : index
    %176 = vector.load %arg4[%c336, %c0_195] : memref<400x16xf32, #tpu.memory_space<vmem>>, vector<16x16xf32>
    %cst_196 = arith.constant dense<0.000000e+00> : vector<16x16xf32>
    %177 = tpu.matmul %175, %176, %cst_196 {dimension_numbers = #tpu.dot_dimension_numbers<[1], [0], [0], [1], [0, 0, 1, 1], [], []>} : vector<16x16xf32>, vector<16x16xf32>, vector<16x16xf32> -> vector<16x16xf32>
    %178 = arith.addf %173, %177 : vector<16x16xf32>
    %c4_197 = arith.constant 4 : index
    %c2_198 = arith.constant 2 : index
    %c0_199 = arith.constant 0 : index
    %179 = vector.load %arg16[%c4_197, %c2_198, %c0_199] : memref<8x8x16xf32, #tpu.memory_space<vmem>>, vector<4x4x16xf32>
    %180 = vector.shape_cast %179 : vector<4x4x16xf32> to vector<16x16xf32>
    %c352 = arith.constant 352 : index
    %c0_200 = arith.constant 0 : index
    %181 = vector.load %arg4[%c352, %c0_200] : memref<400x16xf32, #tpu.memory_space<vmem>>, vector<16x16xf32>
    %cst_201 = arith.constant dense<0.000000e+00> : vector<16x16xf32>
    %182 = tpu.matmul %180, %181, %cst_201 {dimension_numbers = #tpu.dot_dimension_numbers<[1], [0], [0], [1], [0, 0, 1, 1], [], []>} : vector<16x16xf32>, vector<16x16xf32>, vector<16x16xf32> -> vector<16x16xf32>
    %183 = arith.addf %178, %182 : vector<16x16xf32>
    %c4_202 = arith.constant 4 : index
    %c3_203 = arith.constant 3 : index
    %c0_204 = arith.constant 0 : index
    %184 = vector.load %arg16[%c4_202, %c3_203, %c0_204] : memref<8x8x16xf32, #tpu.memory_space<vmem>>, vector<4x4x16xf32>
    %185 = vector.shape_cast %184 : vector<4x4x16xf32> to vector<16x16xf32>
    %c368 = arith.constant 368 : index
    %c0_205 = arith.constant 0 : index
    %186 = vector.load %arg4[%c368, %c0_205] : memref<400x16xf32, #tpu.memory_space<vmem>>, vector<16x16xf32>
    %cst_206 = arith.constant dense<0.000000e+00> : vector<16x16xf32>
    %187 = tpu.matmul %185, %186, %cst_206 {dimension_numbers = #tpu.dot_dimension_numbers<[1], [0], [0], [1], [0, 0, 1, 1], [], []>} : vector<16x16xf32>, vector<16x16xf32>, vector<16x16xf32> -> vector<16x16xf32>
    %188 = arith.addf %183, %187 : vector<16x16xf32>
    %c4_207 = arith.constant 4 : index
    %c4_208 = arith.constant 4 : index
    %c0_209 = arith.constant 0 : index
    %189 = vector.load %arg16[%c4_207, %c4_208, %c0_209] : memref<8x8x16xf32, #tpu.memory_space<vmem>>, vector<4x4x16xf32>
    %190 = vector.shape_cast %189 : vector<4x4x16xf32> to vector<16x16xf32>
    %c384_210 = arith.constant 384 : index
    %c0_211 = arith.constant 0 : index
    %191 = vector.load %arg4[%c384_210, %c0_211] : memref<400x16xf32, #tpu.memory_space<vmem>>, vector<16x16xf32>
    %cst_212 = arith.constant dense<0.000000e+00> : vector<16x16xf32>
    %192 = tpu.matmul %190, %191, %cst_212 {dimension_numbers = #tpu.dot_dimension_numbers<[1], [0], [0], [1], [0, 0, 1, 1], [], []>} : vector<16x16xf32>, vector<16x16xf32>, vector<16x16xf32> -> vector<16x16xf32>
    %193 = arith.addf %188, %192 : vector<16x16xf32>
    %c0_213 = arith.constant 0 : index
    %c0_214 = arith.constant 0 : index
    %194 = vector.load %arg5[%c0_213, %c0_214] : memref<1x16xf32, #tpu.memory_space<vmem>>, vector<1x16xf32>
    %195 = vector.broadcast %194 : vector<1x16xf32> to vector<16x16xf32>
    %196 = arith.addf %193, %195 : vector<16x16xf32>
    %cst_215 = arith.constant 0.000000e+00 : f32
    %197 = vector.broadcast %cst_215 : f32 to vector<16x16xf32>
    %198 = arith.maximumf %196, %197 : vector<16x16xf32>
    %199 = vector.shape_cast %198 : vector<16x16xf32> to vector<4x4x16xf32>
    %cst_216 = arith.constant 0.000000e+00 : f32
    %200 = vector.broadcast %cst_216 : f32 to vector<1x6x16xf32>
    %c0_217 = arith.constant 0 : index
    %c0_218 = arith.constant 0 : index
    %c0_219 = arith.constant 0 : index
    %201 = vector.load %arg17[%c0_217, %c0_218, %c0_219] : memref<6x6x16xf32, #tpu.memory_space<vmem>>, vector<1x6x16xf32>
    tpu.vector_store %arg17[%c0_217, %c0_218, %c0_219], %200 {strides = array<i32>} : memref<6x6x16xf32, #tpu.memory_space<vmem>>, vector<1x6x16xf32>,
    %c5_220 = arith.constant 5 : index
    %c0_221 = arith.constant 0 : index
    %c0_222 = arith.constant 0 : index
    %202 = vector.load %arg17[%c5_220, %c0_221, %c0_222] : memref<6x6x16xf32, #tpu.memory_space<vmem>>, vector<1x6x16xf32>
    tpu.vector_store %arg17[%c5_220, %c0_221, %c0_222], %200 {strides = array<i32>} : memref<6x6x16xf32, #tpu.memory_space<vmem>>, vector<1x6x16xf32>,
    %cst_223 = arith.constant 0.000000e+00 : f32
    %203 = vector.broadcast %cst_223 : f32 to vector<4x1x16xf32>
    %c1_224 = arith.constant 1 : index
    %c0_225 = arith.constant 0 : index
    %c0_226 = arith.constant 0 : index
    %204 = vector.load %arg17[%c1_224, %c0_225, %c0_226] : memref<6x6x16xf32, #tpu.memory_space<vmem>>, vector<4x1x16xf32>
    tpu.vector_store %arg17[%c1_224, %c0_225, %c0_226], %203 {strides = array<i32>} : memref<6x6x16xf32, #tpu.memory_space<vmem>>, vector<4x1x16xf32>,
    %c1_227 = arith.constant 1 : index
    %c5_228 = arith.constant 5 : index
    %c0_229 = arith.constant 0 : index
    %205 = vector.load %arg17[%c1_227, %c5_228, %c0_229] : memref<6x6x16xf32, #tpu.memory_space<vmem>>, vector<4x1x16xf32>
    tpu.vector_store %arg17[%c1_227, %c5_228, %c0_229], %203 {strides = array<i32>} : memref<6x6x16xf32, #tpu.memory_space<vmem>>, vector<4x1x16xf32>,
    %c1_230 = arith.constant 1 : index
    %c1_231 = arith.constant 1 : index
    %c0_232 = arith.constant 0 : index
    %206 = vector.load %arg17[%c1_230, %c1_231, %c0_232] : memref<6x6x16xf32, #tpu.memory_space<vmem>>, vector<4x4x16xf32>
    tpu.vector_store %arg17[%c1_230, %c1_231, %c0_232], %199 {strides = array<i32>} : memref<6x6x16xf32, #tpu.memory_space<vmem>>, vector<4x4x16xf32>,
    %cst_233 = arith.constant 0.000000e+00 : f32
    %207 = vector.broadcast %cst_233 : f32 to vector<16x64xf32>
    %c0_234 = arith.constant 0 : index
    %c0_235 = arith.constant 0 : index
    %c0_236 = arith.constant 0 : index
    %208 = vector.load %arg17[%c0_234, %c0_235, %c0_236] : memref<6x6x16xf32, #tpu.memory_space<vmem>>, vector<4x4x16xf32>
    %209 = vector.shape_cast %208 : vector<4x4x16xf32> to vector<16x16xf32>
    %c0_237 = arith.constant 0 : index
    %c0_238 = arith.constant 0 : index
    %210 = vector.load %arg6[%c0_237, %c0_238] : memref<144x64xf32, #tpu.memory_space<vmem>>, vector<16x64xf32>
    %cst_239 = arith.constant dense<0.000000e+00> : vector<16x64xf32>
    %211 = tpu.matmul %209, %210, %cst_239 {dimension_numbers = #tpu.dot_dimension_numbers<[1], [0], [0], [1], [0, 0, 1, 1], [], []>} : vector<16x16xf32>, vector<16x64xf32>, vector<16x64xf32> -> vector<16x64xf32>
    %212 = arith.addf %207, %211 : vector<16x64xf32>
    %c0_240 = arith.constant 0 : index
    %c1_241 = arith.constant 1 : index
    %c0_242 = arith.constant 0 : index
    %213 = vector.load %arg17[%c0_240, %c1_241, %c0_242] : memref<6x6x16xf32, #tpu.memory_space<vmem>>, vector<4x4x16xf32>
    %214 = vector.shape_cast %213 : vector<4x4x16xf32> to vector<16x16xf32>
    %c16_243 = arith.constant 16 : index
    %c0_244 = arith.constant 0 : index
    %215 = vector.load %arg6[%c16_243, %c0_244] : memref<144x64xf32, #tpu.memory_space<vmem>>, vector<16x64xf32>
    %cst_245 = arith.constant dense<0.000000e+00> : vector<16x64xf32>
    %216 = tpu.matmul %214, %215, %cst_245 {dimension_numbers = #tpu.dot_dimension_numbers<[1], [0], [0], [1], [0, 0, 1, 1], [], []>} : vector<16x16xf32>, vector<16x64xf32>, vector<16x64xf32> -> vector<16x64xf32>
    %217 = arith.addf %212, %216 : vector<16x64xf32>
    %c0_246 = arith.constant 0 : index
    %c2_247 = arith.constant 2 : index
    %c0_248 = arith.constant 0 : index
    %218 = vector.load %arg17[%c0_246, %c2_247, %c0_248] : memref<6x6x16xf32, #tpu.memory_space<vmem>>, vector<4x4x16xf32>
    %219 = vector.shape_cast %218 : vector<4x4x16xf32> to vector<16x16xf32>
    %c32_249 = arith.constant 32 : index
    %c0_250 = arith.constant 0 : index
    %220 = vector.load %arg6[%c32_249, %c0_250] : memref<144x64xf32, #tpu.memory_space<vmem>>, vector<16x64xf32>
    %cst_251 = arith.constant dense<0.000000e+00> : vector<16x64xf32>
    %221 = tpu.matmul %219, %220, %cst_251 {dimension_numbers = #tpu.dot_dimension_numbers<[1], [0], [0], [1], [0, 0, 1, 1], [], []>} : vector<16x16xf32>, vector<16x64xf32>, vector<16x64xf32> -> vector<16x64xf32>
    %222 = arith.addf %217, %221 : vector<16x64xf32>
    %c1_252 = arith.constant 1 : index
    %c0_253 = arith.constant 0 : index
    %c0_254 = arith.constant 0 : index
    %223 = vector.load %arg17[%c1_252, %c0_253, %c0_254] : memref<6x6x16xf32, #tpu.memory_space<vmem>>, vector<4x4x16xf32>
    %224 = vector.shape_cast %223 : vector<4x4x16xf32> to vector<16x16xf32>
    %c48_255 = arith.constant 48 : index
    %c0_256 = arith.constant 0 : index
    %225 = vector.load %arg6[%c48_255, %c0_256] : memref<144x64xf32, #tpu.memory_space<vmem>>, vector<16x64xf32>
    %cst_257 = arith.constant dense<0.000000e+00> : vector<16x64xf32>
    %226 = tpu.matmul %224, %225, %cst_257 {dimension_numbers = #tpu.dot_dimension_numbers<[1], [0], [0], [1], [0, 0, 1, 1], [], []>} : vector<16x16xf32>, vector<16x64xf32>, vector<16x64xf32> -> vector<16x64xf32>
    %227 = arith.addf %222, %226 : vector<16x64xf32>
    %c1_258 = arith.constant 1 : index
    %c1_259 = arith.constant 1 : index
    %c0_260 = arith.constant 0 : index
    %228 = vector.load %arg17[%c1_258, %c1_259, %c0_260] : memref<6x6x16xf32, #tpu.memory_space<vmem>>, vector<4x4x16xf32>
    %229 = vector.shape_cast %228 : vector<4x4x16xf32> to vector<16x16xf32>
    %c64_261 = arith.constant 64 : index
    %c0_262 = arith.constant 0 : index
    %230 = vector.load %arg6[%c64_261, %c0_262] : memref<144x64xf32, #tpu.memory_space<vmem>>, vector<16x64xf32>
    %cst_263 = arith.constant dense<0.000000e+00> : vector<16x64xf32>
    %231 = tpu.matmul %229, %230, %cst_263 {dimension_numbers = #tpu.dot_dimension_numbers<[1], [0], [0], [1], [0, 0, 1, 1], [], []>} : vector<16x16xf32>, vector<16x64xf32>, vector<16x64xf32> -> vector<16x64xf32>
    %232 = arith.addf %227, %231 : vector<16x64xf32>
    %c1_264 = arith.constant 1 : index
    %c2_265 = arith.constant 2 : index
    %c0_266 = arith.constant 0 : index
    %233 = vector.load %arg17[%c1_264, %c2_265, %c0_266] : memref<6x6x16xf32, #tpu.memory_space<vmem>>, vector<4x4x16xf32>
    %234 = vector.shape_cast %233 : vector<4x4x16xf32> to vector<16x16xf32>
    %c80_267 = arith.constant 80 : index
    %c0_268 = arith.constant 0 : index
    %235 = vector.load %arg6[%c80_267, %c0_268] : memref<144x64xf32, #tpu.memory_space<vmem>>, vector<16x64xf32>
    %cst_269 = arith.constant dense<0.000000e+00> : vector<16x64xf32>
    %236 = tpu.matmul %234, %235, %cst_269 {dimension_numbers = #tpu.dot_dimension_numbers<[1], [0], [0], [1], [0, 0, 1, 1], [], []>} : vector<16x16xf32>, vector<16x64xf32>, vector<16x64xf32> -> vector<16x64xf32>
    %237 = arith.addf %232, %236 : vector<16x64xf32>
    %c2_270 = arith.constant 2 : index
    %c0_271 = arith.constant 0 : index
    %c0_272 = arith.constant 0 : index
    %238 = vector.load %arg17[%c2_270, %c0_271, %c0_272] : memref<6x6x16xf32, #tpu.memory_space<vmem>>, vector<4x4x16xf32>
    %239 = vector.shape_cast %238 : vector<4x4x16xf32> to vector<16x16xf32>
    %c96_273 = arith.constant 96 : index
    %c0_274 = arith.constant 0 : index
    %240 = vector.load %arg6[%c96_273, %c0_274] : memref<144x64xf32, #tpu.memory_space<vmem>>, vector<16x64xf32>
    %cst_275 = arith.constant dense<0.000000e+00> : vector<16x64xf32>
    %241 = tpu.matmul %239, %240, %cst_275 {dimension_numbers = #tpu.dot_dimension_numbers<[1], [0], [0], [1], [0, 0, 1, 1], [], []>} : vector<16x16xf32>, vector<16x64xf32>, vector<16x64xf32> -> vector<16x64xf32>
    %242 = arith.addf %237, %241 : vector<16x64xf32>
    %c2_276 = arith.constant 2 : index
    %c1_277 = arith.constant 1 : index
    %c0_278 = arith.constant 0 : index
    %243 = vector.load %arg17[%c2_276, %c1_277, %c0_278] : memref<6x6x16xf32, #tpu.memory_space<vmem>>, vector<4x4x16xf32>
    %244 = vector.shape_cast %243 : vector<4x4x16xf32> to vector<16x16xf32>
    %c112_279 = arith.constant 112 : index
    %c0_280 = arith.constant 0 : index
    %245 = vector.load %arg6[%c112_279, %c0_280] : memref<144x64xf32, #tpu.memory_space<vmem>>, vector<16x64xf32>
    %cst_281 = arith.constant dense<0.000000e+00> : vector<16x64xf32>
    %246 = tpu.matmul %244, %245, %cst_281 {dimension_numbers = #tpu.dot_dimension_numbers<[1], [0], [0], [1], [0, 0, 1, 1], [], []>} : vector<16x16xf32>, vector<16x64xf32>, vector<16x64xf32> -> vector<16x64xf32>
    %247 = arith.addf %242, %246 : vector<16x64xf32>
    %c2_282 = arith.constant 2 : index
    %c2_283 = arith.constant 2 : index
    %c0_284 = arith.constant 0 : index
    %248 = vector.load %arg17[%c2_282, %c2_283, %c0_284] : memref<6x6x16xf32, #tpu.memory_space<vmem>>, vector<4x4x16xf32>
    %249 = vector.shape_cast %248 : vector<4x4x16xf32> to vector<16x16xf32>
    %c128_285 = arith.constant 128 : index
    %c0_286 = arith.constant 0 : index
    %250 = vector.load %arg6[%c128_285, %c0_286] : memref<144x64xf32, #tpu.memory_space<vmem>>, vector<16x64xf32>
    %cst_287 = arith.constant dense<0.000000e+00> : vector<16x64xf32>
    %251 = tpu.matmul %249, %250, %cst_287 {dimension_numbers = #tpu.dot_dimension_numbers<[1], [0], [0], [1], [0, 0, 1, 1], [], []>} : vector<16x16xf32>, vector<16x64xf32>, vector<16x64xf32> -> vector<16x64xf32>
    %252 = arith.addf %247, %251 : vector<16x64xf32>
    %c0_288 = arith.constant 0 : index
    %c0_289 = arith.constant 0 : index
    %253 = vector.load %arg7[%c0_288, %c0_289] : memref<1x64xf32, #tpu.memory_space<vmem>>, vector<1x64xf32>
    %254 = vector.broadcast %253 : vector<1x64xf32> to vector<16x64xf32>
    %255 = arith.addf %252, %254 : vector<16x64xf32>
    %c0_290 = arith.constant 0 : index
    %c0_291 = arith.constant 0 : index
    %256 = vector.load %arg18[%c0_290, %c0_291] : memref<16x64xf32, #tpu.memory_space<vmem>>, vector<16x64xf32>
    tpu.vector_store %arg18[%c0_290, %c0_291], %255 {strides = array<i32>} : memref<16x64xf32, #tpu.memory_space<vmem>>, vector<16x64xf32>,
    %cst_292 = arith.constant 0.000000e+00 : f32
    %257 = vector.broadcast %cst_292 : f32 to vector<1x4x256xf32>
    %c0_293 = arith.constant 0 : index
    %c0_294 = arith.constant 0 : index
    %c0_295 = arith.constant 0 : index
    %258 = vector.load %arg19[%c0_293, %c0_294, %c0_295] : memref<4x4x256xf32, #tpu.memory_space<vmem>>, vector<1x4x256xf32>
    tpu.vector_store %arg19[%c0_293, %c0_294, %c0_295], %257 {strides = array<i32>} : memref<4x4x256xf32, #tpu.memory_space<vmem>>, vector<1x4x256xf32>,
    %c3_296 = arith.constant 3 : index
    %c0_297 = arith.constant 0 : index
    %c0_298 = arith.constant 0 : index
    %259 = vector.load %arg19[%c3_296, %c0_297, %c0_298] : memref<4x4x256xf32, #tpu.memory_space<vmem>>, vector<1x4x256xf32>
    tpu.vector_store %arg19[%c3_296, %c0_297, %c0_298], %257 {strides = array<i32>} : memref<4x4x256xf32, #tpu.memory_space<vmem>>, vector<1x4x256xf32>,
    %cst_299 = arith.constant 0.000000e+00 : f32
    %260 = vector.broadcast %cst_299 : f32 to vector<2x1x256xf32>
    %c1_300 = arith.constant 1 : index
    %c0_301 = arith.constant 0 : index
    %c0_302 = arith.constant 0 : index
    %261 = vector.load %arg19[%c1_300, %c0_301, %c0_302] : memref<4x4x256xf32, #tpu.memory_space<vmem>>, vector<2x1x256xf32>
    tpu.vector_store %arg19[%c1_300, %c0_301, %c0_302], %260 {strides = array<i32>} : memref<4x4x256xf32, #tpu.memory_space<vmem>>, vector<2x1x256xf32>,
    %c1_303 = arith.constant 1 : index
    %c3_304 = arith.constant 3 : index
    %c0_305 = arith.constant 0 : index
    %262 = vector.load %arg19[%c1_303, %c3_304, %c0_305] : memref<4x4x256xf32, #tpu.memory_space<vmem>>, vector<2x1x256xf32>
    tpu.vector_store %arg19[%c1_303, %c3_304, %c0_305], %260 {strides = array<i32>} : memref<4x4x256xf32, #tpu.memory_space<vmem>>, vector<2x1x256xf32>,
    %c0_306 = arith.constant 0 : index
    %c0_307 = arith.constant 0 : index
    %263 = tpu.strided_load %arg18[%c0_306, %c0_307] {strides = array<i32: 2, 1>} : memref<16x64xf32, #tpu.memory_space<vmem>>, vector<2x64xf32>
    %264 = vector.shape_cast %263 : vector<2x64xf32> to vector<1x2x64xf32>
    %c1_308 = arith.constant 1 : index
    %c1_309 = arith.constant 1 : index
    %c0_310 = arith.constant 0 : index
    %265 = vector.load %arg19[%c1_308, %c1_309, %c0_310] : memref<4x4x256xf32, #tpu.memory_space<vmem>>, vector<1x2x64xf32>
    tpu.vector_store %arg19[%c1_308, %c1_309, %c0_310], %264 {strides = array<i32>} : memref<4x4x256xf32, #tpu.memory_space<vmem>>, vector<1x2x64xf32>,
    %c1_311 = arith.constant 1 : index
    %c0_312 = arith.constant 0 : index
    %266 = tpu.strided_load %arg18[%c1_311, %c0_312] {strides = array<i32: 2, 1>} : memref<16x64xf32, #tpu.memory_space<vmem>>, vector<2x64xf32>
    %267 = vector.shape_cast %266 : vector<2x64xf32> to vector<1x2x64xf32>
    %c1_313 = arith.constant 1 : index
    %c1_314 = arith.constant 1 : index
    %c64_315 = arith.constant 64 : index
    %268 = vector.load %arg19[%c1_313, %c1_314, %c64_315] : memref<4x4x256xf32, #tpu.memory_space<vmem>>, vector<1x2x64xf32>
    tpu.vector_store %arg19[%c1_313, %c1_314, %c64_315], %267 {strides = array<i32>} : memref<4x4x256xf32, #tpu.memory_space<vmem>>, vector<1x2x64xf32>,
    %c4_316 = arith.constant 4 : index
    %c0_317 = arith.constant 0 : index
    %269 = tpu.strided_load %arg18[%c4_316, %c0_317] {strides = array<i32: 2, 1>} : memref<16x64xf32, #tpu.memory_space<vmem>>, vector<2x64xf32>
    %270 = vector.shape_cast %269 : vector<2x64xf32> to vector<1x2x64xf32>
    %c1_318 = arith.constant 1 : index
    %c1_319 = arith.constant 1 : index
    %c128_320 = arith.constant 128 : index
    %271 = vector.load %arg19[%c1_318, %c1_319, %c128_320] : memref<4x4x256xf32, #tpu.memory_space<vmem>>, vector<1x2x64xf32>
    tpu.vector_store %arg19[%c1_318, %c1_319, %c128_320], %270 {strides = array<i32>} : memref<4x4x256xf32, #tpu.memory_space<vmem>>, vector<1x2x64xf32>,
    %c5_321 = arith.constant 5 : index
    %c0_322 = arith.constant 0 : index
    %272 = tpu.strided_load %arg18[%c5_321, %c0_322] {strides = array<i32: 2, 1>} : memref<16x64xf32, #tpu.memory_space<vmem>>, vector<2x64xf32>
    %273 = vector.shape_cast %272 : vector<2x64xf32> to vector<1x2x64xf32>
    %c1_323 = arith.constant 1 : index
    %c1_324 = arith.constant 1 : index
    %c192_325 = arith.constant 192 : index
    %274 = vector.load %arg19[%c1_323, %c1_324, %c192_325] : memref<4x4x256xf32, #tpu.memory_space<vmem>>, vector<1x2x64xf32>
    tpu.vector_store %arg19[%c1_323, %c1_324, %c192_325], %273 {strides = array<i32>} : memref<4x4x256xf32, #tpu.memory_space<vmem>>, vector<1x2x64xf32>,
    %c8 = arith.constant 8 : index
    %c0_326 = arith.constant 0 : index
    %275 = tpu.strided_load %arg18[%c8, %c0_326] {strides = array<i32: 2, 1>} : memref<16x64xf32, #tpu.memory_space<vmem>>, vector<2x64xf32>
    %276 = vector.shape_cast %275 : vector<2x64xf32> to vector<1x2x64xf32>
    %c2_327 = arith.constant 2 : index
    %c1_328 = arith.constant 1 : index
    %c0_329 = arith.constant 0 : index
    %277 = vector.load %arg19[%c2_327, %c1_328, %c0_329] : memref<4x4x256xf32, #tpu.memory_space<vmem>>, vector<1x2x64xf32>
    tpu.vector_store %arg19[%c2_327, %c1_328, %c0_329], %276 {strides = array<i32>} : memref<4x4x256xf32, #tpu.memory_space<vmem>>, vector<1x2x64xf32>,
    %c9 = arith.constant 9 : index
    %c0_330 = arith.constant 0 : index
    %278 = tpu.strided_load %arg18[%c9, %c0_330] {strides = array<i32: 2, 1>} : memref<16x64xf32, #tpu.memory_space<vmem>>, vector<2x64xf32>
    %279 = vector.shape_cast %278 : vector<2x64xf32> to vector<1x2x64xf32>
    %c2_331 = arith.constant 2 : index
    %c1_332 = arith.constant 1 : index
    %c64_333 = arith.constant 64 : index
    %280 = vector.load %arg19[%c2_331, %c1_332, %c64_333] : memref<4x4x256xf32, #tpu.memory_space<vmem>>, vector<1x2x64xf32>
    tpu.vector_store %arg19[%c2_331, %c1_332, %c64_333], %279 {strides = array<i32>} : memref<4x4x256xf32, #tpu.memory_space<vmem>>, vector<1x2x64xf32>,
    %c12 = arith.constant 12 : index
    %c0_334 = arith.constant 0 : index
    %281 = tpu.strided_load %arg18[%c12, %c0_334] {strides = array<i32: 2, 1>} : memref<16x64xf32, #tpu.memory_space<vmem>>, vector<2x64xf32>
    %282 = vector.shape_cast %281 : vector<2x64xf32> to vector<1x2x64xf32>
    %c2_335 = arith.constant 2 : index
    %c1_336 = arith.constant 1 : index
    %c128_337 = arith.constant 128 : index
    %283 = vector.load %arg19[%c2_335, %c1_336, %c128_337] : memref<4x4x256xf32, #tpu.memory_space<vmem>>, vector<1x2x64xf32>
    tpu.vector_store %arg19[%c2_335, %c1_336, %c128_337], %282 {strides = array<i32>} : memref<4x4x256xf32, #tpu.memory_space<vmem>>, vector<1x2x64xf32>,
    %c13 = arith.constant 13 : index
    %c0_338 = arith.constant 0 : index
    %284 = tpu.strided_load %arg18[%c13, %c0_338] {strides = array<i32: 2, 1>} : memref<16x64xf32, #tpu.memory_space<vmem>>, vector<2x64xf32>
    %285 = vector.shape_cast %284 : vector<2x64xf32> to vector<1x2x64xf32>
    %c2_339 = arith.constant 2 : index
    %c1_340 = arith.constant 1 : index
    %c192_341 = arith.constant 192 : index
    %286 = vector.load %arg19[%c2_339, %c1_340, %c192_341] : memref<4x4x256xf32, #tpu.memory_space<vmem>>, vector<1x2x64xf32>
    tpu.vector_store %arg19[%c2_339, %c1_340, %c192_341], %285 {strides = array<i32>} : memref<4x4x256xf32, #tpu.memory_space<vmem>>, vector<1x2x64xf32>,
    %cst_342 = arith.constant 0.000000e+00 : f32
    %287 = vector.broadcast %cst_342 : f32 to vector<4x32xf32>
    %c0_343 = arith.constant 0 : index
    %c0_344 = arith.constant 0 : index
    %c0_345 = arith.constant 0 : index
    %288 = vector.load %arg19[%c0_343, %c0_344, %c0_345] : memref<4x4x256xf32, #tpu.memory_space<vmem>>, vector<2x2x256xf32>
    %289 = vector.shape_cast %288 : vector<2x2x256xf32> to vector<4x256xf32>
    %c0_346 = arith.constant 0 : index
    %c0_347 = arith.constant 0 : index
    %290 = vector.load %arg8[%c0_346, %c0_347] : memref<2304x32xf32, #tpu.memory_space<vmem>>, vector<256x32xf32>
    %cst_348 = arith.constant dense<0.000000e+00> : vector<4x32xf32>
    %291 = tpu.matmul %289, %290, %cst_348 {dimension_numbers = #tpu.dot_dimension_numbers<[1], [0], [0], [1], [0, 0, 1, 1], [], []>} : vector<4x256xf32>, vector<256x32xf32>, vector<4x32xf32> -> vector<4x32xf32>
    %292 = arith.addf %287, %291 : vector<4x32xf32>
    %c0_349 = arith.constant 0 : index
    %c1_350 = arith.constant 1 : index
    %c0_351 = arith.constant 0 : index
    %293 = vector.load %arg19[%c0_349, %c1_350, %c0_351] : memref<4x4x256xf32, #tpu.memory_space<vmem>>, vector<2x2x256xf32>
    %294 = vector.shape_cast %293 : vector<2x2x256xf32> to vector<4x256xf32>
    %c256_352 = arith.constant 256 : index
    %c0_353 = arith.constant 0 : index
    %295 = vector.load %arg8[%c256_352, %c0_353] : memref<2304x32xf32, #tpu.memory_space<vmem>>, vector<256x32xf32>
    %cst_354 = arith.constant dense<0.000000e+00> : vector<4x32xf32>
    %296 = tpu.matmul %294, %295, %cst_354 {dimension_numbers = #tpu.dot_dimension_numbers<[1], [0], [0], [1], [0, 0, 1, 1], [], []>} : vector<4x256xf32>, vector<256x32xf32>, vector<4x32xf32> -> vector<4x32xf32>
    %297 = arith.addf %292, %296 : vector<4x32xf32>
    %c0_355 = arith.constant 0 : index
    %c2_356 = arith.constant 2 : index
    %c0_357 = arith.constant 0 : index
    %298 = vector.load %arg19[%c0_355, %c2_356, %c0_357] : memref<4x4x256xf32, #tpu.memory_space<vmem>>, vector<2x2x256xf32>
    %299 = vector.shape_cast %298 : vector<2x2x256xf32> to vector<4x256xf32>
    %c512_358 = arith.constant 512 : index
    %c0_359 = arith.constant 0 : index
    %300 = vector.load %arg8[%c512_358, %c0_359] : memref<2304x32xf32, #tpu.memory_space<vmem>>, vector<256x32xf32>
    %cst_360 = arith.constant dense<0.000000e+00> : vector<4x32xf32>
    %301 = tpu.matmul %299, %300, %cst_360 {dimension_numbers = #tpu.dot_dimension_numbers<[1], [0], [0], [1], [0, 0, 1, 1], [], []>} : vector<4x256xf32>, vector<256x32xf32>, vector<4x32xf32> -> vector<4x32xf32>
    %302 = arith.addf %297, %301 : vector<4x32xf32>
    %c1_361 = arith.constant 1 : index
    %c0_362 = arith.constant 0 : index
    %c0_363 = arith.constant 0 : index
    %303 = vector.load %arg19[%c1_361, %c0_362, %c0_363] : memref<4x4x256xf32, #tpu.memory_space<vmem>>, vector<2x2x256xf32>
    %304 = vector.shape_cast %303 : vector<2x2x256xf32> to vector<4x256xf32>
    %c768 = arith.constant 768 : index
    %c0_364 = arith.constant 0 : index
    %305 = vector.load %arg8[%c768, %c0_364] : memref<2304x32xf32, #tpu.memory_space<vmem>>, vector<256x32xf32>
    %cst_365 = arith.constant dense<0.000000e+00> : vector<4x32xf32>
    %306 = tpu.matmul %304, %305, %cst_365 {dimension_numbers = #tpu.dot_dimension_numbers<[1], [0], [0], [1], [0, 0, 1, 1], [], []>} : vector<4x256xf32>, vector<256x32xf32>, vector<4x32xf32> -> vector<4x32xf32>
    %307 = arith.addf %302, %306 : vector<4x32xf32>
    %c1_366 = arith.constant 1 : index
    %c1_367 = arith.constant 1 : index
    %c0_368 = arith.constant 0 : index
    %308 = vector.load %arg19[%c1_366, %c1_367, %c0_368] : memref<4x4x256xf32, #tpu.memory_space<vmem>>, vector<2x2x256xf32>
    %309 = vector.shape_cast %308 : vector<2x2x256xf32> to vector<4x256xf32>
    %c1024 = arith.constant 1024 : index
    %c0_369 = arith.constant 0 : index
    %310 = vector.load %arg8[%c1024, %c0_369] : memref<2304x32xf32, #tpu.memory_space<vmem>>, vector<256x32xf32>
    %cst_370 = arith.constant dense<0.000000e+00> : vector<4x32xf32>
    %311 = tpu.matmul %309, %310, %cst_370 {dimension_numbers = #tpu.dot_dimension_numbers<[1], [0], [0], [1], [0, 0, 1, 1], [], []>} : vector<4x256xf32>, vector<256x32xf32>, vector<4x32xf32> -> vector<4x32xf32>
    %312 = arith.addf %307, %311 : vector<4x32xf32>
    %c1_371 = arith.constant 1 : index
    %c2_372 = arith.constant 2 : index
    %c0_373 = arith.constant 0 : index
    %313 = vector.load %arg19[%c1_371, %c2_372, %c0_373] : memref<4x4x256xf32, #tpu.memory_space<vmem>>, vector<2x2x256xf32>
    %314 = vector.shape_cast %313 : vector<2x2x256xf32> to vector<4x256xf32>
    %c1280 = arith.constant 1280 : index
    %c0_374 = arith.constant 0 : index
    %315 = vector.load %arg8[%c1280, %c0_374] : memref<2304x32xf32, #tpu.memory_space<vmem>>, vector<256x32xf32>
    %cst_375 = arith.constant dense<0.000000e+00> : vector<4x32xf32>
    %316 = tpu.matmul %314, %315, %cst_375 {dimension_numbers = #tpu.dot_dimension_numbers<[1], [0], [0], [1], [0, 0, 1, 1], [], []>} : vector<4x256xf32>, vector<256x32xf32>, vector<4x32xf32> -> vector<4x32xf32>
    %317 = arith.addf %312, %316 : vector<4x32xf32>
    %c2_376 = arith.constant 2 : index
    %c0_377 = arith.constant 0 : index
    %c0_378 = arith.constant 0 : index
    %318 = vector.load %arg19[%c2_376, %c0_377, %c0_378] : memref<4x4x256xf32, #tpu.memory_space<vmem>>, vector<2x2x256xf32>
    %319 = vector.shape_cast %318 : vector<2x2x256xf32> to vector<4x256xf32>
    %c1536 = arith.constant 1536 : index
    %c0_379 = arith.constant 0 : index
    %320 = vector.load %arg8[%c1536, %c0_379] : memref<2304x32xf32, #tpu.memory_space<vmem>>, vector<256x32xf32>
    %cst_380 = arith.constant dense<0.000000e+00> : vector<4x32xf32>
    %321 = tpu.matmul %319, %320, %cst_380 {dimension_numbers = #tpu.dot_dimension_numbers<[1], [0], [0], [1], [0, 0, 1, 1], [], []>} : vector<4x256xf32>, vector<256x32xf32>, vector<4x32xf32> -> vector<4x32xf32>
    %322 = arith.addf %317, %321 : vector<4x32xf32>
    %c2_381 = arith.constant 2 : index
    %c1_382 = arith.constant 1 : index
    %c0_383 = arith.constant 0 : index
    %323 = vector.load %arg19[%c2_381, %c1_382, %c0_383] : memref<4x4x256xf32, #tpu.memory_space<vmem>>, vector<2x2x256xf32>
    %324 = vector.shape_cast %323 : vector<2x2x256xf32> to vector<4x256xf32>
    %c1792 = arith.constant 1792 : index
    %c0_384 = arith.constant 0 : index
    %325 = vector.load %arg8[%c1792, %c0_384] : memref<2304x32xf32, #tpu.memory_space<vmem>>, vector<256x32xf32>
    %cst_385 = arith.constant dense<0.000000e+00> : vector<4x32xf32>
    %326 = tpu.matmul %324, %325, %cst_385 {dimension_numbers = #tpu.dot_dimension_numbers<[1], [0], [0], [1], [0, 0, 1, 1], [], []>} : vector<4x256xf32>, vector<256x32xf32>, vector<4x32xf32> -> vector<4x32xf32>
    %327 = arith.addf %322, %326 : vector<4x32xf32>
    %c2_386 = arith.constant 2 : index
    %c2_387 = arith.constant 2 : index
    %c0_388 = arith.constant 0 : index
    %328 = vector.load %arg19[%c2_386, %c2_387, %c0_388] : memref<4x4x256xf32, #tpu.memory_space<vmem>>, vector<2x2x256xf32>
    %329 = vector.shape_cast %328 : vector<2x2x256xf32> to vector<4x256xf32>
    %c2048 = arith.constant 2048 : index
    %c0_389 = arith.constant 0 : index
    %330 = vector.load %arg8[%c2048, %c0_389] : memref<2304x32xf32, #tpu.memory_space<vmem>>, vector<256x32xf32>
    %cst_390 = arith.constant dense<0.000000e+00> : vector<4x32xf32>
    %331 = tpu.matmul %329, %330, %cst_390 {dimension_numbers = #tpu.dot_dimension_numbers<[1], [0], [0], [1], [0, 0, 1, 1], [], []>} : vector<4x256xf32>, vector<256x32xf32>, vector<4x32xf32> -> vector<4x32xf32>
    %332 = arith.addf %327, %331 : vector<4x32xf32>
    %c0_391 = arith.constant 0 : index
    %c0_392 = arith.constant 0 : index
    %333 = vector.load %arg9[%c0_391, %c0_392] : memref<1x32xf32, #tpu.memory_space<vmem>>, vector<1x32xf32>
    %334 = vector.broadcast %333 : vector<1x32xf32> to vector<4x32xf32>
    %335 = arith.addf %332, %334 : vector<4x32xf32>
    %cst_393 = arith.constant 0.000000e+00 : f32
    %336 = vector.broadcast %cst_393 : f32 to vector<4x32xf32>
    %337 = arith.maximumf %335, %336 : vector<4x32xf32>
    %338 = vector.shape_cast %337 : vector<4x32xf32> to vector<2x2x32xf32>
    %cst_394 = arith.constant 0.000000e+00 : f32
    %339 = vector.broadcast %cst_394 : f32 to vector<2x6x32xf32>
    %c0_395 = arith.constant 0 : index
    %c0_396 = arith.constant 0 : index
    %c0_397 = arith.constant 0 : index
    %340 = vector.load %arg20[%c0_395, %c0_396, %c0_397] : memref<6x6x32xf32, #tpu.memory_space<vmem>>, vector<2x6x32xf32>
    tpu.vector_store %arg20[%c0_395, %c0_396, %c0_397], %339 {strides = array<i32>} : memref<6x6x32xf32, #tpu.memory_space<vmem>>, vector<2x6x32xf32>,
    %c4_398 = arith.constant 4 : index
    %c0_399 = arith.constant 0 : index
    %c0_400 = arith.constant 0 : index
    %341 = vector.load %arg20[%c4_398, %c0_399, %c0_400] : memref<6x6x32xf32, #tpu.memory_space<vmem>>, vector<2x6x32xf32>
    tpu.vector_store %arg20[%c4_398, %c0_399, %c0_400], %339 {strides = array<i32>} : memref<6x6x32xf32, #tpu.memory_space<vmem>>, vector<2x6x32xf32>,
    %cst_401 = arith.constant 0.000000e+00 : f32
    %342 = vector.broadcast %cst_401 : f32 to vector<2x2x32xf32>
    %c2_402 = arith.constant 2 : index
    %c0_403 = arith.constant 0 : index
    %c0_404 = arith.constant 0 : index
    %343 = vector.load %arg20[%c2_402, %c0_403, %c0_404] : memref<6x6x32xf32, #tpu.memory_space<vmem>>, vector<2x2x32xf32>
    tpu.vector_store %arg20[%c2_402, %c0_403, %c0_404], %342 {strides = array<i32>} : memref<6x6x32xf32, #tpu.memory_space<vmem>>, vector<2x2x32xf32>,
    %c2_405 = arith.constant 2 : index
    %c4_406 = arith.constant 4 : index
    %c0_407 = arith.constant 0 : index
    %344 = vector.load %arg20[%c2_405, %c4_406, %c0_407] : memref<6x6x32xf32, #tpu.memory_space<vmem>>, vector<2x2x32xf32>
    tpu.vector_store %arg20[%c2_405, %c4_406, %c0_407], %342 {strides = array<i32>} : memref<6x6x32xf32, #tpu.memory_space<vmem>>, vector<2x2x32xf32>,
    %c2_408 = arith.constant 2 : index
    %c2_409 = arith.constant 2 : index
    %c0_410 = arith.constant 0 : index
    %345 = vector.load %arg20[%c2_408, %c2_409, %c0_410] : memref<6x6x32xf32, #tpu.memory_space<vmem>>, vector<2x2x32xf32>
    tpu.vector_store %arg20[%c2_408, %c2_409, %c0_410], %338 {strides = array<i32>} : memref<6x6x32xf32, #tpu.memory_space<vmem>>, vector<2x2x32xf32>,
    %cst_411 = arith.constant 0.000000e+00 : f32
    %346 = vector.broadcast %cst_411 : f32 to vector<4x32xf32>
    %c0_412 = arith.constant 0 : index
    %c0_413 = arith.constant 0 : index
    %c0_414 = arith.constant 0 : index
    %347 = vector.load %arg20[%c0_412, %c0_413, %c0_414] : memref<6x6x32xf32, #tpu.memory_space<vmem>>, vector<2x2x32xf32>
    %348 = vector.shape_cast %347 : vector<2x2x32xf32> to vector<4x32xf32>
    %c0_415 = arith.constant 0 : index
    %c0_416 = arith.constant 0 : index
    %349 = vector.load %arg10[%c0_415, %c0_416] : memref<800x32xf32, #tpu.memory_space<vmem>>, vector<32x32xf32>
    %cst_417 = arith.constant dense<0.000000e+00> : vector<4x32xf32>
    %350 = tpu.matmul %348, %349, %cst_417 {dimension_numbers = #tpu.dot_dimension_numbers<[1], [0], [0], [1], [0, 0, 1, 1], [], []>} : vector<4x32xf32>, vector<32x32xf32>, vector<4x32xf32> -> vector<4x32xf32>
    %351 = arith.addf %346, %350 : vector<4x32xf32>
    %c0_418 = arith.constant 0 : index
    %c1_419 = arith.constant 1 : index
    %c0_420 = arith.constant 0 : index
    %352 = vector.load %arg20[%c0_418, %c1_419, %c0_420] : memref<6x6x32xf32, #tpu.memory_space<vmem>>, vector<2x2x32xf32>
    %353 = vector.shape_cast %352 : vector<2x2x32xf32> to vector<4x32xf32>
    %c32_421 = arith.constant 32 : index
    %c0_422 = arith.constant 0 : index
    %354 = vector.load %arg10[%c32_421, %c0_422] : memref<800x32xf32, #tpu.memory_space<vmem>>, vector<32x32xf32>
    %cst_423 = arith.constant dense<0.000000e+00> : vector<4x32xf32>
    %355 = tpu.matmul %353, %354, %cst_423 {dimension_numbers = #tpu.dot_dimension_numbers<[1], [0], [0], [1], [0, 0, 1, 1], [], []>} : vector<4x32xf32>, vector<32x32xf32>, vector<4x32xf32> -> vector<4x32xf32>
    %356 = arith.addf %351, %355 : vector<4x32xf32>
    %c0_424 = arith.constant 0 : index
    %c2_425 = arith.constant 2 : index
    %c0_426 = arith.constant 0 : index
    %357 = vector.load %arg20[%c0_424, %c2_425, %c0_426] : memref<6x6x32xf32, #tpu.memory_space<vmem>>, vector<2x2x32xf32>
    %358 = vector.shape_cast %357 : vector<2x2x32xf32> to vector<4x32xf32>
    %c64_427 = arith.constant 64 : index
    %c0_428 = arith.constant 0 : index
    %359 = vector.load %arg10[%c64_427, %c0_428] : memref<800x32xf32, #tpu.memory_space<vmem>>, vector<32x32xf32>
    %cst_429 = arith.constant dense<0.000000e+00> : vector<4x32xf32>
    %360 = tpu.matmul %358, %359, %cst_429 {dimension_numbers = #tpu.dot_dimension_numbers<[1], [0], [0], [1], [0, 0, 1, 1], [], []>} : vector<4x32xf32>, vector<32x32xf32>, vector<4x32xf32> -> vector<4x32xf32>
    %361 = arith.addf %356, %360 : vector<4x32xf32>
    %c0_430 = arith.constant 0 : index
    %c3_431 = arith.constant 3 : index
    %c0_432 = arith.constant 0 : index
    %362 = vector.load %arg20[%c0_430, %c3_431, %c0_432] : memref<6x6x32xf32, #tpu.memory_space<vmem>>, vector<2x2x32xf32>
    %363 = vector.shape_cast %362 : vector<2x2x32xf32> to vector<4x32xf32>
    %c96_433 = arith.constant 96 : index
    %c0_434 = arith.constant 0 : index
    %364 = vector.load %arg10[%c96_433, %c0_434] : memref<800x32xf32, #tpu.memory_space<vmem>>, vector<32x32xf32>
    %cst_435 = arith.constant dense<0.000000e+00> : vector<4x32xf32>
    %365 = tpu.matmul %363, %364, %cst_435 {dimension_numbers = #tpu.dot_dimension_numbers<[1], [0], [0], [1], [0, 0, 1, 1], [], []>} : vector<4x32xf32>, vector<32x32xf32>, vector<4x32xf32> -> vector<4x32xf32>
    %366 = arith.addf %361, %365 : vector<4x32xf32>
    %c0_436 = arith.constant 0 : index
    %c4_437 = arith.constant 4 : index
    %c0_438 = arith.constant 0 : index
    %367 = vector.load %arg20[%c0_436, %c4_437, %c0_438] : memref<6x6x32xf32, #tpu.memory_space<vmem>>, vector<2x2x32xf32>
    %368 = vector.shape_cast %367 : vector<2x2x32xf32> to vector<4x32xf32>
    %c128_439 = arith.constant 128 : index
    %c0_440 = arith.constant 0 : index
    %369 = vector.load %arg10[%c128_439, %c0_440] : memref<800x32xf32, #tpu.memory_space<vmem>>, vector<32x32xf32>
    %cst_441 = arith.constant dense<0.000000e+00> : vector<4x32xf32>
    %370 = tpu.matmul %368, %369, %cst_441 {dimension_numbers = #tpu.dot_dimension_numbers<[1], [0], [0], [1], [0, 0, 1, 1], [], []>} : vector<4x32xf32>, vector<32x32xf32>, vector<4x32xf32> -> vector<4x32xf32>
    %371 = arith.addf %366, %370 : vector<4x32xf32>
    %c1_442 = arith.constant 1 : index
    %c0_443 = arith.constant 0 : index
    %c0_444 = arith.constant 0 : index
    %372 = vector.load %arg20[%c1_442, %c0_443, %c0_444] : memref<6x6x32xf32, #tpu.memory_space<vmem>>, vector<2x2x32xf32>
    %373 = vector.shape_cast %372 : vector<2x2x32xf32> to vector<4x32xf32>
    %c160_445 = arith.constant 160 : index
    %c0_446 = arith.constant 0 : index
    %374 = vector.load %arg10[%c160_445, %c0_446] : memref<800x32xf32, #tpu.memory_space<vmem>>, vector<32x32xf32>
    %cst_447 = arith.constant dense<0.000000e+00> : vector<4x32xf32>
    %375 = tpu.matmul %373, %374, %cst_447 {dimension_numbers = #tpu.dot_dimension_numbers<[1], [0], [0], [1], [0, 0, 1, 1], [], []>} : vector<4x32xf32>, vector<32x32xf32>, vector<4x32xf32> -> vector<4x32xf32>
    %376 = arith.addf %371, %375 : vector<4x32xf32>
    %c1_448 = arith.constant 1 : index
    %c1_449 = arith.constant 1 : index
    %c0_450 = arith.constant 0 : index
    %377 = vector.load %arg20[%c1_448, %c1_449, %c0_450] : memref<6x6x32xf32, #tpu.memory_space<vmem>>, vector<2x2x32xf32>
    %378 = vector.shape_cast %377 : vector<2x2x32xf32> to vector<4x32xf32>
    %c192_451 = arith.constant 192 : index
    %c0_452 = arith.constant 0 : index
    %379 = vector.load %arg10[%c192_451, %c0_452] : memref<800x32xf32, #tpu.memory_space<vmem>>, vector<32x32xf32>
    %cst_453 = arith.constant dense<0.000000e+00> : vector<4x32xf32>
    %380 = tpu.matmul %378, %379, %cst_453 {dimension_numbers = #tpu.dot_dimension_numbers<[1], [0], [0], [1], [0, 0, 1, 1], [], []>} : vector<4x32xf32>, vector<32x32xf32>, vector<4x32xf32> -> vector<4x32xf32>
    %381 = arith.addf %376, %380 : vector<4x32xf32>
    %c1_454 = arith.constant 1 : index
    %c2_455 = arith.constant 2 : index
    %c0_456 = arith.constant 0 : index
    %382 = vector.load %arg20[%c1_454, %c2_455, %c0_456] : memref<6x6x32xf32, #tpu.memory_space<vmem>>, vector<2x2x32xf32>
    %383 = vector.shape_cast %382 : vector<2x2x32xf32> to vector<4x32xf32>
    %c224_457 = arith.constant 224 : index
    %c0_458 = arith.constant 0 : index
    %384 = vector.load %arg10[%c224_457, %c0_458] : memref<800x32xf32, #tpu.memory_space<vmem>>, vector<32x32xf32>
    %cst_459 = arith.constant dense<0.000000e+00> : vector<4x32xf32>
    %385 = tpu.matmul %383, %384, %cst_459 {dimension_numbers = #tpu.dot_dimension_numbers<[1], [0], [0], [1], [0, 0, 1, 1], [], []>} : vector<4x32xf32>, vector<32x32xf32>, vector<4x32xf32> -> vector<4x32xf32>
    %386 = arith.addf %381, %385 : vector<4x32xf32>
    %c1_460 = arith.constant 1 : index
    %c3_461 = arith.constant 3 : index
    %c0_462 = arith.constant 0 : index
    %387 = vector.load %arg20[%c1_460, %c3_461, %c0_462] : memref<6x6x32xf32, #tpu.memory_space<vmem>>, vector<2x2x32xf32>
    %388 = vector.shape_cast %387 : vector<2x2x32xf32> to vector<4x32xf32>
    %c256_463 = arith.constant 256 : index
    %c0_464 = arith.constant 0 : index
    %389 = vector.load %arg10[%c256_463, %c0_464] : memref<800x32xf32, #tpu.memory_space<vmem>>, vector<32x32xf32>
    %cst_465 = arith.constant dense<0.000000e+00> : vector<4x32xf32>
    %390 = tpu.matmul %388, %389, %cst_465 {dimension_numbers = #tpu.dot_dimension_numbers<[1], [0], [0], [1], [0, 0, 1, 1], [], []>} : vector<4x32xf32>, vector<32x32xf32>, vector<4x32xf32> -> vector<4x32xf32>
    %391 = arith.addf %386, %390 : vector<4x32xf32>
    %c1_466 = arith.constant 1 : index
    %c4_467 = arith.constant 4 : index
    %c0_468 = arith.constant 0 : index
    %392 = vector.load %arg20[%c1_466, %c4_467, %c0_468] : memref<6x6x32xf32, #tpu.memory_space<vmem>>, vector<2x2x32xf32>
    %393 = vector.shape_cast %392 : vector<2x2x32xf32> to vector<4x32xf32>
    %c288_469 = arith.constant 288 : index
    %c0_470 = arith.constant 0 : index
    %394 = vector.load %arg10[%c288_469, %c0_470] : memref<800x32xf32, #tpu.memory_space<vmem>>, vector<32x32xf32>
    %cst_471 = arith.constant dense<0.000000e+00> : vector<4x32xf32>
    %395 = tpu.matmul %393, %394, %cst_471 {dimension_numbers = #tpu.dot_dimension_numbers<[1], [0], [0], [1], [0, 0, 1, 1], [], []>} : vector<4x32xf32>, vector<32x32xf32>, vector<4x32xf32> -> vector<4x32xf32>
    %396 = arith.addf %391, %395 : vector<4x32xf32>
    %c2_472 = arith.constant 2 : index
    %c0_473 = arith.constant 0 : index
    %c0_474 = arith.constant 0 : index
    %397 = vector.load %arg20[%c2_472, %c0_473, %c0_474] : memref<6x6x32xf32, #tpu.memory_space<vmem>>, vector<2x2x32xf32>
    %398 = vector.shape_cast %397 : vector<2x2x32xf32> to vector<4x32xf32>
    %c320_475 = arith.constant 320 : index
    %c0_476 = arith.constant 0 : index
    %399 = vector.load %arg10[%c320_475, %c0_476] : memref<800x32xf32, #tpu.memory_space<vmem>>, vector<32x32xf32>
    %cst_477 = arith.constant dense<0.000000e+00> : vector<4x32xf32>
    %400 = tpu.matmul %398, %399, %cst_477 {dimension_numbers = #tpu.dot_dimension_numbers<[1], [0], [0], [1], [0, 0, 1, 1], [], []>} : vector<4x32xf32>, vector<32x32xf32>, vector<4x32xf32> -> vector<4x32xf32>
    %401 = arith.addf %396, %400 : vector<4x32xf32>
    %c2_478 = arith.constant 2 : index
    %c1_479 = arith.constant 1 : index
    %c0_480 = arith.constant 0 : index
    %402 = vector.load %arg20[%c2_478, %c1_479, %c0_480] : memref<6x6x32xf32, #tpu.memory_space<vmem>>, vector<2x2x32xf32>
    %403 = vector.shape_cast %402 : vector<2x2x32xf32> to vector<4x32xf32>
    %c352_481 = arith.constant 352 : index
    %c0_482 = arith.constant 0 : index
    %404 = vector.load %arg10[%c352_481, %c0_482] : memref<800x32xf32, #tpu.memory_space<vmem>>, vector<32x32xf32>
    %cst_483 = arith.constant dense<0.000000e+00> : vector<4x32xf32>
    %405 = tpu.matmul %403, %404, %cst_483 {dimension_numbers = #tpu.dot_dimension_numbers<[1], [0], [0], [1], [0, 0, 1, 1], [], []>} : vector<4x32xf32>, vector<32x32xf32>, vector<4x32xf32> -> vector<4x32xf32>
    %406 = arith.addf %401, %405 : vector<4x32xf32>
    %c2_484 = arith.constant 2 : index
    %c2_485 = arith.constant 2 : index
    %c0_486 = arith.constant 0 : index
    %407 = vector.load %arg20[%c2_484, %c2_485, %c0_486] : memref<6x6x32xf32, #tpu.memory_space<vmem>>, vector<2x2x32xf32>
    %408 = vector.shape_cast %407 : vector<2x2x32xf32> to vector<4x32xf32>
    %c384_487 = arith.constant 384 : index
    %c0_488 = arith.constant 0 : index
    %409 = vector.load %arg10[%c384_487, %c0_488] : memref<800x32xf32, #tpu.memory_space<vmem>>, vector<32x32xf32>
    %cst_489 = arith.constant dense<0.000000e+00> : vector<4x32xf32>
    %410 = tpu.matmul %408, %409, %cst_489 {dimension_numbers = #tpu.dot_dimension_numbers<[1], [0], [0], [1], [0, 0, 1, 1], [], []>} : vector<4x32xf32>, vector<32x32xf32>, vector<4x32xf32> -> vector<4x32xf32>
    %411 = arith.addf %406, %410 : vector<4x32xf32>
    %c2_490 = arith.constant 2 : index
    %c3_491 = arith.constant 3 : index
    %c0_492 = arith.constant 0 : index
    %412 = vector.load %arg20[%c2_490, %c3_491, %c0_492] : memref<6x6x32xf32, #tpu.memory_space<vmem>>, vector<2x2x32xf32>
    %413 = vector.shape_cast %412 : vector<2x2x32xf32> to vector<4x32xf32>
    %c416 = arith.constant 416 : index
    %c0_493 = arith.constant 0 : index
    %414 = vector.load %arg10[%c416, %c0_493] : memref<800x32xf32, #tpu.memory_space<vmem>>, vector<32x32xf32>
    %cst_494 = arith.constant dense<0.000000e+00> : vector<4x32xf32>
    %415 = tpu.matmul %413, %414, %cst_494 {dimension_numbers = #tpu.dot_dimension_numbers<[1], [0], [0], [1], [0, 0, 1, 1], [], []>} : vector<4x32xf32>, vector<32x32xf32>, vector<4x32xf32> -> vector<4x32xf32>
    %416 = arith.addf %411, %415 : vector<4x32xf32>
    %c2_495 = arith.constant 2 : index
    %c4_496 = arith.constant 4 : index
    %c0_497 = arith.constant 0 : index
    %417 = vector.load %arg20[%c2_495, %c4_496, %c0_497] : memref<6x6x32xf32, #tpu.memory_space<vmem>>, vector<2x2x32xf32>
    %418 = vector.shape_cast %417 : vector<2x2x32xf32> to vector<4x32xf32>
    %c448_498 = arith.constant 448 : index
    %c0_499 = arith.constant 0 : index
    %419 = vector.load %arg10[%c448_498, %c0_499] : memref<800x32xf32, #tpu.memory_space<vmem>>, vector<32x32xf32>
    %cst_500 = arith.constant dense<0.000000e+00> : vector<4x32xf32>
    %420 = tpu.matmul %418, %419, %cst_500 {dimension_numbers = #tpu.dot_dimension_numbers<[1], [0], [0], [1], [0, 0, 1, 1], [], []>} : vector<4x32xf32>, vector<32x32xf32>, vector<4x32xf32> -> vector<4x32xf32>
    %421 = arith.addf %416, %420 : vector<4x32xf32>
    %c3_501 = arith.constant 3 : index
    %c0_502 = arith.constant 0 : index
    %c0_503 = arith.constant 0 : index
    %422 = vector.load %arg20[%c3_501, %c0_502, %c0_503] : memref<6x6x32xf32, #tpu.memory_space<vmem>>, vector<2x2x32xf32>
    %423 = vector.shape_cast %422 : vector<2x2x32xf32> to vector<4x32xf32>
    %c480 = arith.constant 480 : index
    %c0_504 = arith.constant 0 : index
    %424 = vector.load %arg10[%c480, %c0_504] : memref<800x32xf32, #tpu.memory_space<vmem>>, vector<32x32xf32>
    %cst_505 = arith.constant dense<0.000000e+00> : vector<4x32xf32>
    %425 = tpu.matmul %423, %424, %cst_505 {dimension_numbers = #tpu.dot_dimension_numbers<[1], [0], [0], [1], [0, 0, 1, 1], [], []>} : vector<4x32xf32>, vector<32x32xf32>, vector<4x32xf32> -> vector<4x32xf32>
    %426 = arith.addf %421, %425 : vector<4x32xf32>
    %c3_506 = arith.constant 3 : index
    %c1_507 = arith.constant 1 : index
    %c0_508 = arith.constant 0 : index
    %427 = vector.load %arg20[%c3_506, %c1_507, %c0_508] : memref<6x6x32xf32, #tpu.memory_space<vmem>>, vector<2x2x32xf32>
    %428 = vector.shape_cast %427 : vector<2x2x32xf32> to vector<4x32xf32>
    %c512_509 = arith.constant 512 : index
    %c0_510 = arith.constant 0 : index
    %429 = vector.load %arg10[%c512_509, %c0_510] : memref<800x32xf32, #tpu.memory_space<vmem>>, vector<32x32xf32>
    %cst_511 = arith.constant dense<0.000000e+00> : vector<4x32xf32>
    %430 = tpu.matmul %428, %429, %cst_511 {dimension_numbers = #tpu.dot_dimension_numbers<[1], [0], [0], [1], [0, 0, 1, 1], [], []>} : vector<4x32xf32>, vector<32x32xf32>, vector<4x32xf32> -> vector<4x32xf32>
    %431 = arith.addf %426, %430 : vector<4x32xf32>
    %c3_512 = arith.constant 3 : index
    %c2_513 = arith.constant 2 : index
    %c0_514 = arith.constant 0 : index
    %432 = vector.load %arg20[%c3_512, %c2_513, %c0_514] : memref<6x6x32xf32, #tpu.memory_space<vmem>>, vector<2x2x32xf32>
    %433 = vector.shape_cast %432 : vector<2x2x32xf32> to vector<4x32xf32>
    %c544 = arith.constant 544 : index
    %c0_515 = arith.constant 0 : index
    %434 = vector.load %arg10[%c544, %c0_515] : memref<800x32xf32, #tpu.memory_space<vmem>>, vector<32x32xf32>
    %cst_516 = arith.constant dense<0.000000e+00> : vector<4x32xf32>
    %435 = tpu.matmul %433, %434, %cst_516 {dimension_numbers = #tpu.dot_dimension_numbers<[1], [0], [0], [1], [0, 0, 1, 1], [], []>} : vector<4x32xf32>, vector<32x32xf32>, vector<4x32xf32> -> vector<4x32xf32>
    %436 = arith.addf %431, %435 : vector<4x32xf32>
    %c3_517 = arith.constant 3 : index
    %c3_518 = arith.constant 3 : index
    %c0_519 = arith.constant 0 : index
    %437 = vector.load %arg20[%c3_517, %c3_518, %c0_519] : memref<6x6x32xf32, #tpu.memory_space<vmem>>, vector<2x2x32xf32>
    %438 = vector.shape_cast %437 : vector<2x2x32xf32> to vector<4x32xf32>
    %c576 = arith.constant 576 : index
    %c0_520 = arith.constant 0 : index
    %439 = vector.load %arg10[%c576, %c0_520] : memref<800x32xf32, #tpu.memory_space<vmem>>, vector<32x32xf32>
    %cst_521 = arith.constant dense<0.000000e+00> : vector<4x32xf32>
    %440 = tpu.matmul %438, %439, %cst_521 {dimension_numbers = #tpu.dot_dimension_numbers<[1], [0], [0], [1], [0, 0, 1, 1], [], []>} : vector<4x32xf32>, vector<32x32xf32>, vector<4x32xf32> -> vector<4x32xf32>
    %441 = arith.addf %436, %440 : vector<4x32xf32>
    %c3_522 = arith.constant 3 : index
    %c4_523 = arith.constant 4 : index
    %c0_524 = arith.constant 0 : index
    %442 = vector.load %arg20[%c3_522, %c4_523, %c0_524] : memref<6x6x32xf32, #tpu.memory_space<vmem>>, vector<2x2x32xf32>
    %443 = vector.shape_cast %442 : vector<2x2x32xf32> to vector<4x32xf32>
    %c608 = arith.constant 608 : index
    %c0_525 = arith.constant 0 : index
    %444 = vector.load %arg10[%c608, %c0_525] : memref<800x32xf32, #tpu.memory_space<vmem>>, vector<32x32xf32>
    %cst_526 = arith.constant dense<0.000000e+00> : vector<4x32xf32>
    %445 = tpu.matmul %443, %444, %cst_526 {dimension_numbers = #tpu.dot_dimension_numbers<[1], [0], [0], [1], [0, 0, 1, 1], [], []>} : vector<4x32xf32>, vector<32x32xf32>, vector<4x32xf32> -> vector<4x32xf32>
    %446 = arith.addf %441, %445 : vector<4x32xf32>
    %c4_527 = arith.constant 4 : index
    %c0_528 = arith.constant 0 : index
    %c0_529 = arith.constant 0 : index
    %447 = vector.load %arg20[%c4_527, %c0_528, %c0_529] : memref<6x6x32xf32, #tpu.memory_space<vmem>>, vector<2x2x32xf32>
    %448 = vector.shape_cast %447 : vector<2x2x32xf32> to vector<4x32xf32>
    %c640 = arith.constant 640 : index
    %c0_530 = arith.constant 0 : index
    %449 = vector.load %arg10[%c640, %c0_530] : memref<800x32xf32, #tpu.memory_space<vmem>>, vector<32x32xf32>
    %cst_531 = arith.constant dense<0.000000e+00> : vector<4x32xf32>
    %450 = tpu.matmul %448, %449, %cst_531 {dimension_numbers = #tpu.dot_dimension_numbers<[1], [0], [0], [1], [0, 0, 1, 1], [], []>} : vector<4x32xf32>, vector<32x32xf32>, vector<4x32xf32> -> vector<4x32xf32>
    %451 = arith.addf %446, %450 : vector<4x32xf32>
    %c4_532 = arith.constant 4 : index
    %c1_533 = arith.constant 1 : index
    %c0_534 = arith.constant 0 : index
    %452 = vector.load %arg20[%c4_532, %c1_533, %c0_534] : memref<6x6x32xf32, #tpu.memory_space<vmem>>, vector<2x2x32xf32>
    %453 = vector.shape_cast %452 : vector<2x2x32xf32> to vector<4x32xf32>
    %c672 = arith.constant 672 : index
    %c0_535 = arith.constant 0 : index
    %454 = vector.load %arg10[%c672, %c0_535] : memref<800x32xf32, #tpu.memory_space<vmem>>, vector<32x32xf32>
    %cst_536 = arith.constant dense<0.000000e+00> : vector<4x32xf32>
    %455 = tpu.matmul %453, %454, %cst_536 {dimension_numbers = #tpu.dot_dimension_numbers<[1], [0], [0], [1], [0, 0, 1, 1], [], []>} : vector<4x32xf32>, vector<32x32xf32>, vector<4x32xf32> -> vector<4x32xf32>
    %456 = arith.addf %451, %455 : vector<4x32xf32>
    %c4_537 = arith.constant 4 : index
    %c2_538 = arith.constant 2 : index
    %c0_539 = arith.constant 0 : index
    %457 = vector.load %arg20[%c4_537, %c2_538, %c0_539] : memref<6x6x32xf32, #tpu.memory_space<vmem>>, vector<2x2x32xf32>
    %458 = vector.shape_cast %457 : vector<2x2x32xf32> to vector<4x32xf32>
    %c704 = arith.constant 704 : index
    %c0_540 = arith.constant 0 : index
    %459 = vector.load %arg10[%c704, %c0_540] : memref<800x32xf32, #tpu.memory_space<vmem>>, vector<32x32xf32>
    %cst_541 = arith.constant dense<0.000000e+00> : vector<4x32xf32>
    %460 = tpu.matmul %458, %459, %cst_541 {dimension_numbers = #tpu.dot_dimension_numbers<[1], [0], [0], [1], [0, 0, 1, 1], [], []>} : vector<4x32xf32>, vector<32x32xf32>, vector<4x32xf32> -> vector<4x32xf32>
    %461 = arith.addf %456, %460 : vector<4x32xf32>
    %c4_542 = arith.constant 4 : index
    %c3_543 = arith.constant 3 : index
    %c0_544 = arith.constant 0 : index
    %462 = vector.load %arg20[%c4_542, %c3_543, %c0_544] : memref<6x6x32xf32, #tpu.memory_space<vmem>>, vector<2x2x32xf32>
    %463 = vector.shape_cast %462 : vector<2x2x32xf32> to vector<4x32xf32>
    %c736 = arith.constant 736 : index
    %c0_545 = arith.constant 0 : index
    %464 = vector.load %arg10[%c736, %c0_545] : memref<800x32xf32, #tpu.memory_space<vmem>>, vector<32x32xf32>
    %cst_546 = arith.constant dense<0.000000e+00> : vector<4x32xf32>
    %465 = tpu.matmul %463, %464, %cst_546 {dimension_numbers = #tpu.dot_dimension_numbers<[1], [0], [0], [1], [0, 0, 1, 1], [], []>} : vector<4x32xf32>, vector<32x32xf32>, vector<4x32xf32> -> vector<4x32xf32>
    %466 = arith.addf %461, %465 : vector<4x32xf32>
    %c4_547 = arith.constant 4 : index
    %c4_548 = arith.constant 4 : index
    %c0_549 = arith.constant 0 : index
    %467 = vector.load %arg20[%c4_547, %c4_548, %c0_549] : memref<6x6x32xf32, #tpu.memory_space<vmem>>, vector<2x2x32xf32>
    %468 = vector.shape_cast %467 : vector<2x2x32xf32> to vector<4x32xf32>
    %c768_550 = arith.constant 768 : index
    %c0_551 = arith.constant 0 : index
    %469 = vector.load %arg10[%c768_550, %c0_551] : memref<800x32xf32, #tpu.memory_space<vmem>>, vector<32x32xf32>
    %cst_552 = arith.constant dense<0.000000e+00> : vector<4x32xf32>
    %470 = tpu.matmul %468, %469, %cst_552 {dimension_numbers = #tpu.dot_dimension_numbers<[1], [0], [0], [1], [0, 0, 1, 1], [], []>} : vector<4x32xf32>, vector<32x32xf32>, vector<4x32xf32> -> vector<4x32xf32>
    %471 = arith.addf %466, %470 : vector<4x32xf32>
    %c0_553 = arith.constant 0 : index
    %c0_554 = arith.constant 0 : index
    %472 = vector.load %arg11[%c0_553, %c0_554] : memref<1x32xf32, #tpu.memory_space<vmem>>, vector<1x32xf32>
    %473 = vector.broadcast %472 : vector<1x32xf32> to vector<4x32xf32>
    %474 = arith.addf %471, %473 : vector<4x32xf32>
    %cst_555 = arith.constant 0.000000e+00 : f32
    %475 = vector.broadcast %cst_555 : f32 to vector<4x32xf32>
    %476 = arith.maximumf %474, %475 : vector<4x32xf32>
    %477 = vector.shape_cast %476 : vector<4x32xf32> to vector<2x2x32xf32>
    %cst_556 = arith.constant 0.000000e+00 : f32
    %478 = vector.broadcast %cst_556 : f32 to vector<1x4x32xf32>
    %c0_557 = arith.constant 0 : index
    %c0_558 = arith.constant 0 : index
    %c0_559 = arith.constant 0 : index
    %479 = vector.load %arg21[%c0_557, %c0_558, %c0_559] : memref<4x4x32xf32, #tpu.memory_space<vmem>>, vector<1x4x32xf32>
    tpu.vector_store %arg21[%c0_557, %c0_558, %c0_559], %478 {strides = array<i32>} : memref<4x4x32xf32, #tpu.memory_space<vmem>>, vector<1x4x32xf32>,
    %c3_560 = arith.constant 3 : index
    %c0_561 = arith.constant 0 : index
    %c0_562 = arith.constant 0 : index
    %480 = vector.load %arg21[%c3_560, %c0_561, %c0_562] : memref<4x4x32xf32, #tpu.memory_space<vmem>>, vector<1x4x32xf32>
    tpu.vector_store %arg21[%c3_560, %c0_561, %c0_562], %478 {strides = array<i32>} : memref<4x4x32xf32, #tpu.memory_space<vmem>>, vector<1x4x32xf32>,
    %cst_563 = arith.constant 0.000000e+00 : f32
    %481 = vector.broadcast %cst_563 : f32 to vector<2x1x32xf32>
    %c1_564 = arith.constant 1 : index
    %c0_565 = arith.constant 0 : index
    %c0_566 = arith.constant 0 : index
    %482 = vector.load %arg21[%c1_564, %c0_565, %c0_566] : memref<4x4x32xf32, #tpu.memory_space<vmem>>, vector<2x1x32xf32>
    tpu.vector_store %arg21[%c1_564, %c0_565, %c0_566], %481 {strides = array<i32>} : memref<4x4x32xf32, #tpu.memory_space<vmem>>, vector<2x1x32xf32>,
    %c1_567 = arith.constant 1 : index
    %c3_568 = arith.constant 3 : index
    %c0_569 = arith.constant 0 : index
    %483 = vector.load %arg21[%c1_567, %c3_568, %c0_569] : memref<4x4x32xf32, #tpu.memory_space<vmem>>, vector<2x1x32xf32>
    tpu.vector_store %arg21[%c1_567, %c3_568, %c0_569], %481 {strides = array<i32>} : memref<4x4x32xf32, #tpu.memory_space<vmem>>, vector<2x1x32xf32>,
    %c1_570 = arith.constant 1 : index
    %c1_571 = arith.constant 1 : index
    %c0_572 = arith.constant 0 : index
    %484 = vector.load %arg21[%c1_570, %c1_571, %c0_572] : memref<4x4x32xf32, #tpu.memory_space<vmem>>, vector<2x2x32xf32>
    tpu.vector_store %arg21[%c1_570, %c1_571, %c0_572], %477 {strides = array<i32>} : memref<4x4x32xf32, #tpu.memory_space<vmem>>, vector<2x2x32xf32>,
    %cst_573 = arith.constant 0.000000e+00 : f32
    %485 = vector.broadcast %cst_573 : f32 to vector<4x64xf32>
    %c0_574 = arith.constant 0 : index
    %c0_575 = arith.constant 0 : index
    %c0_576 = arith.constant 0 : index
    %486 = vector.load %arg21[%c0_574, %c0_575, %c0_576] : memref<4x4x32xf32, #tpu.memory_space<vmem>>, vector<2x2x32xf32>
    %487 = vector.shape_cast %486 : vector<2x2x32xf32> to vector<4x32xf32>
    %c0_577 = arith.constant 0 : index
    %c0_578 = arith.constant 0 : index
    %488 = vector.load %arg12[%c0_577, %c0_578] : memref<288x64xf32, #tpu.memory_space<vmem>>, vector<32x64xf32>
    %cst_579 = arith.constant dense<0.000000e+00> : vector<4x64xf32>
    %489 = tpu.matmul %487, %488, %cst_579 {dimension_numbers = #tpu.dot_dimension_numbers<[1], [0], [0], [1], [0, 0, 1, 1], [], []>} : vector<4x32xf32>, vector<32x64xf32>, vector<4x64xf32> -> vector<4x64xf32>
    %490 = arith.addf %485, %489 : vector<4x64xf32>
    %c0_580 = arith.constant 0 : index
    %c1_581 = arith.constant 1 : index
    %c0_582 = arith.constant 0 : index
    %491 = vector.load %arg21[%c0_580, %c1_581, %c0_582] : memref<4x4x32xf32, #tpu.memory_space<vmem>>, vector<2x2x32xf32>
    %492 = vector.shape_cast %491 : vector<2x2x32xf32> to vector<4x32xf32>
    %c32_583 = arith.constant 32 : index
    %c0_584 = arith.constant 0 : index
    %493 = vector.load %arg12[%c32_583, %c0_584] : memref<288x64xf32, #tpu.memory_space<vmem>>, vector<32x64xf32>
    %cst_585 = arith.constant dense<0.000000e+00> : vector<4x64xf32>
    %494 = tpu.matmul %492, %493, %cst_585 {dimension_numbers = #tpu.dot_dimension_numbers<[1], [0], [0], [1], [0, 0, 1, 1], [], []>} : vector<4x32xf32>, vector<32x64xf32>, vector<4x64xf32> -> vector<4x64xf32>
    %495 = arith.addf %490, %494 : vector<4x64xf32>
    %c0_586 = arith.constant 0 : index
    %c2_587 = arith.constant 2 : index
    %c0_588 = arith.constant 0 : index
    %496 = vector.load %arg21[%c0_586, %c2_587, %c0_588] : memref<4x4x32xf32, #tpu.memory_space<vmem>>, vector<2x2x32xf32>
    %497 = vector.shape_cast %496 : vector<2x2x32xf32> to vector<4x32xf32>
    %c64_589 = arith.constant 64 : index
    %c0_590 = arith.constant 0 : index
    %498 = vector.load %arg12[%c64_589, %c0_590] : memref<288x64xf32, #tpu.memory_space<vmem>>, vector<32x64xf32>
    %cst_591 = arith.constant dense<0.000000e+00> : vector<4x64xf32>
    %499 = tpu.matmul %497, %498, %cst_591 {dimension_numbers = #tpu.dot_dimension_numbers<[1], [0], [0], [1], [0, 0, 1, 1], [], []>} : vector<4x32xf32>, vector<32x64xf32>, vector<4x64xf32> -> vector<4x64xf32>
    %500 = arith.addf %495, %499 : vector<4x64xf32>
    %c1_592 = arith.constant 1 : index
    %c0_593 = arith.constant 0 : index
    %c0_594 = arith.constant 0 : index
    %501 = vector.load %arg21[%c1_592, %c0_593, %c0_594] : memref<4x4x32xf32, #tpu.memory_space<vmem>>, vector<2x2x32xf32>
    %502 = vector.shape_cast %501 : vector<2x2x32xf32> to vector<4x32xf32>
    %c96_595 = arith.constant 96 : index
    %c0_596 = arith.constant 0 : index
    %503 = vector.load %arg12[%c96_595, %c0_596] : memref<288x64xf32, #tpu.memory_space<vmem>>, vector<32x64xf32>
    %cst_597 = arith.constant dense<0.000000e+00> : vector<4x64xf32>
    %504 = tpu.matmul %502, %503, %cst_597 {dimension_numbers = #tpu.dot_dimension_numbers<[1], [0], [0], [1], [0, 0, 1, 1], [], []>} : vector<4x32xf32>, vector<32x64xf32>, vector<4x64xf32> -> vector<4x64xf32>
    %505 = arith.addf %500, %504 : vector<4x64xf32>
    %c1_598 = arith.constant 1 : index
    %c1_599 = arith.constant 1 : index
    %c0_600 = arith.constant 0 : index
    %506 = vector.load %arg21[%c1_598, %c1_599, %c0_600] : memref<4x4x32xf32, #tpu.memory_space<vmem>>, vector<2x2x32xf32>
    %507 = vector.shape_cast %506 : vector<2x2x32xf32> to vector<4x32xf32>
    %c128_601 = arith.constant 128 : index
    %c0_602 = arith.constant 0 : index
    %508 = vector.load %arg12[%c128_601, %c0_602] : memref<288x64xf32, #tpu.memory_space<vmem>>, vector<32x64xf32>
    %cst_603 = arith.constant dense<0.000000e+00> : vector<4x64xf32>
    %509 = tpu.matmul %507, %508, %cst_603 {dimension_numbers = #tpu.dot_dimension_numbers<[1], [0], [0], [1], [0, 0, 1, 1], [], []>} : vector<4x32xf32>, vector<32x64xf32>, vector<4x64xf32> -> vector<4x64xf32>
    %510 = arith.addf %505, %509 : vector<4x64xf32>
    %c1_604 = arith.constant 1 : index
    %c2_605 = arith.constant 2 : index
    %c0_606 = arith.constant 0 : index
    %511 = vector.load %arg21[%c1_604, %c2_605, %c0_606] : memref<4x4x32xf32, #tpu.memory_space<vmem>>, vector<2x2x32xf32>
    %512 = vector.shape_cast %511 : vector<2x2x32xf32> to vector<4x32xf32>
    %c160_607 = arith.constant 160 : index
    %c0_608 = arith.constant 0 : index
    %513 = vector.load %arg12[%c160_607, %c0_608] : memref<288x64xf32, #tpu.memory_space<vmem>>, vector<32x64xf32>
    %cst_609 = arith.constant dense<0.000000e+00> : vector<4x64xf32>
    %514 = tpu.matmul %512, %513, %cst_609 {dimension_numbers = #tpu.dot_dimension_numbers<[1], [0], [0], [1], [0, 0, 1, 1], [], []>} : vector<4x32xf32>, vector<32x64xf32>, vector<4x64xf32> -> vector<4x64xf32>
    %515 = arith.addf %510, %514 : vector<4x64xf32>
    %c2_610 = arith.constant 2 : index
    %c0_611 = arith.constant 0 : index
    %c0_612 = arith.constant 0 : index
    %516 = vector.load %arg21[%c2_610, %c0_611, %c0_612] : memref<4x4x32xf32, #tpu.memory_space<vmem>>, vector<2x2x32xf32>
    %517 = vector.shape_cast %516 : vector<2x2x32xf32> to vector<4x32xf32>
    %c192_613 = arith.constant 192 : index
    %c0_614 = arith.constant 0 : index
    %518 = vector.load %arg12[%c192_613, %c0_614] : memref<288x64xf32, #tpu.memory_space<vmem>>, vector<32x64xf32>
    %cst_615 = arith.constant dense<0.000000e+00> : vector<4x64xf32>
    %519 = tpu.matmul %517, %518, %cst_615 {dimension_numbers = #tpu.dot_dimension_numbers<[1], [0], [0], [1], [0, 0, 1, 1], [], []>} : vector<4x32xf32>, vector<32x64xf32>, vector<4x64xf32> -> vector<4x64xf32>
    %520 = arith.addf %515, %519 : vector<4x64xf32>
    %c2_616 = arith.constant 2 : index
    %c1_617 = arith.constant 1 : index
    %c0_618 = arith.constant 0 : index
    %521 = vector.load %arg21[%c2_616, %c1_617, %c0_618] : memref<4x4x32xf32, #tpu.memory_space<vmem>>, vector<2x2x32xf32>
    %522 = vector.shape_cast %521 : vector<2x2x32xf32> to vector<4x32xf32>
    %c224_619 = arith.constant 224 : index
    %c0_620 = arith.constant 0 : index
    %523 = vector.load %arg12[%c224_619, %c0_620] : memref<288x64xf32, #tpu.memory_space<vmem>>, vector<32x64xf32>
    %cst_621 = arith.constant dense<0.000000e+00> : vector<4x64xf32>
    %524 = tpu.matmul %522, %523, %cst_621 {dimension_numbers = #tpu.dot_dimension_numbers<[1], [0], [0], [1], [0, 0, 1, 1], [], []>} : vector<4x32xf32>, vector<32x64xf32>, vector<4x64xf32> -> vector<4x64xf32>
    %525 = arith.addf %520, %524 : vector<4x64xf32>
    %c2_622 = arith.constant 2 : index
    %c2_623 = arith.constant 2 : index
    %c0_624 = arith.constant 0 : index
    %526 = vector.load %arg21[%c2_622, %c2_623, %c0_624] : memref<4x4x32xf32, #tpu.memory_space<vmem>>, vector<2x2x32xf32>
    %527 = vector.shape_cast %526 : vector<2x2x32xf32> to vector<4x32xf32>
    %c256_625 = arith.constant 256 : index
    %c0_626 = arith.constant 0 : index
    %528 = vector.load %arg12[%c256_625, %c0_626] : memref<288x64xf32, #tpu.memory_space<vmem>>, vector<32x64xf32>
    %cst_627 = arith.constant dense<0.000000e+00> : vector<4x64xf32>
    %529 = tpu.matmul %527, %528, %cst_627 {dimension_numbers = #tpu.dot_dimension_numbers<[1], [0], [0], [1], [0, 0, 1, 1], [], []>} : vector<4x32xf32>, vector<32x64xf32>, vector<4x64xf32> -> vector<4x64xf32>
    %530 = arith.addf %525, %529 : vector<4x64xf32>
    %c0_628 = arith.constant 0 : index
    %c0_629 = arith.constant 0 : index
    %531 = vector.load %arg13[%c0_628, %c0_629] : memref<1x64xf32, #tpu.memory_space<vmem>>, vector<1x64xf32>
    %532 = vector.broadcast %531 : vector<1x64xf32> to vector<4x64xf32>
    %533 = arith.addf %530, %532 : vector<4x64xf32>
    %cst_630 = arith.constant 0.000000e+00 : f32
    %534 = vector.broadcast %cst_630 : f32 to vector<4x64xf32>
    %535 = arith.maximumf %533, %534 : vector<4x64xf32>
    %536 = vector.shape_cast %535 : vector<4x64xf32> to vector<1x2x2x64xf32>
    %c0_631 = arith.constant 0 : index
    %c0_632 = arith.constant 0 : index
    %c0_633 = arith.constant 0 : index
    %c0_634 = arith.constant 0 : index
    %537 = vector.load %arg14[%c0_631, %c0_632, %c0_633, %c0_634] : memref<1x2x2x64xf32, #tpu.memory_space<vmem>>, vector<1x2x2x64xf32>
    tpu.vector_store %arg14[%c0_631, %c0_632, %c0_633, %c0_634], %536 {strides = array<i32>} : memref<1x2x2x64xf32, #tpu.memory_space<vmem>>, vector<1x2x2x64xf32>,
    return
  }
  func.func @transform_0(%arg0: i32) -> (i32, i32, i32, i32) {
    %c0_i32 = arith.constant 0 : i32
    %c0_i32_0 = arith.constant 0 : i32
    %c0_i32_1 = arith.constant 0 : i32
    %c0_i32_2 = arith.constant 0 : i32
    return %arg0, %c0_i32, %c0_i32_0, %c0_i32_1 : i32, i32, i32, i32
  }
  func.func @transform_1(%arg0: i32) -> (i32, i32) {
    %c0_i32 = arith.constant 0 : i32
    %c0_i32_0 = arith.constant 0 : i32
    %c0_i32_1 = arith.constant 0 : i32
    return %c0_i32, %c0_i32_0 : i32, i32
  }
  func.func @transform_2(%arg0: i32) -> (i32, i32) {
    %c0_i32 = arith.constant 0 : i32
    %c0_i32_0 = arith.constant 0 : i32
    %c0_i32_1 = arith.constant 0 : i32
    return %c0_i32, %c0_i32_0 : i32, i32
  }
  func.func @transform_3(%arg0: i32) -> (i32, i32) {
    %c0_i32 = arith.constant 0 : i32
    %c0_i32_0 = arith.constant 0 : i32
    %c0_i32_1 = arith.constant 0 : i32
    return %c0_i32, %c0_i32_0 : i32, i32
  }
  func.func @transform_4(%arg0: i32) -> (i32, i32) {
    %c0_i32 = arith.constant 0 : i32
    %c0_i32_0 = arith.constant 0 : i32
    %c0_i32_1 = arith.constant 0 : i32
    return %c0_i32, %c0_i32_0 : i32, i32
  }
  func.func @transform_5(%arg0: i32) -> (i32, i32) {
    %c0_i32 = arith.constant 0 : i32
    %c0_i32_0 = arith.constant 0 : i32
    %c0_i32_1 = arith.constant 0 : i32
    return %c0_i32, %c0_i32_0 : i32, i32
  }
  func.func @transform_6(%arg0: i32) -> (i32, i32) {
    %c0_i32 = arith.constant 0 : i32
    %c0_i32_0 = arith.constant 0 : i32
    %c0_i32_1 = arith.constant 0 : i32
    return %c0_i32, %c0_i32_0 : i32, i32
  }
  func.func @transform_7(%arg0: i32) -> (i32, i32) {
    %c0_i32 = arith.constant 0 : i32
    %c0_i32_0 = arith.constant 0 : i32
    %c0_i32_1 = arith.constant 0 : i32
    return %c0_i32, %c0_i32_0 : i32, i32
  }
  func.func @transform_8(%arg0: i32) -> (i32, i32) {
    %c0_i32 = arith.constant 0 : i32
    %c0_i32_0 = arith.constant 0 : i32
    %c0_i32_1 = arith.constant 0 : i32
    return %c0_i32, %c0_i32_0 : i32, i32
  }
  func.func @transform_9(%arg0: i32) -> (i32, i32) {
    %c0_i32 = arith.constant 0 : i32
    %c0_i32_0 = arith.constant 0 : i32
    %c0_i32_1 = arith.constant 0 : i32
    return %c0_i32, %c0_i32_0 : i32, i32
  }
  func.func @transform_10(%arg0: i32) -> (i32, i32) {
    %c0_i32 = arith.constant 0 : i32
    %c0_i32_0 = arith.constant 0 : i32
    %c0_i32_1 = arith.constant 0 : i32
    return %c0_i32, %c0_i32_0 : i32, i32
  }
  func.func @transform_11(%arg0: i32) -> (i32, i32) {
    %c0_i32 = arith.constant 0 : i32
    %c0_i32_0 = arith.constant 0 : i32
    %c0_i32_1 = arith.constant 0 : i32
    return %c0_i32, %c0_i32_0 : i32, i32
  }
  func.func @transform_12(%arg0: i32) -> (i32, i32) {
    %c0_i32 = arith.constant 0 : i32
    %c0_i32_0 = arith.constant 0 : i32
    %c0_i32_1 = arith.constant 0 : i32
    return %c0_i32, %c0_i32_0 : i32, i32
  }
  func.func @transform_13(%arg0: i32) -> (i32, i32, i32, i32) {
    %c0_i32 = arith.constant 0 : i32
    %c0_i32_0 = arith.constant 0 : i32
    %c0_i32_1 = arith.constant 0 : i32
    %c0_i32_2 = arith.constant 0 : i32
    return %arg0, %c0_i32, %c0_i32_0, %c0_i32_1 : i32, i32, i32, i32
  }
}

</mosaic_0001>

<bundles_post_ra>
// kernel: encoder_forward.1
= control target key start
LH: loop header
LB: loop body
LE: loop exit
PB: predicated region body
PF: predicated region fallthrough
CT: control target
= control target key end

     0   :  { %s14187_s0 = inlined_call_operand.vmem [shape: f32[2,4,4,64], index: 0, kind: input, shape index: {}]   ;;  %s14188_s1 = inlined_call_operand.vmem [shape: f32[576,16], index: 1, kind: input, shape index: {}]   ;;  %s14189_s2 = inlined_call_operand.vmem [shape: f32[1,16], index: 2, kind: input, shape index: {}]   ;;  %s14190_s3 = inlined_call_operand.vmem [shape: f32[400,16], index: 3, kind: input, shape index: {}]   ;;  %s14191_s4 = inlined_call_operand.vmem [shape: f32[1,16], index: 4, kind: input, shape index: {}]   ;;  %s14192_s5 = inlined_call_operand.vmem [shape: f32[144,64], index: 5, kind: input, shape index: {}]   ;;  %s14193_s6 = inlined_call_operand.vmem [shape: f32[1,64], index: 6, kind: input, shape index: {}]   ;;  %s14194_s7 = inlined_call_operand.vmem [shape: f32[2304,32], index: 7, kind: input, shape index: {}]   ;;  %s14195_s8 = inlined_call_operand.vmem [shape: f32[1,32], index: 8, kind: input, shape index: {}]   ;;  %s14196_s9 = inlined_call_operand.vmem [shape: f32[800,32], index: 9, kind: input, shape index: {}]   ;;  %s14197_s10 = inlined_call_operand.vmem [shape: f32[1,32], index: 10, kind: input, shape index: {}]   ;;  %s14198_s11 = inlined_call_operand.vmem [shape: f32[288,64], index: 11, kind: input, shape index: {}]   ;;  %s14199_s12 = inlined_call_operand.vmem [shape: f32[1,64], index: 12, kind: input, shape index: {}]   ;;  %s14200_s13 = inlined_call_operand.hbm [shape: f32[2,2,2,64], index: 13, kind: output, shape index: {}]  }
   0x1   :  { %14201 = sst [smem:[#allocation13_spill]] %s14187_s0 }
   0x2   :  { %14202 = sst [smem:[#allocation14_spill]] %s14188_s1 }
   0x3   :  { %18 = vsyncpa [#allocation10], 0 }
   0x4   :  { %20 = vsyncpa [#allocation10 + $0x1], 0  ;;  %s11922_s25 = smov 0   ;;  %s11924_s26 = smov 0  }
   0x5   :  { %s11926_s27 = smov 0   ;;  %s11928_s28 = smov 0  }
   0x6 LB: > { %s11943_s29 = sadd.s32 4294967295, %s11842_s28   ;;  %s9089_s30 = sadd.s32 4294967294, %s11842_s28   ;;  %s11842_s28 = sphi %s11928_s28, %s14214_s28   ;;  %s11838_s27 = sphi %s11926_s27, %s14213_s27   ;;  %s11834_s26 = sphi %s11924_s26, %s14212_s26   ;;  %s11830_s25 = sphi %s11922_s25, %s14211_s25  }
   0x7   : > { %s11947_s14 = sadd.s32 1, %s11842_s28   ;;  %s311_s15 = sadd.s32 1, %s11838_s27 }
   0x8   : > { %s308_s16 = ssub.s32 %s11842_s28, %s11947_s14  ;;  %p321_p0 = scmp.ne.s32.totalorder %s11838_s27, %s11834_s26 }
   0x9   : > { %p309_p1 = scmp.eq.s32.totalorder %s308_s16, 0  ;;  %p322_p2 = scmp.eq.s32.totalorder %s11943_s29, 1 }
   0xa   : > { %p327_p3 = scmp.ne.s32.totalorder %s11834_s26, %s11830_s25  ;;  %p328_p4 = scmp.eq.s32.totalorder %s9089_s30, 1 }
   0xb   : > { %s11958_s17 = scalar_select %p309_p1, %s11838_s27, %s311_s15  }
   0xc   : > { %p11960_p5 = por %p322_p2, %p321_p0  ;;  %p11964_p6 = por %p328_p4, %p327_p3 }
   0xd   : > { %14203 = sst [smem:[#allocation12_spill]] %s11958_s17  ;;  %p9092_p7 = scmp.ge.s32.totalorder %s11842_s28, 1 }
   0xe   : > { %p390_p8 = scmp.lt.s32.totalorder %s11842_s28, 3 }
  0x10   : > { %p391_p9 = pnand %p9092_p7, %p390_p8 }
  0x11   : > { %s14206_s1 = sld [smem:[#allocation14_spill]] (!%p391_p9)  ;;  %p434_p10 = scmp.lt.s32.totalorder (!%p391_p9), %s11943_s29, 1  ;;  %vm443_vm0 = vcmask (!%p391_p9), 521216   ;;  %v11844_v5 = vmov (!%p391_p9), 0.0   ;;  %vm448_vm1 = vcmask (!%p391_p9), 516096   ;;  %vm457_vm2 = vcmask (!%p391_p9), 519168  }
  0x12   : > { %394 = sbr.rel (%p391_p9) target bundleno = 2175 (0x87f), region = 72  ;;  %444 = vst.msk [vmem:[#allocation2] sm:$0x3f] (!%p391_p9), %vm443_vm0, %v11844_v5  ;;  %446 = vst.msk [vmem:[#allocation2 + $0x28] sm:$0x3f] (!%p391_p9), %vm443_vm0, %v11844_v5  ;;  %s14207_s0 = sld [smem:[#allocation13_spill]] (!%p391_p9) }
  0x13   : > { %4593 = vst [vmem:[#allocation6] sm:$0xff] (!%p391_p9), %v11844_v5  ;;  %4595 = vst [vmem:[#allocation6 + $0x18] sm:$0xff] (!%p391_p9), %v11844_v5  ;;  %vm492_vm3 = vcmask (!%p391_p9), 523264   ;;  %vm1375_vm4 = vcmask (!%p391_p9), 123904   ;;  %vm1368_vm5 = vcmask (!%p391_p9), 130048   ;;  %vm1384_vm6 = vcmask (!%p391_p9), 125952  }
  0x14   : > { %449 = vst.msk [vmem:[#allocation2 + $0x8] sm:$0x1] (!%p391_p9), %vm448_vm1, %v11844_v5  ;;  %450 = vst.msk [vmem:[#allocation2 + $0x10] sm:$0x1] (!%p391_p9), %vm448_vm1, %v11844_v5  ;;  %vm3730_vm7 = vcmask (!%p391_p9), 128000   ;;  %vm3735_vm8 = vcmask (!%p391_p9), 122880  }
  0x15   : > { %451 = vst.msk [vmem:[#allocation2 + $0x18] sm:$0x1] (!%p391_p9), %vm448_vm1, %v11844_v5  ;;  %452 = vst.msk [vmem:[#allocation2 + $0x20] sm:$0x1] (!%p391_p9), %vm448_vm1, %v11844_v5  ;;  %vm4612_vm10 = vcmask (!%p391_p9), 518145   ;;  %s11845_s20 = smov (!%p391_p9), 64  }
  0x16   : > { %453 = vst.msk [vmem:[#allocation2 + $0xd] sm:$0x1] (!%p391_p9), %vm448_vm1, %v11844_v5  ;;  %454 = vst.msk [vmem:[#allocation2 + $0x15] sm:$0x1] (!%p391_p9), %vm448_vm1, %v11844_v5  ;;  %vm4621_vm11 = vcmask (!%p391_p9), 1042945   ;;  %vm4736_vm12 = vcmask (!%p391_p9), 1040384  }
  0x17   : > { %v478_v0 = vld [vmem:[%s14206_s1 + $0x40] sm:$0xff] (!%p391_p9)  ;;  %v479_v1 = vld [vmem:[%s14206_s1 + $0x48] sm:$0xff] (!%p391_p9)  ;;  %v480_v2 = vld [vmem:[%s14206_s1 + $0x50] sm:$0xff] (!%p391_p9)  ;;  %455 = vst.msk [vmem:[#allocation2 + $0x1d] sm:$0x1] (!%p391_p9), %vm448_vm1, %v11844_v5  ;;  %vm4737_vm13 = vcmask (!%p391_p9), 1042434  }
  0x18   : > { %v10750_v3 = vpack.c.bf16 (!%p391_p9), %v479_v1, %v478_v0  ;;  %v481_v4 = vld [vmem:[%s14206_s1 + $0x58] sm:$0xff] (!%p391_p9)  ;;  %v482_v7 = vld [vmem:[%s14206_s1 + $0x60] sm:$0xff] (!%p391_p9)  ;;  %v483_v8 = vld [vmem:[%s14206_s1 + $0x68] sm:$0xff] (!%p391_p9)  ;;  %456 = vst.msk [vmem:[#allocation2 + $0x25] sm:$0x1] (!%p391_p9), %vm448_vm1, %v11844_v5  ;;  %vm4739_vm15 = vcmask (!%p391_p9), 1044484  }
  0x19   : > { %v10754_v6 = vpack.c.bf16 %v481_v4, %v480_v2  ;;  %s435_s24 = scalar_select %p434_p10, %s11943_s29, 1  ;;  %v10758_v9 = vpack.c.bf16 %v483_v8, %v482_v7  ;;  %v484_v10 = vld [vmem:[%s14206_s1 + $0x70] sm:$0xff]  ;;  %v485_v11 = vld [vmem:[%s14206_s1 + $0x78] sm:$0xff]  ;;  %v466_v17 = vld [vmem:[%s14206_s1] sm:$0xff]  ;;  %1376 = vst.msk [vmem:[#allocation3 + $0x10] sm:$0x3] %vm1375_vm4, %v11844_v5 }
  0x1a   : > { %10751 = vmatprep.subr.bf16.mxu0 %v10750_v3  ;;  %v10762_v16 = vpack.c.bf16 %v485_v11, %v484_v10  ;;  %v467_v18 = vld [vmem:[%s14206_s1 + $0x8] sm:$0xff]  ;;  %v468_v20 = vld [vmem:[%s14206_s1 + $0x10] sm:$0xff]  ;;  %v469_v21 = vld [vmem:[%s14206_s1 + $0x18] sm:$0xff]  ;;  %1377 = vst.msk [vmem:[#allocation3 + $0x18] sm:$0x3] %vm1375_vm4, %v11844_v5  ;;  %vm4741_vm1 = vcmask 1046534  }
  0x1b   : > { %10753 = vmatpush3.bf16.msra.mxu0 %v10750_v3  ;;  %s9254_s30 = sshll.u32 %s435_s24, 4  ;;  %v10766_v19 = vpack.c.bf16 %v467_v18, %v466_v17  ;;  %v10770_v25 = vpack.c.bf16 %v469_v21, %v468_v20  ;;  %v470_v26 = vld [vmem:[%s14206_s1 + $0x20] sm:$0xff]  ;;  %v471_v27 = vld [vmem:[%s14206_s1 + $0x28] sm:$0xff]  ;;  %v472_v29 = vld [vmem:[%s14206_s1 + $0x30] sm:$0xff]  ;;  %1378 = vst.msk [vmem:[#allocation3 + $0x20] sm:$0x3] %vm1375_vm4, %v11844_v5 }
  0x1c   : > { %10755 = vmatprep.subr.bf16.mxu0 %v10754_v6  ;;  %s438_s17 = scalar_lea.vmem %s14207_s0, %s9254_s30  ;;  %v10774_v28 = vpack.c.bf16 %v471_v27, %v470_v26  ;;  %v473_v30 = vld [vmem:[%s14206_s1 + $0x38] sm:$0xff]  ;;  %v661_v32 = vld [vmem:[%s14206_s1 + $0x80] sm:$0xff]  ;;  %v662_v33 = vld [vmem:[%s14206_s1 + $0x88] sm:$0xff]  ;;  %1379 = vst.msk [vmem:[#allocation3 + $0x28] sm:$0x3] %vm1375_vm4, %v11844_v5  ;;  %s9255_s24 = sshll.u32 %s11943_s29, 6 }
  0x1d   : > { %v439_v12 = vld [vmem:[%s438_s17] sm:$0xf]  ;;  %v442_v13 = vld [vmem:[%s438_s17 + $0xc] sm:$0xf]  ;;  %v440_v14 = vld [vmem:[%s438_s17 + $0x4] sm:$0xf]  ;;  %v10778_v31 = vpack.c.bf16 %v473_v30, %v472_v29  ;;  %v10782_v34 = vpack.c.bf16 %v662_v33, %v661_v32  ;;  %s14142_s21 = scalar_lea.hbm %s14200_s13, %s9255_s24 }
  0x1e   : > { %458 = vst.msk [vmem:[#allocation2 + $0x9] sm:$0xf] %vm457_vm2, %v439_v12  ;;  %461 = vst.msk [vmem:[#allocation2 + $0x21] sm:$0xf] %vm457_vm2, %v442_v13  ;;  %v441_v15 = vld [vmem:[%s438_s17 + $0x8] sm:$0xf] }
  0x1f   : > { %459 = vst.msk [vmem:[#allocation2 + $0x11] sm:$0xf] %vm457_vm2, %v440_v14  ;;  %10757 = vmatpush3.bf16.msra.mxu0 %v10754_v6  ;;  %460 = vst.msk [vmem:[#allocation2 + $0x19] sm:$0xf] %vm457_vm2, %v441_v15  ;;  %v663_v35 = vld [vmem:[%s14206_s1 + $0x90] sm:$0xff]  ;;  %v664_v36 = vld [vmem:[%s14206_s1 + $0x98] sm:$0xff] }
  0x20   : > { %10759 = vmatprep.subr.bf16.mxu0 %v10758_v9  ;;  %v10786_v39 = vpack.c.bf16 %v664_v36, %v663_v35  ;;  %v665_v40 = vld [vmem:[%s14206_s1 + $0xa0] sm:$0xff]  ;;  %v666_v41 = vld [vmem:[%s14206_s1 + $0xa8] sm:$0xff]  ;;  %v667_v43 = vld [vmem:[%s14206_s1 + $0xb0] sm:$0xff]  ;;  %1380 = vst.msk [vmem:[#allocation3 + $0x16] sm:$0x3] %vm1375_vm4, %v11844_v5 }
  0x21   : > { %v10790_v42 = vpack.c.bf16 %v666_v41, %v665_v40  ;;  %v668_v44 = vld [vmem:[%s14206_s1 + $0xb8] sm:$0xff]  ;;  %v760_v46 = vld [vmem:[%s14206_s1 + $0xc0] sm:$0xff]  ;;  %v761_v47 = vld [vmem:[%s14206_s1 + $0xc8] sm:$0xff]  ;;  %1381 = vst.msk [vmem:[#allocation3 + $0x1e] sm:$0x3] %vm1375_vm4, %v11844_v5 }
  0x22   : > { %v10794_v45 = vpack.c.bf16 %v668_v44, %v667_v43  ;;  %v10798_v48 = vpack.c.bf16 %v761_v47, %v760_v46  ;;  %v762_v49 = vld [vmem:[%s14206_s1 + $0xd0] sm:$0xff]  ;;  %v763_v50 = vld [vmem:[%s14206_s1 + $0xd8] sm:$0xff]  ;;  %v764_v54 = vld [vmem:[%s14206_s1 + $0xe0] sm:$0xff]  ;;  %1382 = vst.msk [vmem:[#allocation3 + $0x26] sm:$0x3] %vm1375_vm4, %v11844_v5 }
  0x23   : > { %10761 = vmatpush3.bf16.msra.mxu0 %v10758_v9  ;;  %v10802_v53 = vpack.c.bf16 %v763_v50, %v762_v49  ;;  %v765_v55 = vld [vmem:[%s14206_s1 + $0xe8] sm:$0xff]  ;;  %v766_v57 = vld [vmem:[%s14206_s1 + $0xf0] sm:$0xff]  ;;  %v767_v58 = vld [vmem:[%s14206_s1 + $0xf8] sm:$0xff]  ;;  %1383 = vst.msk [vmem:[#allocation3 + $0x2e] sm:$0x3] %vm1375_vm4, %v11844_v5  ;;  %vm11848_vm4 = vmmov 0  }
  0x24   : > { %10763 = vmatprep.subr.bf16.mxu0 %v10762_v16  ;;  %v10806_v56 = vpack.c.bf16 %v765_v55, %v764_v54  ;;  %v10810_v59 = vpack.c.bf16 %v767_v58, %v766_v57  ;;  %v859_v60 = vld [vmem:[%s14206_s1 + $0x100] sm:$0xff]  ;;  %v860_v61 = vld [vmem:[%s14206_s1 + $0x108] sm:$0xff]  ;;  %v861_v63 = vld [vmem:[%s14206_s1 + $0x110] sm:$0xff]  ;;  %1369 = vst.msk [vmem:[#allocation3] sm:$0xff] %vm1368_vm5, %v11844_v5 }
  0x25   : > { %v11648_v22 = vld [vmem:[#allocation2 + $0x1] ss:$8 sps:$4 sm:$0xff]   ;;  %v10814_v62 = vpack.c.bf16 %v860_v61, %v859_v60  ;;  %v862_v0 = vld [vmem:[%s14206_s1 + $0x118] sm:$0xff]  ;;  %v865_v8 = vld [vmem:[%s14206_s1 + $0x130] sm:$0xff]  ;;  %1370 = vst.msk [vmem:[#allocation3 + $0x8] sm:$0xff] %vm1368_vm5, %v11844_v5 }
  0x26   : > { %v11649_v23 = vld [vmem:[#allocation2 + $0x11] ss:$8 sps:$4 sm:$0xff]   ;;  %9983 = vmatprep.mubr.msk.f32.mxu0 %vm492_vm3, %v11648_v22  ;;  %v11650_v24 = vld [vmem:[#allocation2] ss:$8 sps:$4 sm:$0xff]   ;;  %v10818_v3 = vpack.c.bf16 %v862_v0, %v861_v63  ;;  %1372 = vst.msk [vmem:[#allocation3 + $0x30] sm:$0xff] %vm1368_vm5, %v11844_v5  ;;  %1373 = vst.msk [vmem:[#allocation3 + $0x38] sm:$0xff] %vm1368_vm5, %v11844_v5 }
  0x27   : > { %10765 = vmatpush3.bf16.msra.mxu0 %v10762_v16  ;;  %v11651_v37 = vld [vmem:[#allocation2 + $0x10] ss:$8 sps:$4 sm:$0xff]   ;;  %v11652_v38 = vld [vmem:[#allocation2 + $0x2] ss:$8 sps:$4 sm:$0xff]   ;;  %vm4738_vm14 = vmor %vm4736_vm12, %vm4737_vm13 }
  0x28   : > { %10767 = vmatprep.subr.bf16.mxu0 %v10766_v19  ;;  %v11653_v51 = vld [vmem:[#allocation2 + $0x12] ss:$8 sps:$4 sm:$0xff]   ;;  %v863_v4 = vld [vmem:[%s14206_s1 + $0x120] sm:$0xff]  ;;  %v864_v6 = vld [vmem:[%s14206_s1 + $0x128] sm:$0xff] }
  0x29   : > { %v11654_v52 = vld [vmem:[#allocation2 + $0x8] ss:$8 sps:$4 sm:$0xff]   ;;  %v11655_v1 = vld [vmem:[#allocation2 + $0x18] ss:$8 sps:$4 sm:$0xff]   ;;  %v10822_v7 = vpack.c.bf16 %v864_v6, %v863_v4  ;;  %vm4740_vm0 = vmor %vm4738_vm14, %vm4739_vm15 }
  0x2a   : > { %9984 = vmatmul.mubr.msk.f32.vlgmr.msra.gmra.mrb[0].mxu0 %vm492_vm3, %v11649_v23  ;;  %v11656_v2 = vld [vmem:[#allocation2 + $0x9] ss:$8 sps:$4 sm:$0xff]   ;;  %v866_v9 = vld [vmem:[%s14206_s1 + $0x138] sm:$0xff]  ;;  %v958_v11 = vld [vmem:[%s14206_s1 + $0x140] sm:$0xff] }
  0x2b   : > { %10769 = vmatpush3.bf16.msra.mxu0 %v10766_v19  ;;  %10002 = vmatprep.mubr.msk.f32.mxu0 %vm492_vm3, %v11650_v24  ;;  %v10826_v10 = vpack.c.bf16 %v866_v9, %v865_v8  ;;  %v959_v12 = vld [vmem:[%s14206_s1 + $0x148] sm:$0xff]  ;;  %v960_v14 = vld [vmem:[%s14206_s1 + $0x150] sm:$0xff]  ;;  %v961_v15 = vld [vmem:[%s14206_s1 + $0x158] sm:$0xff] }
  0x2c   : > { %10771 = vmatprep.subr.bf16.mxu0 %v10770_v25  ;;  %v10830_v13 = vpack.c.bf16 %v959_v12, %v958_v11  ;;  %v11657_v16 = vld [vmem:[#allocation2 + $0x19] ss:$8 sps:$4 sm:$0xff]   ;;  %v11658_v17 = vld [vmem:[#allocation2 + $0xa] ss:$8 sps:$4 sm:$0xff]   ;;  %v10834_v18 = vpack.c.bf16 %v961_v15, %v960_v14  ;;  %v9114_v11 = vld [vmem:[%s14189_s2] ss:$0 sm:$0xff] }
  0x2d   : > { %v962_v19 = vld [vmem:[%s14206_s1 + $0x160] sm:$0xff]  ;;  %v963_v20 = vld [vmem:[%s14206_s1 + $0x168] sm:$0xff]  ;;  %v964_v22 = vld [vmem:[%s14206_s1 + $0x170] sm:$0xff] }
  0x2e   : > { %v10838_v21 = vpack.c.bf16 %v963_v20, %v962_v19  ;;  %v965_v23 = vld [vmem:[%s14206_s1 + $0x178] sm:$0xff]  ;;  %v1059_v26 = vld [vmem:[%s14206_s1 + $0x188] sm:$0xff]  ;;  %v1062_v33 = vld [vmem:[%s14206_s1 + $0x1a0] sm:$0xff] }
  0x2f   : > { %10773 = vmatpush3.bf16.msra.mxu0 %v10770_v25  ;;  %v10842_v24 = vpack.c.bf16 %v965_v23, %v964_v22  ;;  %v1058_v25 = vld [vmem:[%s14206_s1 + $0x180] sm:$0xff]  ;;  %v1061_v29 = vld [vmem:[%s14206_s1 + $0x198] sm:$0xff]  ;;  %v1064_v36 = vld [vmem:[%s14206_s1 + $0x1b0] sm:$0xff] }
  0x30   : > { %10775 = vmatprep.subr.bf16.mxu0 %v10774_v28  ;;  %v10846_v27 = vpack.c.bf16 %v1059_v26, %v1058_v25  ;;  %v11659_v30 = vld [vmem:[#allocation2 + $0x1a] ss:$8 sps:$4 sm:$0xff]   ;;  %v1158_v40 = vld [vmem:[%s14206_s1 + $0x1c8] sm:$0xff]  ;;  %v1163_v50 = vld [vmem:[%s14206_s1 + $0x1f0] sm:$0xff] }
  0x31   : > { %v1160_v43 = vld [vmem:[%s14206_s1 + $0x1d8] sm:$0xff]  ;;  %v11661_v44 = vld [vmem:[#allocation2 + $0x20] ss:$8 sps:$4 sm:$0xff]   ;;  %v1262_v0 = vld [vmem:[%s14206_s1 + $0x230] sm:$0xff] }
  0x32   : > { %v1161_v47 = vld [vmem:[%s14206_s1 + $0x1e0] sm:$0xff]  ;;  %v1257_v54 = vld [vmem:[%s14206_s1 + $0x208] sm:$0xff]  ;;  %v1259_v57 = vld [vmem:[%s14206_s1 + $0x218] sm:$0xff] }
  0x33   : > { %10777 = vmatpush3.bf16.msra.mxu0 %v10774_v28  ;;  %v1060_v28 = vld [vmem:[%s14206_s1 + $0x190] sm:$0xff]  ;;  %v11663_v58 = vld [vmem:[#allocation2 + $0x21] ss:$8 sps:$4 sm:$0xff]   ;;  %v1400_v6 = vld [vmem:[%s14190_s3 + $0x18] sm:$0xff] }
  0x34   : > { %10779 = vmatprep.subr.bf16.mxu0 %v10778_v31  ;;  %v10850_v32 = vpack.c.bf16 %v1061_v29, %v1060_v28  ;;  %v1260_v61 = vld [vmem:[%s14206_s1 + $0x220] sm:$0xff]  ;;  %v1399_v4 = vld [vmem:[%s14190_s3 + $0x10] sm:$0xff]  ;;  %v1394_v9 = vld [vmem:[%s14190_s3 + $0x8] sm:$0xff] }
  0x35   : > { %v10894_v8 = vpack.c.bf16 %v1400_v6, %v1399_v4  ;;  %v11666_v5 = vld [vmem:[#allocation3 + $0x1] ss:$8 sps:$4 sm:$0xff]   ;;  %v1575_v20 = vld [vmem:[%s14190_s3 + $0x20] sm:$0xff]  ;;  %vm12763_vm2 = vmor %vm4740_vm0, %vm4741_vm1 }
  0x36   : > { %10142 = vmatprep.mubr.msk.f32.mxu1 %vm1368_vm5, %v11666_v5  ;;  %v11668_v22 = vld [vmem:[#allocation3] ss:$8 sps:$4 sm:$0xff]  }
  0x37   : > { %10781 = vmatpush3.bf16.msra.mxu0 %v10778_v31  ;;  %v11660_v31 = vld [vmem:[#allocation2 + $0x10] ss:$8 sps:$4 sm:$0xff]   ;;  %10895 = vmatprep.subr.bf16.mxu1 %v10894_v8 }
  0x38   : > { %10783 = vmatprep.subr.bf16.mxu0 %v10782_v34  ;;  %10897 = vmatpush3.bf16.msra.mxu1 %v10894_v8  ;;  %v1668_v25 = vld [vmem:[%s14190_s3 + $0x30] sm:$0xff]  ;;  %v1669_v26 = vld [vmem:[%s14190_s3 + $0x38] sm:$0xff]  ;;  %v2507_v8 = vld [vmem:[%s14190_s3 + $0xc8] sm:$0xff] }
  0x39   : > { %v10906_v29 = vpack.c.bf16 %v1669_v26, %v1668_v25  ;;  %v2879_v26 = vld [vmem:[%s14190_s3 + $0x100] sm:$0xff] }
  0x3a   : > { %10003 = vmatmul.mubr.msk.f32.vlgmr.msra.gmra.mrb[0].mxu0 %vm492_vm3, %v11651_v37  ;;  %v1065_v37 = vld [vmem:[%s14206_s1 + $0x1b8] sm:$0xff] }
  0x3b   : > { %10785 = vmatpush3.bf16.msra.mxu0 %v10782_v34  ;;  %10021 = vmatprep.mubr.msk.f32.mxu0 %vm492_vm3, %v11652_v38  ;;  %v1063_v34 = vld [vmem:[%s14206_s1 + $0x1a8] sm:$0xff]  ;;  %v10858_v38 = vpack.c.bf16 %v1065_v37, %v1064_v36  ;;  %v1856_v36 = vld [vmem:[%s14190_s3 + $0x58] sm:$0xff] }
  0x3c   : > { %10787 = vmatprep.subr.bf16.mxu0 %v10786_v39  ;;  %v10854_v35 = vpack.c.bf16 %v1063_v34, %v1062_v33  ;;  %v11674_v37 = vld [vmem:[#allocation3 + $0x4] ss:$8 sps:$4 sm:$0xff]  }
  0x3f   : > { %10789 = vmatpush3.bf16.msra.mxu0 %v10786_v39  ;;  %v1157_v39 = vld [vmem:[%s14206_s1 + $0x1c0] sm:$0xff] }
  0x40   : > { %10791 = vmatprep.subr.bf16.mxu0 %v10790_v42  ;;  %v10862_v41 = vpack.c.bf16 %v1158_v40, %v1157_v39  ;;  %v1948_v40 = vld [vmem:[%s14190_s3 + $0x60] sm:$0xff] }
  0x43   : > { %10793 = vmatpush3.bf16.msra.mxu0 %v10790_v42  ;;  %v1159_v42 = vld [vmem:[%s14206_s1 + $0x1d0] sm:$0xff] }
  0x44   : > { %10795 = vmatprep.subr.bf16.mxu0 %v10794_v45  ;;  %v10866_v46 = vpack.c.bf16 %v1160_v43, %v1159_v42 }
  0x47   : > { %10797 = vmatpush3.bf16.msra.mxu0 %v10794_v45  ;;  %v11662_v45 = vld [vmem:[#allocation2 + $0x11] ss:$8 sps:$4 sm:$0xff]  }
  0x48   : > { %10799 = vmatprep.subr.bf16.mxu0 %v10798_v48 }
  0x4a   : > { %10022 = vmatmul.mubr.msk.f32.vlgmr.msra.gmra.mrb[0].mxu0 %vm492_vm3, %v11653_v51  ;;  %v1164_v51 = vld [vmem:[%s14206_s1 + $0x1f8] sm:$0xff] }
  0x4b   : > { %10801 = vmatpush3.bf16.msra.mxu0 %v10798_v48  ;;  %10040 = vmatprep.mubr.msk.f32.mxu0 %vm492_vm3, %v11654_v52  ;;  %v1162_v48 = vld [vmem:[%s14206_s1 + $0x1e8] sm:$0xff]  ;;  %v10874_v52 = vpack.c.bf16 %v1164_v51, %v1163_v50  ;;  %v2134_v50 = vld [vmem:[%s14190_s3 + $0x80] sm:$0xff] }
  0x4c   : > { %10803 = vmatprep.subr.bf16.mxu0 %v10802_v53  ;;  %v10870_v49 = vpack.c.bf16 %v1162_v48, %v1161_v47  ;;  %v2135_v51 = vld [vmem:[%s14190_s3 + $0x88] sm:$0xff] }
  0x4f   : > { %10805 = vmatpush3.bf16.msra.mxu0 %v10802_v53  ;;  %v1256_v53 = vld [vmem:[%s14206_s1 + $0x200] sm:$0xff] }
  0x50   : > { %10807 = vmatprep.subr.bf16.mxu0 %v10806_v56  ;;  %v10878_v55 = vpack.c.bf16 %v1257_v54, %v1256_v53  ;;  %v10926_v53 = vpack.c.bf16 %v2135_v51, %v2134_v50  ;;  %v3345_v51 = vld [vmem:[%s14190_s3 + $0x150] sm:$0xff] }
  0x53   : > { %10809 = vmatpush3.bf16.msra.mxu0 %v10806_v56  ;;  %v1258_v56 = vld [vmem:[%s14206_s1 + $0x210] sm:$0xff] }
  0x54   : > { %10811 = vmatprep.subr.bf16.mxu0 %v10810_v59  ;;  %v10882_v60 = vpack.c.bf16 %v1259_v57, %v1258_v56  ;;  %v2228_v56 = vld [vmem:[%s14190_s3 + $0x98] sm:$0xff] }
  0x57   : > { %10813 = vmatpush3.bf16.msra.mxu0 %v10810_v59  ;;  %v11664_v59 = vld [vmem:[#allocation2 + $0x12] ss:$8 sps:$4 sm:$0xff]  }
  0x58   : > { %10815 = vmatprep.subr.bf16.mxu0 %v10814_v62 }
  0x5a   : > { %10041 = vmatmul.mubr.msk.f32.vlgmr.msra.gmra.mrb[0].mxu0 %vm492_vm3, %v11655_v1  ;;  %v1263_v1 = vld [vmem:[%s14206_s1 + $0x238] sm:$0xff] }
  0x5b   : > { %10817 = vmatpush3.bf16.msra.mxu0 %v10814_v62  ;;  %10059 = vmatprep.mubr.msk.f32.mxu0 %vm492_vm3, %v11656_v2  ;;  %v1261_v62 = vld [vmem:[%s14206_s1 + $0x228] sm:$0xff]  ;;  %v10890_v2 = vpack.c.bf16 %v1263_v1, %v1262_v0  ;;  %v2413_v1 = vld [vmem:[%s14190_s3 + $0xb0] sm:$0xff] }
  0x5c   : > { %10819 = vmatprep.subr.bf16.mxu0 %v10818_v3  ;;  %v10886_v63 = vpack.c.bf16 %v1261_v62, %v1260_v61  ;;  %v2321_v61 = vld [vmem:[%s14190_s3 + $0xa8] sm:$0xff] }
  0x5f   : > { %10821 = vmatpush3.bf16.msra.mxu0 %v10818_v3  ;;  %v11665_v3 = vld [vmem:[#allocation2 + $0x22] ss:$8 sps:$4 sm:$0xff]  }
  0x60   : > { %10823 = vmatprep.subr.bf16.mxu0 %v10822_v7 }
  0x63   : > { %10825 = vmatpush3.bf16.msra.mxu0 %v10822_v7  ;;  %v1393_v7 = vld [vmem:[%s14190_s3] sm:$0xff] }
  0x64   : > { %10827 = vmatprep.subr.bf16.mxu0 %v10826_v10 }
  0x67   : > { %10829 = vmatpush3.bf16.msra.mxu0 %v10826_v10  ;;  %v10898_v10 = vpack.c.bf16 %v1394_v9, %v1393_v7  ;;  %v2506_v7 = vld [vmem:[%s14190_s3 + $0xc0] sm:$0xff] }
  0x68   : > { %10831 = vmatprep.subr.bf16.mxu0 %v10830_v13 }
  0x69   : > { %10899 = vmatprep.subr.bf16.mxu1 %v10898_v10 }
  0x6a   : > { %10060 = vmatmul.mubr.msk.f32.vlgmr.msra.gmra.mrb[0].mxu0 %vm492_vm3, %v11657_v16 }
  0x6b   : > { %10833 = vmatpush3.bf16.msra.mxu0 %v10830_v13  ;;  %10078 = vmatprep.mubr.msk.f32.mxu0 %vm492_vm3, %v11658_v17 }
  0x6c   : > { %10835 = vmatprep.subr.bf16.mxu0 %v10834_v18 }
  0x6f   : > { %10837 = vmatpush3.bf16.msra.mxu0 %v10834_v18 }
  0x70   : > { %10839 = vmatprep.subr.bf16.mxu0 %v10838_v21 }
  0x73   : > { %10841 = vmatpush3.bf16.msra.mxu0 %v10838_v21  ;;  %v1576_v21 = vld [vmem:[%s14190_s3 + $0x28] sm:$0xff] }
  0x74   : > { %10843 = vmatprep.subr.bf16.mxu0 %v10842_v24 }
  0x77   : > { %10845 = vmatpush3.bf16.msra.mxu0 %v10842_v24  ;;  %v10902_v24 = vpack.c.bf16 %v1576_v21, %v1575_v20  ;;  %v2786_v21 = vld [vmem:[%s14190_s3 + $0xf0] sm:$0xff] }
  0x78   : > { %10847 = vmatprep.subr.bf16.mxu0 %v10846_v27 }
  0x7a   : > { %10079 = vmatmul.mubr.msk.f32.vlgmr.msra.gmra.mrb[0].mxu0 %vm492_vm3, %v11659_v30  ;;  %v1761_v30 = vld [vmem:[%s14190_s3 + $0x40] sm:$0xff] }
  0x7b   : > { %10849 = vmatpush3.bf16.msra.mxu0 %v10846_v27  ;;  %10097 = vmatprep.mubr.msk.f32.mxu0 %vm492_vm3, %v11660_v31  ;;  %v11670_v27 = vld [vmem:[#allocation3 + $0x2] ss:$8 sps:$4 sm:$0xff]   ;;  %v1762_v31 = vld [vmem:[%s14190_s3 + $0x48] sm:$0xff] }
  0x7c   : > { %10851 = vmatprep.subr.bf16.mxu0 %v10850_v32  ;;  %v10910_v34 = vpack.c.bf16 %v1762_v31, %v1761_v30  ;;  %v2972_v31 = vld [vmem:[%s14190_s3 + $0x110] sm:$0xff] }
  0x7f   : > { %10853 = vmatpush3.bf16.msra.mxu0 %v10850_v32  ;;  %v11672_v32 = vld [vmem:[#allocation3 + $0x3] ss:$8 sps:$4 sm:$0xff]  }
  0x80   : > { %10855 = vmatprep.subr.bf16.mxu0 %v10854_v35 }
  0x83   : > { %10857 = vmatpush3.bf16.msra.mxu0 %v10854_v35  ;;  %v1855_v35 = vld [vmem:[%s14190_s3 + $0x50] sm:$0xff] }
  0x84   : > { %10859 = vmatprep.subr.bf16.mxu0 %v10858_v38  ;;  %v10914_v39 = vpack.c.bf16 %v1856_v36, %v1855_v35  ;;  %v3065_v36 = vld [vmem:[%s14190_s3 + $0x120] sm:$0xff] }
  0x87   : > { %10861 = vmatpush3.bf16.msra.mxu0 %v10858_v38 }
  0x88   : > { %10863 = vmatprep.subr.bf16.mxu0 %v10862_v41 }
  0x8a   : > { %10098 = vmatmul.mubr.msk.f32.vlgmr.msra.gmra.mrb[0].mxu0 %vm492_vm3, %v11661_v44 }
  0x8b   : > { %10865 = vmatpush3.bf16.msra.mxu0 %v10862_v41  ;;  %10116 = vmatprep.mubr.msk.f32.mxu0 %vm492_vm3, %v11662_v45  ;;  %v1949_v41 = vld [vmem:[%s14190_s3 + $0x68] sm:$0xff]  ;;  %v2041_v45 = vld [vmem:[%s14190_s3 + $0x70] sm:$0xff] }
  0x8c   : > { %10867 = vmatprep.subr.bf16.mxu0 %v10866_v46  ;;  %v10918_v43 = vpack.c.bf16 %v1949_v41, %v1948_v40  ;;  %v3158_v41 = vld [vmem:[%s14190_s3 + $0x130] sm:$0xff] }
  0x8f   : > { %10869 = vmatpush3.bf16.msra.mxu0 %v10866_v46  ;;  %v2042_v46 = vld [vmem:[%s14190_s3 + $0x78] sm:$0xff] }
  0x90   : > { %10871 = vmatprep.subr.bf16.mxu0 %v10870_v49  ;;  %v10922_v48 = vpack.c.bf16 %v2042_v46, %v2041_v45  ;;  %v3252_v46 = vld [vmem:[%s14190_s3 + $0x140] sm:$0xff] }
  0x93   : > { %10873 = vmatpush3.bf16.msra.mxu0 %v10870_v49 }
  0x94   : > { %10875 = vmatprep.subr.bf16.mxu0 %v10874_v52 }
  0x97   : > { %10877 = vmatpush3.bf16.msra.mxu0 %v10874_v52 }
  0x98   : > { %10879 = vmatprep.subr.bf16.mxu0 %v10878_v55 }
  0x9a   : > { %10117 = vmatmul.mubr.msk.f32.vlgmr.msra.gmra.mrb[0].mxu0 %vm492_vm3, %v11663_v58 }
  0x9b   : > { %10881 = vmatpush3.bf16.msra.mxu0 %v10878_v55  ;;  %10135 = vmatprep.mubr.msk.f32.mxu0 %vm492_vm3, %v11664_v59  ;;  %v2227_v55 = vld [vmem:[%s14190_s3 + $0x90] sm:$0xff] }
  0x9c   : > { %10883 = vmatprep.subr.bf16.mxu0 %v10882_v60  ;;  %v10930_v58 = vpack.c.bf16 %v2228_v56, %v2227_v55  ;;  %v3438_v56 = vld [vmem:[%s14190_s3 + $0x160] sm:$0xff] }
  0x9f   : > { %10885 = vmatpush3.bf16.msra.mxu0 %v10882_v60  ;;  %v2320_v60 = vld [vmem:[%s14190_s3 + $0xa0] sm:$0xff] }
  0xa0   : > { %10887 = vmatprep.subr.bf16.mxu0 %v10886_v63 }
  0xa3   : > { %10889 = vmatpush3.bf16.msra.mxu0 %v10886_v63  ;;  %v10934_v63 = vpack.c.bf16 %v2321_v61, %v2320_v60  ;;  %v3531_v61 = vld [vmem:[%s14190_s3 + $0x170] sm:$0xff] }
  0xa4   : > { %10891 = vmatprep.subr.bf16.mxu0 %v10890_v2 }
  0xa7   : > { %10893 = vmatpush3.bf16.msra.mxu0 %v10890_v2  ;;  %v2414_v2 = vld [vmem:[%s14190_s3 + $0xb8] sm:$0xff] }
  0xa8   : > { %v10938_v4 = vpack.c.bf16 %v2414_v2, %v2413_v1  ;;  %v3624_v2 = vld [vmem:[%s14190_s3 + $0x180] sm:$0xff] }
  0xaa   : > { %10136 = vmatmul.mubr.msk.f32.vlgmr.msra.gmra.mrb[0].mxu0 %vm492_vm3, %v11665_v3 }
 0x17d   : > { %v10137_v12 = vpop.f32.mrb[0].mxu0 }
 0x17e   : > { %v1359_v13 = vadd.f32 %v10137_v12, %v9114_v11  ;;  %v1340_v14 = vpop.f32.mrb[1].mxu0  ;;  %v2600_v12 = vld [vmem:[%s14190_s3 + $0xd8] sm:$0xff] }
 0x17f   : > { %v1358_v15 = vadd.f32 %v9114_v11, %v1340_v14  ;;  %v2599_v11 = vld [vmem:[%s14190_s3 + $0xd0] sm:$0xff] }
 0x180   : > { %v1361_v16 = vmax.f32 %v1359_v13, 0.0  ;;  %v10946_v14 = vpack.c.bf16 %v2600_v12, %v2599_v11  ;;  %v3759_v11 = vld [vmem:[%s14192_s5 + $0x18] sm:$0xff] }
 0x181   : > { %v1360_v17 = vmax.f32 %v1358_v15, 0.0 }
 0x182   : > { %v1365_v18 = vcombine.high %v1361_v16, %v1361_v16  ;;  %1387 = vst.msk [vmem:[#allocation3 + $0x22] sm:$0xf] %vm1384_vm6, %v1361_v16  ;;  %v2692_v16 = vld [vmem:[%s14190_s3 + $0xe0] sm:$0xff] }
 0x183   : > { %v1364_v19 = vcombine.high %v1360_v17, %v1360_v17  ;;  %1385 = vst.msk [vmem:[#allocation3 + $0x12] sm:$0xf] %vm1384_vm6, %v1360_v17  ;;  %v2693_v17 = vld [vmem:[%s14190_s3 + $0xe8] sm:$0xff] }
 0x184   : > { %1388 = vst.msk [vmem:[#allocation3 + $0x2a] sm:$0xf] %vm1384_vm6, %v1365_v18 }
 0x185   : > { %1386 = vst.msk [vmem:[#allocation3 + $0x1a] sm:$0xf] %vm1384_vm6, %v1364_v19  ;;  %v10950_v19 = vpack.c.bf16 %v2693_v17, %v2692_v16  ;;  %v9165_v17 = vld [vmem:[%s14191_s4] ss:$0 sm:$0xff] }
 0x18a   : > { %v11676_v44 = vld [vmem:[#allocation3 + $0x8] ss:$8 sps:$4 sm:$0xff]   ;;  %v11684_v0 = vld [vmem:[#allocation3 + $0xc] ss:$8 sps:$4 sm:$0xff]  }
 0x18b   : > { %v11678_v49 = vld [vmem:[#allocation3 + $0x9] ss:$8 sps:$4 sm:$0xff]  }
 0x18c   : > { %v11667_v23 = vld [vmem:[#allocation3 + $0x11] ss:$8 sps:$4 sm:$0xff]   ;;  %v11687_v9 = vld [vmem:[#allocation3 + $0x20] ss:$8 sps:$4 sm:$0xff]  }
 0x18d   : > { %10143 = vmatmul.mubr.msk.f32.vlgmr.msra.gmra.mrb[0].mxu1 %vm1368_vm5, %v11667_v23  ;;  %v11669_v28 = vld [vmem:[#allocation3 + $0x10] ss:$8 sps:$4 sm:$0xff]   ;;  %v11675_v42 = vld [vmem:[#allocation3 + $0x14] ss:$8 sps:$4 sm:$0xff]   ;;  %v11689_v13 = vld [vmem:[#allocation3 + $0x21] ss:$8 sps:$4 sm:$0xff]  }
 0x18e   : > { %10901 = vmatpush3.bf16.msra.mxu1 %v10898_v10  ;;  %10149 = vmatprep.mubr.msk.f32.mxu1 %vm1368_vm5, %v11668_v22  ;;  %v11671_v33 = vld [vmem:[#allocation3 + $0x12] ss:$8 sps:$4 sm:$0xff]   ;;  %v10942_v10 = vpack.c.bf16 %v2507_v8, %v2506_v7  ;;  %v11691_v18 = vld [vmem:[#allocation3 + $0x22] ss:$8 sps:$4 sm:$0xff]  }
 0x18f   : > { %10903 = vmatprep.subr.bf16.mxu1 %v10902_v24  ;;  %v11673_v38 = vld [vmem:[#allocation3 + $0x13] ss:$8 sps:$4 sm:$0xff]   ;;  %v2787_v22 = vld [vmem:[%s14190_s3 + $0xf8] sm:$0xff] }
 0x190   : > { %v11677_v47 = vld [vmem:[#allocation3 + $0x18] ss:$8 sps:$4 sm:$0xff]   ;;  %v11680_v54 = vld [vmem:[#allocation3 + $0xa] ss:$8 sps:$4 sm:$0xff]   ;;  %v11685_v3 = vld [vmem:[#allocation3 + $0x1c] ss:$8 sps:$4 sm:$0xff]  }
 0x191   : > { %v11679_v52 = vld [vmem:[#allocation3 + $0x19] ss:$8 sps:$4 sm:$0xff]   ;;  %v11682_v59 = vld [vmem:[#allocation3 + $0xb] ss:$8 sps:$4 sm:$0xff]  }
 0x192   : > { %v11681_v57 = vld [vmem:[#allocation3 + $0x1a] ss:$8 sps:$4 sm:$0xff]  }
 0x193   : > { %v11683_v62 = vld [vmem:[#allocation3 + $0x1b] ss:$8 sps:$4 sm:$0xff]  }
 0x194   : > { %v11686_v6 = vld [vmem:[#allocation3 + $0x10] ss:$8 sps:$4 sm:$0xff]   ;;  %v11693_v23 = vld [vmem:[#allocation3 + $0x23] ss:$8 sps:$4 sm:$0xff]   ;;  %v11694_v25 = vld [vmem:[#allocation3 + $0x14] ss:$8 sps:$4 sm:$0xff]  }
 0x195   : > { %10150 = vmatmul.mubr.msk.f32.vlgmr.msra.gmra.mrb[0].mxu1 %vm1368_vm5, %v11669_v28  ;;  %v11688_v5 = vld [vmem:[#allocation3 + $0x11] ss:$8 sps:$4 sm:$0xff]   ;;  %v11695_v28 = vld [vmem:[#allocation3 + $0x24] ss:$8 sps:$4 sm:$0xff]   ;;  %v11706_v55 = vld [vmem:[#allocation3 + $0x20] ss:$8 sps:$4 sm:$0xff]  }
 0x196   : > { %10905 = vmatpush3.bf16.msra.mxu1 %v10902_v24  ;;  %10156 = vmatprep.mubr.msk.f32.mxu1 %vm1368_vm5, %v11670_v27  ;;  %v11690_v15 = vld [vmem:[#allocation3 + $0x12] ss:$8 sps:$4 sm:$0xff]   ;;  %v10954_v24 = vpack.c.bf16 %v2787_v22, %v2786_v21  ;;  %v11708_v60 = vld [vmem:[#allocation3 + $0x21] ss:$8 sps:$4 sm:$0xff]  }
 0x197   : > { %10907 = vmatprep.subr.bf16.mxu1 %v10906_v29  ;;  %v11692_v20 = vld [vmem:[#allocation3 + $0x13] ss:$8 sps:$4 sm:$0xff]   ;;  %v11710_v1 = vld [vmem:[#allocation3 + $0x22] ss:$8 sps:$4 sm:$0xff]  }
 0x198   : > { %v2880_v27 = vld [vmem:[%s14190_s3 + $0x108] sm:$0xff]  ;;  %v11712_v7 = vld [vmem:[#allocation3 + $0x23] ss:$8 sps:$4 sm:$0xff]  }
 0x199   : > { %v11696_v30 = vld [vmem:[#allocation3 + $0x18] ss:$8 sps:$4 sm:$0xff]   ;;  %v11704_v50 = vld [vmem:[#allocation3 + $0x1c] ss:$8 sps:$4 sm:$0xff]  }
 0x19a   : > { %v11698_v35 = vld [vmem:[#allocation3 + $0x19] ss:$8 sps:$4 sm:$0xff]  }
 0x19b   : > { %v11700_v40 = vld [vmem:[#allocation3 + $0x1a] ss:$8 sps:$4 sm:$0xff]  }
 0x19c   : > { %v11702_v45 = vld [vmem:[#allocation3 + $0x1b] ss:$8 sps:$4 sm:$0xff]  }
 0x19d   : > { %10157 = vmatmul.mubr.msk.f32.vlgmr.msra.gmra.mrb[0].mxu1 %vm1368_vm5, %v11671_v33  ;;  %v11697_v33 = vld [vmem:[#allocation3 + $0x28] ss:$8 sps:$4 sm:$0xff]  }
 0x19e   : > { %10909 = vmatpush3.bf16.msra.mxu1 %v10906_v29  ;;  %10163 = vmatprep.mubr.msk.f32.mxu1 %vm1368_vm5, %v11672_v32  ;;  %v10958_v29 = vpack.c.bf16 %v2880_v27, %v2879_v26  ;;  %v2973_v32 = vld [vmem:[%s14190_s3 + $0x118] sm:$0xff]  ;;  %v11713_v8 = vld [vmem:[#allocation3 + $0x33] ss:$8 sps:$4 sm:$0xff]  }
 0x19f   : > { %10911 = vmatprep.subr.bf16.mxu1 %v10910_v34  ;;  %v3934_v26 = vld [vmem:[%s14192_s5 + $0x20] sm:$0xff]  ;;  %v3935_v27 = vld [vmem:[%s14192_s5 + $0x28] sm:$0xff] }
 0x1a5   : > { %10164 = vmatmul.mubr.msk.f32.vlgmr.msra.gmra.mrb[0].mxu1 %vm1368_vm5, %v11673_v38  ;;  %v11699_v38 = vld [vmem:[#allocation3 + $0x29] ss:$8 sps:$4 sm:$0xff]  }
 0x1a6   : > { %10913 = vmatpush3.bf16.msra.mxu1 %v10910_v34  ;;  %10170 = vmatprep.mubr.msk.f32.mxu1 %vm1368_vm5, %v11674_v37  ;;  %v10962_v34 = vpack.c.bf16 %v2973_v32, %v2972_v31  ;;  %v3066_v37 = vld [vmem:[%s14190_s3 + $0x128] sm:$0xff]  ;;  %v4027_v32 = vld [vmem:[%s14192_s5 + $0x30] sm:$0xff] }
 0x1a7   : > { %10915 = vmatprep.subr.bf16.mxu1 %v10914_v39 }
 0x1ad   : > { %10171 = vmatmul.mubr.msk.f32.vlgmr.msra.gmra.mrb[0].mxu1 %vm1368_vm5, %v11675_v42  ;;  %v3159_v42 = vld [vmem:[%s14190_s3 + $0x138] sm:$0xff] }
 0x1ae   : > { %10917 = vmatpush3.bf16.msra.mxu1 %v10914_v39  ;;  %10177 = vmatprep.mubr.msk.f32.mxu1 %vm1368_vm5, %v11676_v44  ;;  %v10966_v39 = vpack.c.bf16 %v3066_v37, %v3065_v36  ;;  %v10970_v44 = vpack.c.bf16 %v3159_v42, %v3158_v41  ;;  %v4120_v37 = vld [vmem:[%s14192_s5 + $0x40] sm:$0xff]  ;;  %v4213_v42 = vld [vmem:[%s14192_s5 + $0x50] sm:$0xff] }
 0x1af   : > { %10919 = vmatprep.subr.bf16.mxu1 %v10918_v43 }
 0x1b5   : > { %10178 = vmatmul.mubr.msk.f32.vlgmr.msra.gmra.mrb[0].mxu1 %vm1368_vm5, %v11677_v47  ;;  %v3253_v47 = vld [vmem:[%s14190_s3 + $0x148] sm:$0xff] }
 0x1b6   : > { %10921 = vmatpush3.bf16.msra.mxu1 %v10918_v43  ;;  %10184 = vmatprep.mubr.msk.f32.mxu1 %vm1368_vm5, %v11678_v49  ;;  %v11701_v43 = vld [vmem:[#allocation3 + $0x2a] ss:$8 sps:$4 sm:$0xff]   ;;  %v10974_v49 = vpack.c.bf16 %v3253_v47, %v3252_v46 }
 0x1b7   : > { %10923 = vmatprep.subr.bf16.mxu1 %v10922_v48  ;;  %v4307_v47 = vld [vmem:[%s14192_s5 + $0x60] sm:$0xff] }
 0x1bd   : > { %10185 = vmatmul.mubr.msk.f32.vlgmr.msra.gmra.mrb[0].mxu1 %vm1368_vm5, %v11679_v52  ;;  %v3346_v52 = vld [vmem:[%s14190_s3 + $0x158] sm:$0xff] }
 0x1be   : > { %10925 = vmatpush3.bf16.msra.mxu1 %v10922_v48  ;;  %10191 = vmatprep.mubr.msk.f32.mxu1 %vm1368_vm5, %v11680_v54  ;;  %v11703_v48 = vld [vmem:[#allocation3 + $0x2b] ss:$8 sps:$4 sm:$0xff]   ;;  %v10978_v54 = vpack.c.bf16 %v3346_v52, %v3345_v51  ;;  %v4400_v52 = vld [vmem:[%s14192_s5 + $0x70] sm:$0xff] }
 0x1bf   : > { %10927 = vmatprep.subr.bf16.mxu1 %v10926_v53 }
 0x1c5   : > { %10192 = vmatmul.mubr.msk.f32.vlgmr.msra.gmra.mrb[0].mxu1 %vm1368_vm5, %v11681_v57  ;;  %v3439_v57 = vld [vmem:[%s14190_s3 + $0x168] sm:$0xff] }
 0x1c6   : > { %10929 = vmatpush3.bf16.msra.mxu1 %v10926_v53  ;;  %10198 = vmatprep.mubr.msk.f32.mxu1 %vm1368_vm5, %v11682_v59  ;;  %v11705_v53 = vld [vmem:[#allocation3 + $0x2c] ss:$8 sps:$4 sm:$0xff]   ;;  %v10982_v59 = vpack.c.bf16 %v3439_v57, %v3438_v56 }
 0x1c7   : > { %10931 = vmatprep.subr.bf16.mxu1 %v10930_v58  ;;  %v4493_v57 = vld [vmem:[%s14192_s5 + $0x80] sm:$0xff] }
 0x1cd   : > { %10199 = vmatmul.mubr.msk.f32.vlgmr.msra.gmra.mrb[0].mxu1 %vm1368_vm5, %v11683_v62  ;;  %v3532_v62 = vld [vmem:[%s14190_s3 + $0x178] sm:$0xff] }
 0x1ce   : > { %10933 = vmatpush3.bf16.msra.mxu1 %v10930_v58  ;;  %10205 = vmatprep.mubr.msk.f32.mxu1 %vm1368_vm5, %v11684_v0  ;;  %v11707_v58 = vld [vmem:[#allocation3 + $0x30] ss:$8 sps:$4 sm:$0xff]   ;;  %v10986_v0 = vpack.c.bf16 %v3532_v62, %v3531_v61 }
 0x1cf   : > { %10935 = vmatprep.subr.bf16.mxu1 %v10934_v63 }
 0x1d5   : > { %10206 = vmatmul.mubr.msk.f32.vlgmr.msra.gmra.mrb[0].mxu1 %vm1368_vm5, %v11685_v3  ;;  %v3625_v3 = vld [vmem:[%s14190_s3 + $0x188] sm:$0xff] }
 0x1d6   : > { %10937 = vmatpush3.bf16.msra.mxu1 %v10934_v63  ;;  %10212 = vmatprep.mubr.msk.f32.mxu1 %vm1368_vm5, %v11686_v6  ;;  %v11709_v63 = vld [vmem:[#allocation3 + $0x31] ss:$8 sps:$4 sm:$0xff]   ;;  %v10990_v6 = vpack.c.bf16 %v3625_v3, %v3624_v2 }
 0x1d7   : > { %10939 = vmatprep.subr.bf16.mxu1 %v10938_v4  ;;  %v4701_v2 = vld [vmem:[%s14194_s7 + $0x88] sm:$0xff]  ;;  %v4684_v3 = vld [vmem:[%s14194_s7] sm:$0xff] }
 0x1dd   : > { %10213 = vmatmul.mubr.msk.f32.vlgmr.msra.gmra.mrb[0].mxu1 %vm1368_vm5, %v11687_v9  ;;  %v11714_v9 = vld [vmem:[#allocation3 + $0x24] ss:$8 sps:$4 sm:$0xff]  }
 0x1de   : > { %10941 = vmatpush3.bf16.msra.mxu1 %v10938_v4  ;;  %10219 = vmatprep.mubr.msk.f32.mxu1 %vm1368_vm5, %v11688_v5  ;;  %v11711_v4 = vld [vmem:[#allocation3 + $0x32] ss:$8 sps:$4 sm:$0xff]   ;;  %v3758_v5 = vld [vmem:[%s14192_s5 + $0x10] sm:$0xff] }
 0x1df   : > { %10943 = vmatprep.subr.bf16.mxu1 %v10942_v10  ;;  %v10994_v12 = vpack.c.bf16 %v3759_v11, %v3758_v5  ;;  %v4767_v5 = vld [vmem:[%s14194_s7 + $0x180] sm:$0xff]  ;;  %v4768_v11 = vld [vmem:[%s14194_s7 + $0x188] sm:$0xff] }
 0x1e5   : > { %10220 = vmatmul.mubr.msk.f32.vlgmr.msra.gmra.mrb[0].mxu1 %vm1368_vm5, %v11689_v13  ;;  %v12450_v13 = vld [vmem:[#allocation6] sm:$0xff] }
 0x1e6   : > { %10945 = vmatpush3.bf16.msra.mxu1 %v10942_v10  ;;  %10226 = vmatprep.mubr.msk.f32.mxu1 %vm1368_vm5, %v11690_v15  ;;  %v11715_v10 = vld [vmem:[#allocation3 + $0x34] ss:$8 sps:$4 sm:$0xff]   ;;  %3731 = vst.msk [vmem:[#allocation4] sm:$0x3f] %vm3730_vm7, %v12450_v13  ;;  %3733 = vst.msk [vmem:[#allocation4 + $0x28] sm:$0x3f] %vm3730_vm7, %v12450_v13 }
 0x1e7   : > { %10947 = vmatprep.subr.bf16.mxu1 %v10946_v14  ;;  %v3753_v15 = vld [vmem:[%s14192_s5 + $0x8] sm:$0xff]  ;;  %3736 = vst.msk [vmem:[#allocation4 + $0x8] sm:$0x1] %vm3735_vm8, %v12450_v13  ;;  %3737 = vst.msk [vmem:[#allocation4 + $0x10] sm:$0x1] %vm3735_vm8, %v12450_v13  ;;  %vm8175_vm7 = vcmask 257024  }
 0x1e8   : > { %3738 = vst.msk [vmem:[#allocation4 + $0x18] sm:$0x1] %vm3735_vm8, %v12450_v13  ;;  %3739 = vst.msk [vmem:[#allocation4 + $0x20] sm:$0x1] %vm3735_vm8, %v12450_v13 }
 0x1e9   : > { %3740 = vst.msk [vmem:[#allocation4 + $0xd] sm:$0x1] %vm3735_vm8, %v12450_v13  ;;  %3741 = vst.msk [vmem:[#allocation4 + $0x15] sm:$0x1] %vm3735_vm8, %v12450_v13 }
 0x1ea   : > { %3742 = vst.msk [vmem:[#allocation4 + $0x1d] sm:$0x1] %vm3735_vm8, %v12450_v13  ;;  %3743 = vst.msk [vmem:[#allocation4 + $0x25] sm:$0x1] %vm3735_vm8, %v12450_v13  ;;  %vm8180_vm8 = vcmask 253952  }
 0x1ed   : > { %10227 = vmatmul.mubr.msk.f32.vlgmr.msra.gmra.mrb[0].mxu1 %vm1368_vm5, %v11691_v18 }
 0x1ee   : > { %10949 = vmatpush3.bf16.msra.mxu1 %v10946_v14  ;;  %10233 = vmatprep.mubr.msk.f32.mxu1 %vm1368_vm5, %v11692_v20  ;;  %v3752_v14 = vld [vmem:[%s14192_s5] sm:$0xff] }
 0x1ef   : > { %10951 = vmatprep.subr.bf16.mxu1 %v10950_v19  ;;  %v10998_v16 = vpack.c.bf16 %v3753_v15, %v3752_v14  ;;  %v11030_v14 = vpack.c.bf16 %v4768_v11, %v4767_v5  ;;  %v4687_v15 = vld [vmem:[%s14194_s7 + $0x18] sm:$0xff]  ;;  %v4713_v11 = vld [vmem:[%s14194_s7 + $0xe8] sm:$0xff] }
 0x1f5   : > { %10234 = vmatmul.mubr.msk.f32.vlgmr.msra.gmra.mrb[0].mxu1 %vm1368_vm5, %v11693_v23 }
 0x1f6   : > { %10953 = vmatpush3.bf16.msra.mxu1 %v10950_v19  ;;  %10240 = vmatprep.mubr.msk.f32.mxu1 %vm1368_vm5, %v11694_v25 }
 0x1f7   : > { %10955 = vmatprep.subr.bf16.mxu1 %v10954_v24 }
 0x1fd   : > { %10241 = vmatmul.mubr.msk.f32.vlgmr.msra.gmra.mrb[0].mxu1 %vm1368_vm5, %v11695_v28 }
 0x1fe   : > { %10957 = vmatpush3.bf16.msra.mxu1 %v10954_v24  ;;  %10247 = vmatprep.mubr.msk.f32.mxu1 %vm1368_vm5, %v11696_v30  ;;  %v11002_v30 = vpack.c.bf16 %v3935_v27, %v3934_v26  ;;  %v4689_v26 = vld [vmem:[%s14194_s7 + $0x28] sm:$0xff] }
 0x1ff   : > { %10959 = vmatprep.subr.bf16.mxu1 %v10958_v29 }
 0x205   : > { %10248 = vmatmul.mubr.msk.f32.vlgmr.msra.gmra.mrb[0].mxu1 %vm1368_vm5, %v11697_v33  ;;  %v4028_v33 = vld [vmem:[%s14192_s5 + $0x38] sm:$0xff] }
 0x206   : > { %10961 = vmatpush3.bf16.msra.mxu1 %v10958_v29  ;;  %10254 = vmatprep.mubr.msk.f32.mxu1 %vm1368_vm5, %v11698_v35  ;;  %v11006_v35 = vpack.c.bf16 %v4028_v33, %v4027_v32  ;;  %v4707_v32 = vld [vmem:[%s14194_s7 + $0xb8] sm:$0xff] }
 0x207   : > { %10963 = vmatprep.subr.bf16.mxu1 %v10962_v34 }
 0x20d   : > { %10255 = vmatmul.mubr.msk.f32.vlgmr.msra.gmra.mrb[0].mxu1 %vm1368_vm5, %v11699_v38  ;;  %v4121_v38 = vld [vmem:[%s14192_s5 + $0x48] sm:$0xff] }
 0x20e   : > { %10965 = vmatpush3.bf16.msra.mxu1 %v10962_v34  ;;  %10261 = vmatprep.mubr.msk.f32.mxu1 %vm1368_vm5, %v11700_v40  ;;  %v11010_v40 = vpack.c.bf16 %v4121_v38, %v4120_v37  ;;  %v4771_v37 = vld [vmem:[%s14194_s7 + $0x1a0] sm:$0xff]  ;;  %v4772_v38 = vld [vmem:[%s14194_s7 + $0x1a8] sm:$0xff] }
 0x20f   : > { %10967 = vmatprep.subr.bf16.mxu1 %v10966_v39 }
 0x215   : > { %10262 = vmatmul.mubr.msk.f32.vlgmr.msra.gmra.mrb[0].mxu1 %vm1368_vm5, %v11701_v43  ;;  %v4214_v43 = vld [vmem:[%s14192_s5 + $0x58] sm:$0xff] }
 0x216   : > { %10969 = vmatpush3.bf16.msra.mxu1 %v10966_v39  ;;  %10268 = vmatprep.mubr.msk.f32.mxu1 %vm1368_vm5, %v11702_v45  ;;  %v11014_v45 = vpack.c.bf16 %v4214_v43, %v4213_v42  ;;  %v11038_v42 = vpack.c.bf16 %v4772_v38, %v4771_v37  ;;  %v4691_v43 = vld [vmem:[%s14194_s7 + $0x38] sm:$0xff] }
 0x217   : > { %10971 = vmatprep.subr.bf16.mxu1 %v10970_v44 }
 0x21d   : > { %10269 = vmatmul.mubr.msk.f32.vlgmr.msra.gmra.mrb[0].mxu1 %vm1368_vm5, %v11703_v48  ;;  %v4308_v48 = vld [vmem:[%s14192_s5 + $0x68] sm:$0xff] }
 0x21e   : > { %10973 = vmatpush3.bf16.msra.mxu1 %v10970_v44  ;;  %10275 = vmatprep.mubr.msk.f32.mxu1 %vm1368_vm5, %v11704_v50  ;;  %v11018_v50 = vpack.c.bf16 %v4308_v48, %v4307_v47 }
 0x21f   : > { %10975 = vmatprep.subr.bf16.mxu1 %v10974_v49 }
 0x225   : > { %10276 = vmatmul.mubr.msk.f32.vlgmr.msra.gmra.mrb[0].mxu1 %vm1368_vm5, %v11705_v53  ;;  %v4401_v53 = vld [vmem:[%s14192_s5 + $0x78] sm:$0xff] }
 0x226   : > { %10977 = vmatpush3.bf16.msra.mxu1 %v10974_v49  ;;  %10282 = vmatprep.mubr.msk.f32.mxu1 %vm1368_vm5, %v11706_v55  ;;  %v11022_v55 = vpack.c.bf16 %v4401_v53, %v4400_v52  ;;  %v4773_v52 = vld [vmem:[%s14194_s7 + $0x1b0] sm:$0xff]  ;;  %v4774_v53 = vld [vmem:[%s14194_s7 + $0x1b8] sm:$0xff] }
 0x227   : > { %10979 = vmatprep.subr.bf16.mxu1 %v10978_v54 }
 0x22d   : > { %10283 = vmatmul.mubr.msk.f32.vlgmr.msra.gmra.mrb[0].mxu1 %vm1368_vm5, %v11707_v58  ;;  %v4494_v58 = vld [vmem:[%s14192_s5 + $0x88] sm:$0xff] }
 0x22e   : > { %10981 = vmatpush3.bf16.msra.mxu1 %v10978_v54  ;;  %10289 = vmatprep.mubr.msk.f32.mxu1 %vm1368_vm5, %v11708_v60  ;;  %v11026_v60 = vpack.c.bf16 %v4494_v58, %v4493_v57  ;;  %v4757_v57 = vld [vmem:[%s14194_s7 + $0x130] sm:$0xff]  ;;  %v4758_v58 = vld [vmem:[%s14194_s7 + $0x138] sm:$0xff] }
 0x22f   : > { %10983 = vmatprep.subr.bf16.mxu1 %v10982_v59 }
 0x235   : > { %10290 = vmatmul.mubr.msk.f32.vlgmr.msra.gmra.mrb[0].mxu1 %vm1368_vm5, %v11709_v63 }
 0x236   : > { %10985 = vmatpush3.bf16.msra.mxu1 %v10982_v59  ;;  %10296 = vmatprep.mubr.msk.f32.mxu1 %vm1368_vm5, %v11710_v1  ;;  %v4700_v1 = vld [vmem:[%s14194_s7 + $0x80] sm:$0xff] }
 0x237   : > { %10987 = vmatprep.subr.bf16.mxu1 %v10986_v0 }
 0x23d   : > { %10297 = vmatmul.mubr.msk.f32.vlgmr.msra.gmra.mrb[0].mxu1 %vm1368_vm5, %v11711_v4  ;;  %v11062_v4 = vpack.c.bf16 %v4701_v2, %v4700_v1  ;;  %v4776_v2 = vld [vmem:[%s14194_s7 + $0x1c8] sm:$0xff] }
 0x23e   : > { %10989 = vmatpush3.bf16.msra.mxu1 %v10986_v0  ;;  %10303 = vmatprep.mubr.msk.f32.mxu1 %vm1368_vm5, %v11712_v7  ;;  %v4702_v7 = vld [vmem:[%s14194_s7 + $0x90] sm:$0xff] }
 0x23f   : > { %10991 = vmatprep.subr.bf16.mxu1 %v10990_v6  ;;  %11063 = vmatprep.subr.bf16.mxu0 %v11062_v4  ;;  %v4695_v4 = vld [vmem:[%s14194_s7 + $0x58] sm:$0xff] }
 0x245   : > { %10304 = vmatmul.mubr.msk.f32.vlgmr.msra.gmra.mrb[0].mxu1 %vm1368_vm5, %v11713_v8  ;;  %v4703_v8 = vld [vmem:[%s14194_s7 + $0x98] sm:$0xff] }
 0x246   : > { %10993 = vmatpush3.bf16.msra.mxu1 %v10990_v6  ;;  %10310 = vmatprep.mubr.msk.f32.mxu1 %vm1368_vm5, %v11714_v9  ;;  %v4685_v6 = vld [vmem:[%s14194_s7 + $0x8] sm:$0xff] }
 0x247   : > { %10995 = vmatprep.subr.bf16.mxu1 %v10994_v12  ;;  %v11064_v9 = vpack.c.bf16 %v4685_v6, %v4684_v3  ;;  %v4694_v3 = vld [vmem:[%s14194_s7 + $0x50] sm:$0xff] }
 0x249   : > { %11065 = vmatpush3.bf16.msra.mxu0 %v11064_v9  ;;  %v4760_v9 = vld [vmem:[%s14194_s7 + $0x148] sm:$0xff] }
 0x24d   : > { %10311 = vmatmul.mubr.msk.f32.vlgmr.msra.gmra.mrb[0].mxu1 %vm1368_vm5, %v11715_v10  ;;  %v11066_v10 = vpack.c.bf16 %v4703_v8, %v4702_v7  ;;  %v11084_v7 = vpack.c.bf16 %v4695_v4, %v4694_v3  ;;  %v4759_v8 = vld [vmem:[%s14194_s7 + $0x140] sm:$0xff] }
 0x24e   : > { %10997 = vmatpush3.bf16.msra.mxu1 %v10994_v12  ;;  %v4686_v12 = vld [vmem:[%s14194_s7 + $0x10] sm:$0xff]  ;;  %v11048_v5 = vpack.c.bf16 %v4760_v9, %v4759_v8 }
 0x24f   : > { %10999 = vmatprep.subr.bf16.mxu1 %v10998_v16  ;;  %11067 = vmatprep.subr.bf16.mxu0 %v11066_v10  ;;  %v4712_v10 = vld [vmem:[%s14194_s7 + $0xe0] sm:$0xff] }
 0x320   : > { %v10312_v18 = vpop.f32.mrb[0].mxu1 }
 0x321   : > { %v3721_v19 = vadd.f32 %v10312_v18, %v9165_v17  ;;  %v3702_v20 = vpop.f32.mrb[1].mxu1  ;;  %v11068_v18 = vpack.c.bf16 %v4687_v15, %v4686_v12  ;;  %v4777_v12 = vld [vmem:[%s14194_s7 + $0x1d0] sm:$0xff] }
 0x322   : > { %v3720_v21 = vadd.f32 %v9165_v17, %v3702_v20  ;;  %v4752_v17 = vld [vmem:[%s14194_s7 + $0x108] sm:$0xff]  ;;  %v4704_v20 = vld [vmem:[%s14194_s7 + $0xa0] sm:$0xff] }
 0x323   : > { %v3723_v22 = vmax.f32 %v3721_v19, 0.0  ;;  %11069 = vmatpush3.bf16.msra.mxu0 %v11068_v18 }
 0x324   : > { %v3722_v23 = vmax.f32 %v3720_v21, 0.0  ;;  %v4705_v21 = vld [vmem:[%s14194_s7 + $0xa8] sm:$0xff] }
 0x325   : > { %v3727_v24 = vcombine.high %v3723_v22, %v3723_v22  ;;  %3746 = vst.msk [vmem:[#allocation4 + $0x19] sm:$0xf] %vm1384_vm6, %v3723_v22  ;;  %v4769_v22 = vld [vmem:[%s14194_s7 + $0x190] sm:$0xff] }
 0x326   : > { %v3726_v25 = vcombine.high %v3722_v23, %v3722_v23  ;;  %3744 = vst.msk [vmem:[#allocation4 + $0x9] sm:$0xf] %vm1384_vm6, %v3722_v23  ;;  %v11070_v23 = vpack.c.bf16 %v4705_v21, %v4704_v20  ;;  %v4696_v21 = vld [vmem:[%s14194_s7 + $0x60] sm:$0xff] }
 0x327   : > { %3747 = vst.msk [vmem:[#allocation4 + $0x21] sm:$0xf] %vm1384_vm6, %v3727_v24  ;;  %v4770_v24 = vld [vmem:[%s14194_s7 + $0x198] sm:$0xff] }
 0x328   : > { %3745 = vst.msk [vmem:[#allocation4 + $0x11] sm:$0xf] %vm1384_vm6, %v3726_v25  ;;  %v4688_v25 = vld [vmem:[%s14194_s7 + $0x20] sm:$0xff]  ;;  %v11034_v27 = vpack.c.bf16 %v4770_v24, %v4769_v22  ;;  %11071 = vmatprep.subr.bf16.mxu0 %v11070_v23  ;;  %v4697_v24 = vld [vmem:[%s14194_s7 + $0x68] sm:$0xff]  ;;  %vm5951_vm6 = vcmask 261120  }
 0x329   : > { %v11072_v33 = vpack.c.bf16 %v4689_v26, %v4688_v25  ;;  %v4761_v25 = vld [vmem:[%s14194_s7 + $0x150] sm:$0xff] }
 0x32b   : > { %11073 = vmatpush3.bf16.msra.mxu0 %v11072_v33 }
 0x32d   : > { %v11716_v28 = vld [vmem:[#allocation4 + $0x1] ss:$8 sps:$4 sm:$0xff]  }
 0x32e   : > { %10317 = vmatprep.mubr.msk.f32.mxu1 %vm1368_vm5, %v11716_v28  ;;  %v11718_v31 = vld [vmem:[#allocation4] ss:$8 sps:$4 sm:$0xff]  }
 0x32f   : > { %v11717_v29 = vld [vmem:[#allocation4 + $0x11] ss:$8 sps:$4 sm:$0xff]   ;;  %v11720_v36 = vld [vmem:[#allocation4 + $0x2] ss:$8 sps:$4 sm:$0xff]  }
 0x330   : > { %10318 = vmatmul.mubr.msk.f32.vlgmr.msra.gmra.mrb[2].mxu1 %vm1368_vm5, %v11717_v29  ;;  %v11719_v34 = vld [vmem:[#allocation4 + $0x10] ss:$8 sps:$4 sm:$0xff]   ;;  %v11729_v59 = vld [vmem:[#allocation4 + $0x20] ss:$8 sps:$4 sm:$0xff]  }
 0x331   : > { %11001 = vmatpush3.bf16.msra.mxu1 %v10998_v16  ;;  %10324 = vmatprep.mubr.msk.f32.mxu1 %vm1368_vm5, %v11718_v31  ;;  %v11721_v39 = vld [vmem:[#allocation4 + $0x12] ss:$8 sps:$4 sm:$0xff]   ;;  %v11731_v62 = vld [vmem:[#allocation4 + $0x21] ss:$8 sps:$4 sm:$0xff]  }
 0x332   : > { %11003 = vmatprep.subr.bf16.mxu1 %v11002_v30  ;;  %v11722_v41 = vld [vmem:[#allocation4 + $0x8] ss:$8 sps:$4 sm:$0xff]   ;;  %v11723_v44 = vld [vmem:[#allocation4 + $0x18] ss:$8 sps:$4 sm:$0xff]  }
 0x333   : > { %v11724_v46 = vld [vmem:[#allocation4 + $0x9] ss:$8 sps:$4 sm:$0xff]   ;;  %v11725_v49 = vld [vmem:[#allocation4 + $0x19] ss:$8 sps:$4 sm:$0xff]  }
 0x334   : > { %v11726_v51 = vld [vmem:[#allocation4 + $0xa] ss:$8 sps:$4 sm:$0xff]   ;;  %v11727_v54 = vld [vmem:[#allocation4 + $0x1a] ss:$8 sps:$4 sm:$0xff]  }
 0x335   : > { %v11728_v56 = vld [vmem:[#allocation4 + $0x10] ss:$8 sps:$4 sm:$0xff]   ;;  %v11733_v0 = vld [vmem:[#allocation4 + $0x22] ss:$8 sps:$4 sm:$0xff]  }
 0x336   : > { %v11730_v61 = vld [vmem:[#allocation4 + $0x11] ss:$8 sps:$4 sm:$0xff]   ;;  %v4753_v28 = vld [vmem:[%s14194_s7 + $0x110] sm:$0xff]  ;;  %v4754_v29 = vld [vmem:[%s14194_s7 + $0x118] sm:$0xff] }
 0x337   : > { %v11732_v63 = vld [vmem:[#allocation4 + $0x12] ss:$8 sps:$4 sm:$0xff]   ;;  %v11036_v31 = vpack.c.bf16 %v4754_v29, %v4753_v28  ;;  %v11088_v28 = vpack.c.bf16 %v4697_v24, %v4696_v21  ;;  %v4762_v29 = vld [vmem:[%s14194_s7 + $0x158] sm:$0xff] }
 0x338   : > { %10325 = vmatmul.mubr.msk.f32.vlgmr.msra.gmra.mrb[2].mxu1 %vm1368_vm5, %v11719_v34  ;;  %v4751_v16 = vld [vmem:[%s14194_s7 + $0x100] sm:$0xff]  ;;  %v11052_v33 = vpack.c.bf16 %v4762_v29, %v4761_v25  ;;  %v5115_v25 = vld [vmem:[%s14194_s7 + $0x390] sm:$0xff] }
 0x339   : > { %11005 = vmatpush3.bf16.msra.mxu1 %v11002_v30  ;;  %10331 = vmatprep.mubr.msk.f32.mxu1 %vm1368_vm5, %v11720_v36  ;;  %v11032_v19 = vpack.c.bf16 %v4752_v17, %v4751_v16  ;;  %v4706_v30 = vld [vmem:[%s14194_s7 + $0xb0] sm:$0xff]  ;;  %v11086_v17 = vpack.c.bf16 %v4713_v11, %v4712_v10 }
 0x33a   : > { %11007 = vmatprep.subr.bf16.mxu1 %v11006_v35  ;;  %v11074_v34 = vpack.c.bf16 %v4707_v32, %v4706_v30  ;;  %v4714_v30 = vld [vmem:[%s14194_s7 + $0xf0] sm:$0xff] }
 0x33b   : > { %v9185_v10 = vld.sshfl [vmem:[#allocation6] sm:$0xf pattern:$0x76325410] }
 0x33c   : > { %11075 = vmatprep.subr.bf16.mxu0 %v11074_v34  ;;  %v4715_v34 = vld [vmem:[%s14194_s7 + $0xf8] sm:$0xff] }
 0x33d   : > { %v11090_v38 = vpack.c.bf16 %v4715_v34, %v4714_v30 }
 0x340   : > { %10332 = vmatmul.mubr.msk.f32.vlgmr.msra.gmra.mrb[2].mxu1 %vm1368_vm5, %v11721_v39  ;;  %v4690_v39 = vld [vmem:[%s14194_s7 + $0x30] sm:$0xff] }
 0x341   : > { %11009 = vmatpush3.bf16.msra.mxu1 %v11006_v35  ;;  %10338 = vmatprep.mubr.msk.f32.mxu1 %vm1368_vm5, %v11722_v41  ;;  %v9184_v35 = vld [vmem:[%s14193_s6] ss:$0 sm:$0xff]  ;;  %v11076_v47 = vpack.c.bf16 %v4691_v43, %v4690_v39  ;;  %v4780_v39 = vld [vmem:[%s14194_s7 + $0x1e8] sm:$0xff] }
 0x342   : > { %11011 = vmatprep.subr.bf16.mxu1 %v11010_v40 }
 0x343   : > { %11077 = vmatpush3.bf16.msra.mxu0 %v11076_v47 }
 0x348   : > { %10339 = vmatmul.mubr.msk.f32.vlgmr.msra.gmra.mrb[2].mxu1 %vm1368_vm5, %v11723_v44  ;;  %v4755_v44 = vld [vmem:[%s14194_s7 + $0x120] sm:$0xff] }
 0x349   : > { %11013 = vmatpush3.bf16.msra.mxu1 %v11010_v40  ;;  %10345 = vmatprep.mubr.msk.f32.mxu1 %vm1368_vm5, %v11724_v46 }
 0x34a   : > { %11015 = vmatprep.subr.bf16.mxu1 %v11014_v45 }
 0x350   : > { %10346 = vmatmul.mubr.msk.f32.vlgmr.msra.gmra.mrb[2].mxu1 %vm1368_vm5, %v11725_v49  ;;  %v4708_v49 = vld [vmem:[%s14194_s7 + $0xc0] sm:$0xff] }
 0x351   : > { %11017 = vmatpush3.bf16.msra.mxu1 %v11014_v45  ;;  %10352 = vmatprep.mubr.msk.f32.mxu1 %vm1368_vm5, %v11726_v51  ;;  %v4756_v45 = vld [vmem:[%s14194_s7 + $0x128] sm:$0xff] }
 0x352   : > { %11019 = vmatprep.subr.bf16.mxu1 %v11018_v50  ;;  %v11040_v48 = vpack.c.bf16 %v4756_v45, %v4755_v44  ;;  %v4699_v44 = vld [vmem:[%s14194_s7 + $0x78] sm:$0xff]  ;;  %v4763_v45 = vld [vmem:[%s14194_s7 + $0x160] sm:$0xff] }
 0x358   : > { %10353 = vmatmul.mubr.msk.f32.vlgmr.msra.gmra.mrb[2].mxu1 %vm1368_vm5, %v11727_v54  ;;  %v4692_v54 = vld [vmem:[%s14194_s7 + $0x40] sm:$0xff] }
 0x359   : > { %11021 = vmatpush3.bf16.msra.mxu1 %v11018_v50  ;;  %10359 = vmatprep.mubr.msk.f32.mxu1 %vm1368_vm5, %v11728_v56  ;;  %v4709_v50 = vld [vmem:[%s14194_s7 + $0xc8] sm:$0xff] }
 0x35a   : > { %11023 = vmatprep.subr.bf16.mxu1 %v11022_v55  ;;  %v11078_v51 = vpack.c.bf16 %v4709_v50, %v4708_v49  ;;  %v4693_v56 = vld [vmem:[%s14194_s7 + $0x48] sm:$0xff]  ;;  %v5113_v50 = vld [vmem:[%s14194_s7 + $0x380] sm:$0xff] }
 0x35c   : > { %11079 = vmatprep.subr.bf16.mxu0 %v11078_v51  ;;  %v5114_v51 = vld [vmem:[%s14194_s7 + $0x388] sm:$0xff] }
 0x360   : > { %10360 = vmatmul.mubr.msk.f32.vlgmr.msra.gmra.mrb[2].mxu1 %vm1368_vm5, %v11729_v59  ;;  %v4597_v59 = vlaneseq }
 0x361   : > { %11025 = vmatpush3.bf16.msra.mxu1 %v11022_v55  ;;  %10366 = vmatprep.mubr.msk.f32.mxu1 %vm1368_vm5, %v11730_v61  ;;  %v11042_v55 = vpack.c.bf16 %v4774_v53, %v4773_v52  ;;  %v11044_v61 = vpack.c.bf16 %v4758_v58, %v4757_v57  ;;  %v4781_v52 = vld [vmem:[%s14194_s7 + $0x1f0] sm:$0xff]  ;;  %v11126_v53 = vpack.c.bf16 %v5114_v51, %v5113_v50  ;;  %v4766_v57 = vld [vmem:[%s14194_s7 + $0x178] sm:$0xff]  ;;  %v5102_v50 = vld [vmem:[%s14194_s7 + $0x328] sm:$0xff] }
 0x362   : > { %11027 = vmatprep.subr.bf16.mxu1 %v11026_v60  ;;  %vm4599_vm9 = vcmp.lt.s32.totalorder %v4597_v59, 256  ;;  %v4788_v8 = vshrl.u32 %v4597_v59, 7  ;;  %v5388_v59 = vld [vmem:[%s14194_s7 + $0x578] sm:$0xff] }
 0x363   : > { %4601 = vst.msk [vmem:[#allocation6 + $0x8] ss:$4 sm:$0x3] %vm4599_vm9, %v12450_v13  ;;  %4603 = vst.msk [vmem:[#allocation6 + $0x10] ss:$4 sm:$0x3] %vm4599_vm9, %v12450_v13 }
 0x364   : > { %4605 = vst.msk [vmem:[#allocation6 + $0xb] ss:$4 sm:$0x3] %vm4599_vm9, %v12450_v13  ;;  %4607 = vst.msk [vmem:[#allocation6 + $0x13] ss:$4 sm:$0x3] %vm4599_vm9, %v12450_v13 }
 0x365   : > { %vm9007_vm9 = vcmask 517120  }
 0x368   : > { %10367 = vmatmul.mubr.msk.f32.vlgmr.msra.gmra.mrb[2].mxu1 %vm1368_vm5, %v11731_v62  ;;  %v4710_v62 = vld [vmem:[%s14194_s7 + $0xd0] sm:$0xff] }
 0x369   : > { %11029 = vmatpush3.bf16.msra.mxu1 %v11026_v60  ;;  %10373 = vmatprep.mubr.msk.f32.mxu1 %vm1368_vm5, %v11732_v63  ;;  %v11080_v60 = vpack.c.bf16 %v4693_v56, %v4692_v54  ;;  %v4711_v63 = vld [vmem:[%s14194_s7 + $0xd8] sm:$0xff]  ;;  %v4765_v56 = vld [vmem:[%s14194_s7 + $0x170] sm:$0xff] }
 0x36a   : > { %11031 = vmatprep.subr.bf16.mxu1 %v11030_v14  ;;  %v11082_v1 = vpack.c.bf16 %v4711_v63, %v4710_v62  ;;  %v4778_v14 = vld [vmem:[%s14194_s7 + $0x1d8] sm:$0xff]  ;;  %v11060_v58 = vpack.c.bf16 %v4766_v57, %v4765_v56  ;;  %v4967_v56 = vld [vmem:[%s14194_s7 + $0x210] sm:$0xff] }
 0x36b   : > { %11081 = vmatpush3.bf16.msra.mxu0 %v11080_v60  ;;  %v11050_v13 = vpack.c.bf16 %v4778_v14, %v4777_v12  ;;  %v4782_v54 = vld [vmem:[%s14194_s7 + $0x1f8] sm:$0xff]  ;;  %v4981_v60 = vld [vmem:[%s14194_s7 + $0x280] sm:$0xff] }
 0x36c   : > { %11083 = vmatprep.subr.bf16.mxu0 %v11082_v1  ;;  %v4968_v57 = vld [vmem:[%s14194_s7 + $0x218] sm:$0xff] }
 0x36f   : > { %11085 = vmatpush3.bf16.msra.mxu0 %v11084_v7 }
 0x370   : > { %10374 = vmatmul.mubr.msk.f32.vlgmr.msra.gmra.mrb[2].mxu1 %vm1368_vm5, %v11733_v0  ;;  %v4775_v0 = vld [vmem:[%s14194_s7 + $0x1c0] sm:$0xff]  ;;  %11087 = vmatprep.subr.bf16.mxu0 %v11086_v17  ;;  %vm5922_vm5 = vcmask 254976  }
 0x371   : > { %11033 = vmatpush3.bf16.msra.mxu1 %v11032_v19  ;;  %v11046_v6 = vpack.c.bf16 %v4776_v2, %v4775_v0  ;;  %v11846_v2 = vmov 1983009808  }
 0x372   : > { %11035 = vmatprep.subr.bf16.mxu1 %v11034_v27  ;;  %v4785_v3 = vunpack.c.l.s4 %v11846_v2  ;;  %v11100_v2 = vpack.c.bf16 %v4968_v57, %v4967_v56  ;;  %v5111_v57 = vld [vmem:[%s14194_s7 + $0x370] sm:$0xff] }
 0x373   : > { %11089 = vmatpush3.bf16.msra.mxu0 %v11088_v28 }
 0x374   : > { %11091 = vmatprep.subr.bf16.mxu0 %v11090_v38  ;;  %v4786_v7 = vunpack.c.0.s8 %v4785_v3  ;;  %v5121_v3 = vld [vmem:[%s14194_s7 + $0x3c0] sm:$0xff] }
 0x375   : > { %11037 = vmatpush3.bf16.msra.mxu1 %v11036_v31 }
 0x376   : > { %11039 = vmatprep.subr.bf16.mxu1 %v11038_v42 }
 0x379   : > { %11041 = vmatpush3.bf16.msra.mxu1 %v11040_v48  ;;  %v4764_v48 = vld [vmem:[%s14194_s7 + $0x168] sm:$0xff] }
 0x37a   : > { %11043 = vmatprep.subr.bf16.mxu1 %v11042_v55  ;;  %v11056_v49 = vpack.c.bf16 %v4764_v48, %v4763_v45  ;;  %v11058_v55 = vpack.c.bf16 %v4782_v54, %v4781_v52  ;;  %v5120_v54 = vld [vmem:[%s14194_s7 + $0x3b8] sm:$0xff] }
 0x37d   : > { %11045 = vmatpush3.bf16.msra.mxu1 %v11044_v61  ;;  %v4982_v61 = vld [vmem:[%s14194_s7 + $0x288] sm:$0xff] }
 0x37e   : > { %11047 = vmatprep.subr.bf16.mxu1 %v11046_v6  ;;  %v11094_v62 = vpack.c.bf16 %v4982_v61, %v4981_v60  ;;  %v9187_v6 = vld.sshfl [vmem:[#allocation6] sm:$0x5a pattern:$0x76325410]  ;;  %v4985_v61 = vld [vmem:[%s14194_s7 + $0x2a0] sm:$0xff] }
 0x37f   : > { %v4727_v9 = vcombine.high %v9187_v6, %v9187_v6  ;;  %v9189_v14 = vrot.slane %v9187_v6, 9 }
 0x381   : > { %11049 = vmatpush3.bf16.msra.mxu1 %v11048_v5  ;;  %v12758_v5 = vsub.s32 %v4786_v7, %v4788_v8  ;;  %v4969_v7 = vld [vmem:[%s14194_s7 + $0x220] sm:$0xff]  ;;  %v4970_v8 = vld [vmem:[%s14194_s7 + $0x228] sm:$0xff] }
 0x382   : > { %11051 = vmatprep.subr.bf16.mxu1 %v11050_v13 }
 0x385   : > { %11053 = vmatpush3.bf16.msra.mxu1 %v11052_v33 }
 0x443   : > { %v10375_v36 = vpop.f32.mrb[2].mxu1 }
 0x444   : > { %v4590_v40 = vadd.f32 %v10375_v36, %v9184_v35  ;;  %v4571_v41 = vpop.f32.mrb[3].mxu1 }
 0x445   : > { %v4589_v46 = vadd.f32 %v9184_v35, %v4571_v41  ;;  %v4779_v35 = vld [vmem:[%s14194_s7 + $0x1e0] sm:$0xff] }
 0x446   : > { %4592 = vst.msk [vmem:[#allocation5 + $0x8] sm:$0xff] %vm492_vm3, %v4590_v40  ;;  %v4698_v40 = vld [vmem:[%s14194_s7 + $0x70] sm:$0xff]  ;;  %v11054_v43 = vpack.c.bf16 %v4780_v39, %v4779_v35  ;;  %v5117_v39 = vld [vmem:[%s14194_s7 + $0x3a0] sm:$0xff] }
 0x447   : > { %4591 = vst.msk [vmem:[#allocation5] sm:$0xff] %vm492_vm3, %v4589_v46  ;;  %v11092_v47 = vpack.c.bf16 %v4699_v44, %v4698_v40  ;;  %v5099_v35 = vld [vmem:[%s14194_s7 + $0x310] sm:$0xff]  ;;  %v5118_v40 = vld [vmem:[%s14194_s7 + $0x3a8] sm:$0xff]  ;;  %vm5915_vm3 = vcmask 259072  }
 0x448   : > { %11055 = vmatprep.subr.bf16.mxu1 %v11054_v43  ;;  %v11134_v48 = vpack.c.bf16 %v5118_v40, %v5117_v39  ;;  %v4991_v39 = vld [vmem:[%s14194_s7 + $0x2d0] sm:$0xff]  ;;  %v4992_v40 = vld [vmem:[%s14194_s7 + $0x2d8] sm:$0xff] }
 0x449   : > { %11093 = vmatpush3.bf16.msra.mxu0 %v11092_v47  ;;  %11057 = vmatpush3.bf16.msra.mxu1 %v11056_v49  ;;  %v4984_v47 = vld [vmem:[%s14194_s7 + $0x298] sm:$0xff]  ;;  %v5101_v49 = vld [vmem:[%s14194_s7 + $0x320] sm:$0xff] }
 0x44a   : > { %11127 = vmatprep.subr.bf16.mxu0 %v11126_v53  ;;  %11059 = vmatprep.subr.bf16.mxu1 %v11058_v55  ;;  %v5119_v53 = vld [vmem:[%s14194_s7 + $0x3b0] sm:$0xff]  ;;  %v11136_v60 = vpack.c.bf16 %v5102_v50, %v5101_v49  ;;  %v11114_v49 = vpack.c.bf16 %v4992_v40, %v4991_v39  ;;  %v5377_v40 = vld [vmem:[%s14194_s7 + $0x520] sm:$0xff] }
 0x44b   : > { %v4975_v50 = vld [vmem:[%s14194_s7 + $0x250] sm:$0xff] }
 0x44d   : > { %v4645_v15 = vld [vmem:[#allocation5 + $0x9] ss:$2 sm:$0x3]  ;;  %v4659_v16 = vld [vmem:[#allocation5 + $0xd] ss:$2 sm:$0x3]  ;;  %11061 = vmatpush3.bf16.msra.mxu1 %v11060_v58 }
 0x44e   : > { %v4647_v18 = vrot.slane %v4645_v15, 7  ;;  %v4615_v19 = vld [vmem:[#allocation5 + $0x1] ss:$2 sm:$0x3]  ;;  %v4661_v20 = vrot.slane %v4659_v16, 7  ;;  %11095 = vmatprep.subr.bf16.mxu1 %v11094_v62  ;;  %v4745_v15 = vrot.slane %v4727_v9, 7 }
 0x44f   : > { %v4617_v22 = vrot.slane %v4615_v19, 7  ;;  %v4630_v23 = vld [vmem:[#allocation5 + $0x5] ss:$2 sm:$0x3]  ;;  %v4986_v62 = vld [vmem:[%s14194_s7 + $0x2a8] sm:$0xff] }
 0x450   : > { %4648 = vrot.lane.b32.xlu1 %v4647_v18, %s11845_s20  ;;  %v4632_v26 = vrot.slane %v4630_v23, 7  ;;  %v4638_v27 = vld [vmem:[#allocation5 + $0x8] ss:$2 sm:$0x3]  ;;  %v5097_v19 = vld [vmem:[%s14194_s7 + $0x300] sm:$0xff]  ;;  %v11102_v6 = vpack.c.bf16 %v4986_v62, %v4985_v61 }
 0x451   : > { %4618 = vrot.lane.b32.xlu0 %v4617_v22, %s11845_s20  ;;  %v4640_v31 = vrot.slane %v4638_v27, 7  ;;  %v4608_v32 = vld [vmem:[#allocation5] ss:$2 sm:$0x3]  ;;  %v4746_v27 = vsel %vm12763_vm2, %v9189_v14, %v4745_v15 }
 0x452   : > { %v4610_v36 = vrot.slane %v4608_v32, 7  ;;  %v4653_v37 = vld [vmem:[#allocation5 + $0xc] ss:$2 sm:$0x3]  ;;  %v5105_v15 = vld [vmem:[%s14194_s7 + $0x340] sm:$0xff] }
 0x453   : > { %4643 = vst.msk [vmem:[#allocation6 + $0x10] sm:$0x6] %vm4612_vm10, %v4640_v31  ;;  %v4655_v41 = vrot.slane %v4653_v37, 7  ;;  %v4624_v42 = vld [vmem:[#allocation5 + $0x4] ss:$2 sm:$0x3] }
 0x454   : > { %4662 = vrot.lane.b32.xlu1 %v4661_v20, %s11845_s20  ;;  %4613 = vst.msk [vmem:[#allocation6 + $0x8] sm:$0x6] %vm4612_vm10, %v4610_v36  ;;  %v4626_v46 = vrot.slane %v4624_v42, 7  ;;  %v5098_v20 = vld [vmem:[%s14194_s7 + $0x308] sm:$0xff]  ;;  %v5100_v36 = vld [vmem:[%s14194_s7 + $0x318] sm:$0xff]  ;;  %v5389_v62 = vld [vmem:[%s14194_s7 + $0x580] sm:$0xff] }
 0x455   : > { %4633 = vrot.lane.b32.xlu0 %v4632_v26, %s11845_s20  ;;  %4657 = vst.msk [vmem:[#allocation6 + $0x14] sm:$0x6] %vm4612_vm10, %v4655_v41  ;;  %v9191_v16 = vld.sshfl [vmem:[#allocation6] sm:$0xf0 pattern:$0x76325410]  ;;  %v11128_v31 = vpack.c.bf16 %v5098_v20, %v5097_v19  ;;  %v11132_v44 = vpack.c.bf16 %v5100_v36, %v5099_v35 }
 0x456   : > { %4628 = vst.msk [vmem:[#allocation6 + $0xc] sm:$0x6] %vm4612_vm10, %v4626_v46  ;;  %v5116_v26 = vld [vmem:[%s14194_s7 + $0x398] sm:$0xff]  ;;  %v4965_v41 = vld [vmem:[%s14194_s7 + $0x200] sm:$0xff]  ;;  %v4966_v42 = vld [vmem:[%s14194_s7 + $0x208] sm:$0xff]  ;;  %s431_s20 = sand.u32 1, %s11834_s26  }
 0x457   : > { %v11130_v33 = vpack.c.bf16 %v5116_v26, %v5115_v25  ;;  %v4983_v46 = vld [vmem:[%s14194_s7 + $0x290] sm:$0xff]  ;;  %v11096_v52 = vpack.c.bf16 %v4966_v42, %v4965_v41  ;;  %v4989_v25 = vld [vmem:[%s14194_s7 + $0x2c0] sm:$0xff]  ;;  %v4990_v26 = vld [vmem:[%s14194_s7 + $0x2c8] sm:$0xff]  ;;  %s9093_s17 = sshll.u32 %s431_s20, 2  ;;  %s14146_s1 = scalar_lea.sflag [#allocation10], %s431_s20 }
 0x458   : > { %v11098_v55 = vpack.c.bf16 %v4984_v47, %v4983_v46  ;;  %v4971_v20 = vld [vmem:[%s14194_s7 + $0x230] sm:$0xff]  ;;  %v11110_v35 = vpack.c.bf16 %v4990_v26, %v4989_v25  ;;  %v4973_v36 = vld [vmem:[%s14194_s7 + $0x240] sm:$0xff]  ;;  %s433_s15 = scalar_lea.vmem [#allocation9], %s9093_s17  ;;  %s11849_s17 = smov [#allocation9]  }
 0x459   : > { %v5109_v42 = vld [vmem:[%s14194_s7 + $0x360] sm:$0xff]  ;;  %v5127_v47 = vld [vmem:[%s14194_s7 + $0x3f0] sm:$0xff]  ;;  %s9024_s16 = sshll.u32 %s433_s15, 4  ;;  %s11784_s22 = sshll.u32 %s11849_s17, 4  ;;  %s14144_s16 = int_to_ptr.vmem [resolvable:$true] %s9024_s16  ;;  %s11785_s22 = int_to_ptr.vmem [resolvable:$false] %s11784_s22 }
 0x45a   : > { %s11780_s29 = scalar_lea.vmem %s14144_s16, 64  ;;  %s11786_s23 = scalar_lea.vmem %s11785_s22, 128 }
 0x45b   : > { %p11781_p11 = scmp.ne.s32.totalorder %s14144_s16, %s11780_s29  ;;  %p11787_p0 = scmp.lt.s32.totalorder %s14144_s16, %s11785_s22 }
 0x45c   : > { %p11788_p1 = scmp.lt.s32.totalorder %s11786_s23, %s11780_s29 }
 0x45d   : > { %p11782_p12 = pnand %p11781_p11, %p11960_p5 }
 0x45e   : > { %p11789_p2 = por %p11788_p1, %p11787_p0 }
 0x45f   : > { %p11783_p13 = pneg %p11782_p12 }
 0x461   : > { %p11790_p3 = pnand %p11789_p2, %p11783_p13 }
 0x4c2   : > { %v4649_v63 = vpop.permute.xlu1 %4648 }
 0x4c3   : > { %4651 = vst.msk [vmem:[#allocation6 + $0x10] sm:$0x6] %vm4621_vm11, %v4649_v63  ;;  %v4619_v0 = vpop.permute.xlu0 %4618  ;;  %v11138_v63 = vpack.c.bf16 %v5120_v54, %v5119_v53  ;;  %v4993_v54 = vld [vmem:[%s14194_s7 + $0x2e0] sm:$0xff] }
 0x4c4   : > { %4622 = vst.msk [vmem:[#allocation6 + $0x8] sm:$0x6] %vm4621_vm11, %v4619_v0  ;;  %v5103_v0 = vld [vmem:[%s14194_s7 + $0x330] sm:$0xff] }
 0x4c6   : > { %v4663_v1 = vpop.permute.xlu1 %4662 }
 0x4c7   : > { %4665 = vst.msk [vmem:[#allocation6 + $0x14] sm:$0x6] %vm4621_vm11, %v4663_v1  ;;  %v4634_v4 = vpop.permute.xlu0 %4633  ;;  %v5104_v1 = vld [vmem:[%s14194_s7 + $0x338] sm:$0xff] }
 0x4c8   : > { %4636 = vst.msk [vmem:[#allocation6 + $0xc] sm:$0x6] %vm4621_vm11, %v4634_v4  ;;  %v5122_v4 = vld [vmem:[%s14194_s7 + $0x3c8] sm:$0xff]  ;;  %v11140_v9 = vpack.c.bf16 %v5104_v1, %v5103_v0 }
 0x4c9   : > { %v11142_v14 = vpack.c.bf16 %v5122_v4, %v5121_v3  ;;  %v4978_v3 = vld [vmem:[%s14194_s7 + $0x268] sm:$0xff] }
 0x4ce   : > { %v12760_v11 = vld.sshfl [vmem:[#allocation6 + $0x10] sm:$0xf pattern:$0x76325410] }
 0x4cf   : > { %v9186_v12 = vld.sshfl [vmem:[#allocation6 + $0x8] sm:$0xf pattern:$0x76325410] }
 0x4d0   : > { %v4864_v17 = vcombine.low %v9185_v10, %v9186_v12  ;;  %v5129_v13 = vcombine.low %v9186_v12, %v12760_v11  ;;  %v9188_v18 = vld.sshfl [vmem:[#allocation6 + $0x8] sm:$0x5a pattern:$0x76325410]  ;;  %v4987_v10 = vld [vmem:[%s14194_s7 + $0x2b0] sm:$0xff] }
 0x4d1   : > { %v4735_v21 = vcombine.high %v9188_v18, %v9188_v18  ;;  %v12773_v22 = vld.sshfl [vmem:[#allocation6 + $0x8] sm:$0xf0 pattern:$0x76325410]  ;;  %v9190_v28 = vrot.slane %v9188_v18, 9 }
 0x4d2   : > { %v4871_v23 = vrot.slane %v4864_v17, %v12758_v5  ;;  %v12777_v24 = vrot.slane %v5129_v13, %v12758_v5  ;;  %v9193_v32 = vcombine.high %v9191_v16, %v12773_v22  ;;  %v4988_v12 = vld [vmem:[%s14194_s7 + $0x2b8] sm:$0xff]  ;;  %v5106_v16 = vld [vmem:[%s14194_s7 + $0x348] sm:$0xff]  ;;  %v11104_v17 = vpack.c.bf16 %v4970_v8, %v4969_v7  ;;  %v5123_v13 = vld [vmem:[%s14194_s7 + $0x3d0] sm:$0xff] }
 0x4d3   : > { %v4749_v29 = vrot.slane %v4735_v21, 7  ;;  %v5124_v18 = vld [vmem:[%s14194_s7 + $0x3d8] sm:$0xff]  ;;  %v11106_v19 = vpack.c.bf16 %v4988_v12, %v4987_v10  ;;  %v4995_v7 = vld [vmem:[%s14194_s7 + $0x2f0] sm:$0xff]  ;;  %v5374_v10 = vld [vmem:[%s14194_s7 + $0x508] sm:$0xff] }
 0x4d4   : > { %v4872_v30 = vcombine.high %v4871_v23, %v4871_v23  ;;  %v5137_v37 = vcombine.high %v12777_v24, %v12777_v24  ;;  %v12815_v45 = vrot.slane %v9193_v32, %v12758_v5  ;;  %v4972_v21 = vld [vmem:[%s14194_s7 + $0x238] sm:$0xff]  ;;  %v5126_v32 = vld [vmem:[%s14194_s7 + $0x3e8] sm:$0xff] }
 0x4d5   : > { %v12790_v34 = vsel %vm12763_vm2, %v9190_v28, %v4749_v29  ;;  %v5107_v28 = vld [vmem:[%s14194_s7 + $0x350] sm:$0xff]  ;;  %v5108_v29 = vld [vmem:[%s14194_s7 + $0x358] sm:$0xff] }
 0x4d6   : > { %4939 = vmatprep.mubr.f32.mxu0 %v4872_v30  ;;  %v4783_v38 = vcombine.low %v4746_v27, %v12790_v34  ;;  %v5005_v58 = vcombine.high %v12815_v45, %v12815_v45  ;;  %v11146_v27 = vpack.c.bf16 %v5124_v18, %v5123_v13  ;;  %v11108_v30 = vpack.c.bf16 %v4972_v21, %v4971_v20  ;;  %v4979_v18 = vld [vmem:[%s14194_s7 + $0x270] sm:$0xff]  ;;  %v5255_v21 = vld [vmem:[%s14194_s7 + $0x480] sm:$0xff] }
 0x4d7   : > { %4940 = vmatmul.mubr.f32.vlgmr.msra.gmra.mrb[2].mxu0 %v4871_v23  ;;  %v11144_v23 = vpack.c.bf16 %v5106_v16, %v5105_v15  ;;  %v5391_v16 = vld [vmem:[%s14194_s7 + $0x590] sm:$0xff] }
 0x4d8   : > { %11129 = vmatpush3.bf16.msra.mxu0 %v11128_v31  ;;  %5204 = vmatprep.mubr.f32.mxu0 %v5137_v37  ;;  %v4790_v43 = vrot.slane %v4783_v38, %v12758_v5  ;;  %v5125_v31 = vld [vmem:[%s14194_s7 + $0x3e0] sm:$0xff]  ;;  %v4974_v37 = vld [vmem:[%s14194_s7 + $0x248] sm:$0xff]  ;;  %v11148_v38 = vpack.c.bf16 %v5108_v29, %v5107_v28  ;;  %v5376_v28 = vld [vmem:[%s14194_s7 + $0x518] sm:$0xff] }
 0x4d9   : > { %11131 = vmatprep.subr.bf16.mxu0 %v11130_v33  ;;  %v9197_v33 = vld.sshfl [vmem:[#allocation6 + $0x10] sm:$0x5a pattern:$0x76325410]  ;;  %v11150_v41 = vpack.c.bf16 %v5126_v32, %v5125_v31  ;;  %v11112_v46 = vpack.c.bf16 %v4974_v37, %v4973_v36 }
 0x4da   : > { %v4791_v51 = vcombine.high %v4790_v43, %v4790_v43  ;;  %v9199_v4 = vrot.slane %v9197_v33, 9  ;;  %v5393_v31 = vld [vmem:[%s14194_s7 + $0x5a0] sm:$0xff] }
 0x4dc   : > { %4858 = vmatprep.mubr.f32.mxu1 %v4791_v51  ;;  %11133 = vmatpush3.bf16.msra.mxu0 %v11132_v44  ;;  %v5230_v44 = vcombine.high %v9197_v33, %v9197_v33  ;;  %v4976_v51 = vld [vmem:[%s14194_s7 + $0x258] sm:$0xff]  ;;  %v5239_v33 = vld [vmem:[%s14194_s7 + $0x400] sm:$0xff] }
 0x4dd   : > { %4859 = vmatmul.mubr.f32.vlgmr.msra.gmra.mrb[4].mxu1 %v4790_v43  ;;  %11135 = vmatprep.subr.bf16.mxu0 %v11134_v48  ;;  %v5110_v43 = vld [vmem:[%s14194_s7 + $0x368] sm:$0xff]  ;;  %v5128_v48 = vld [vmem:[%s14194_s7 + $0x3f8] sm:$0xff]  ;;  %v11116_v61 = vpack.c.bf16 %v4976_v51, %v4975_v50  ;;  %v5259_v51 = vld [vmem:[%s14194_s7 + $0x4a0] sm:$0xff] }
 0x4de   : > { %11097 = vmatpush3.bf16.msra.mxu1 %v11096_v52  ;;  %5072 = vmatprep.mubr.f32.mxu1 %v5005_v58  ;;  %v12939_v52 = vld.sshfl [vmem:[#allocation6 + $0x10] sm:$0xf0 pattern:$0x76325410]  ;;  %v11152_v53 = vpack.c.bf16 %v5110_v43, %v5109_v42  ;;  %v11154_v56 = vpack.c.bf16 %v5128_v48, %v5127_v47  ;;  %v5112_v58 = vld [vmem:[%s14194_s7 + $0x378] sm:$0xff]  ;;  %v5395_v43 = vld [vmem:[%s14194_s7 + $0x5b0] sm:$0xff] }
 0x4df   : > { %11099 = vmatprep.subr.bf16.mxu1 %v11098_v55  ;;  %v4994_v55 = vld [vmem:[%s14194_s7 + $0x2e8] sm:$0xff]  ;;  %v9202_v0 = vcombine.high %v12773_v22, %v12939_v52  ;;  %v4996_v22 = vld [vmem:[%s14194_s7 + $0x2f8] sm:$0xff]  ;;  %v5241_v47 = vld [vmem:[%s14194_s7 + $0x410] sm:$0xff] }
 0x4e0   : > { %11137 = vmatpush3.bf16.msra.mxu0 %v11136_v60  ;;  %v5237_v60 = vrot.slane %v5230_v44, 7  ;;  %v11118_v1 = vpack.c.bf16 %v4994_v55, %v4993_v54  ;;  %v11122_v13 = vpack.c.bf16 %v4996_v22, %v4995_v7  ;;  %v5396_v44 = vld [vmem:[%s14194_s7 + $0x5b8] sm:$0xff]  ;;  %v5379_v55 = vld [vmem:[%s14194_s7 + $0x530] sm:$0xff] }
 0x4e1   : > { %11139 = vmatprep.subr.bf16.mxu0 %v11138_v63  ;;  %v5390_v63 = vld [vmem:[%s14194_s7 + $0x588] sm:$0xff]  ;;  %v12984_v15 = vrot.slane %v9202_v0, %v12758_v5  ;;  %v5242_v48 = vld [vmem:[%s14194_s7 + $0x418] sm:$0xff]  ;;  %v11202_v54 = vpack.c.bf16 %v5396_v44, %v5395_v43  ;;  %v5261_v0 = vld [vmem:[%s14194_s7 + $0x4b0] sm:$0xff] }
 0x4e2   : > { %11101 = vmatpush3.bf16.msra.mxu1 %v11100_v2  ;;  %v4977_v2 = vld [vmem:[%s14194_s7 + $0x260] sm:$0xff]  ;;  %v11190_v8 = vpack.c.bf16 %v5390_v63, %v5389_v62  ;;  %v12981_v12 = vsel %vm12763_vm2, %v9199_v4, %v5237_v60  ;;  %v5244_v62 = vld [vmem:[%s14194_s7 + $0x428] sm:$0xff]  ;;  %v5399_v22 = vld [vmem:[%s14194_s7 + $0x5d0] sm:$0xff] }
 0x4e3   : > { %11103 = vmatprep.subr.bf16.mxu1 %v11102_v6  ;;  %v11156_v6 = vpack.c.bf16 %v5112_v58, %v5111_v57  ;;  %v5271_v25 = vcombine.low %v12790_v34, %v12981_v12  ;;  %v5413_v29 = vcombine.high %v12984_v15, %v12984_v15  ;;  %v5394_v34 = vld [vmem:[%s14194_s7 + $0x5a8] sm:$0xff]  ;;  %v11164_v57 = vpack.c.bf16 %v5242_v48, %v5241_v47  ;;  %v5397_v58 = vld [vmem:[%s14194_s7 + $0x5c0] sm:$0xff]  ;;  %v5250_v43 = vld [vmem:[%s14194_s7 + $0x458] sm:$0xff] }
 0x4e4   : > { %11141 = vmatpush3.bf16.msra.mxu0 %v11140_v9  ;;  %v5373_v9 = vld [vmem:[%s14194_s7 + $0x500] sm:$0xff]  ;;  %v11198_v39 = vpack.c.bf16 %v5394_v34, %v5393_v31  ;;  %v5268_v48 = vld [vmem:[%s14194_s7 + $0x4e8] sm:$0xff] }
 0x4e5   : > { %11143 = vmatprep.subr.bf16.mxu0 %v11142_v14  ;;  %v11120_v14 = vpack.c.bf16 %v4978_v3, %v4977_v2  ;;  %v11192_v20 = vpack.c.bf16 %v5374_v10, %v5373_v9  ;;  %v13028_v37 = vrot.slane %v5271_v25, %v12758_v5  ;;  %v9206_v2 = vld.sshfl [vmem:[#allocation6 + $0x18] sm:$0x5a pattern:$0x76325410]  ;;  %v5381_v4 = vld [vmem:[%s14194_s7 + $0x540] sm:$0xff]  ;;  %v5245_v10 = vld [vmem:[%s14194_s7 + $0x430] sm:$0xff] }
 0x4e6   : > { %11105 = vmatpush3.bf16.msra.mxu1 %v11104_v17  ;;  %v5392_v17 = vld [vmem:[%s14194_s7 + $0x598] sm:$0xff]  ;;  %v5401_v25 = vld [vmem:[%s14194_s7 + $0x5e0] sm:$0xff] }
 0x4e7   : > { %11107 = vmatprep.subr.bf16.mxu1 %v11106_v19  ;;  %v4980_v19 = vld [vmem:[%s14194_s7 + $0x278] sm:$0xff]  ;;  %v11194_v26 = vpack.c.bf16 %v5392_v17, %v5391_v16  ;;  %v5638_v16 = vcombine.high %v9206_v2, %v9206_v2  ;;  %v5267_v47 = vld [vmem:[%s14194_s7 + $0x4e0] sm:$0xff] }
 0x4e8   : > { %11145 = vmatpush3.bf16.msra.mxu0 %v11144_v23  ;;  %v5256_v23 = vld [vmem:[%s14194_s7 + $0x488] sm:$0xff] }
 0x4e9   : > { %11147 = vmatprep.subr.bf16.mxu0 %v11146_v27  ;;  %v5375_v27 = vld [vmem:[%s14194_s7 + $0x510] sm:$0xff]  ;;  %v11158_v32 = vpack.c.bf16 %v5256_v23, %v5255_v21  ;;  %v5384_v21 = vld [vmem:[%s14194_s7 + $0x558] sm:$0xff]  ;;  %v5645_v31 = vrot.slane %v5638_v16, 7 }
 0x4ea   : > { %11109 = vmatpush3.bf16.msra.mxu1 %v11108_v30  ;;  %v11124_v30 = vpack.c.bf16 %v4980_v19, %v4979_v18  ;;  %v11196_v36 = vpack.c.bf16 %v5376_v28, %v5375_v27  ;;  %v5264_v18 = vld [vmem:[%s14194_s7 + $0x4c8] sm:$0xff]  ;;  %v5247_v28 = vld [vmem:[%s14194_s7 + $0x440] sm:$0xff] }
 0x4eb   : > { %11111 = vmatprep.subr.bf16.mxu1 %v11110_v35  ;;  %v5240_v35 = vld [vmem:[%s14194_s7 + $0x408] sm:$0xff] }
 0x4ec   : > { %11149 = vmatpush3.bf16.msra.mxu0 %v11148_v38  ;;  %v5258_v38 = vld [vmem:[%s14194_s7 + $0x498] sm:$0xff]  ;;  %v11160_v42 = vpack.c.bf16 %v5240_v35, %v5239_v33 }
 0x4ed   : > { %11151 = vmatprep.subr.bf16.mxu0 %v11150_v41  ;;  %v5378_v41 = vld [vmem:[%s14194_s7 + $0x528] sm:$0xff]  ;;  %v5266_v33 = vld [vmem:[%s14194_s7 + $0x4d8] sm:$0xff] }
 0x4ee   : > { %11113 = vmatpush3.bf16.msra.mxu1 %v11112_v46  ;;  %v11200_v50 = vpack.c.bf16 %v5378_v41, %v5377_v40  ;;  %v5404_v40 = vld [vmem:[%s14194_s7 + $0x5f8] sm:$0xff] }
 0x4ef   : > { %11115 = vmatprep.subr.bf16.mxu1 %v11114_v49  ;;  %v5279_v49 = vcombine.high %v13028_v37, %v13028_v37 }
 0x4f0   : > { %11153 = vmatpush3.bf16.msra.mxu0 %v11152_v53  ;;  %v5260_v53 = vld [vmem:[%s14194_s7 + $0x4a8] sm:$0xff] }
 0x4f1   : > { %11155 = vmatprep.subr.bf16.mxu0 %v11154_v56  ;;  %v5380_v56 = vld [vmem:[%s14194_s7 + $0x538] sm:$0xff]  ;;  %v11166_v60 = vpack.c.bf16 %v5260_v53, %v5259_v51  ;;  %v5663_v53 = vld [vmem:[%s14194_s7 + $0x780] sm:$0xff] }
 0x4f2   : > { %11117 = vmatpush3.bf16.msra.mxu1 %v11116_v61  ;;  %v5243_v61 = vld [vmem:[%s14194_s7 + $0x420] sm:$0xff]  ;;  %v11204_v63 = vpack.c.bf16 %v5380_v56, %v5379_v55  ;;  %v11182_v56 = vpack.c.bf16 %v5268_v48, %v5267_v47 }
 0x4f3   : > { %11119 = vmatprep.subr.bf16.mxu1 %v11118_v1  ;;  %v5262_v1 = vld [vmem:[%s14194_s7 + $0x4b8] sm:$0xff]  ;;  %v11168_v7 = vpack.c.bf16 %v5244_v62, %v5243_v61  ;;  %v5647_v62 = vld [vmem:[%s14194_s7 + $0x700] sm:$0xff] }
 0x4f4   : > { %11157 = vmatpush3.bf16.msra.mxu0 %v11156_v6  ;;  %v5382_v6 = vld [vmem:[%s14194_s7 + $0x548] sm:$0xff]  ;;  %v11170_v9 = vpack.c.bf16 %v5262_v1, %v5261_v0  ;;  %v5671_v47 = vld [vmem:[%s14194_s7 + $0x7c0] sm:$0xff] }
 0x4f5   : > { %11191 = vmatprep.subr.bf16.mxu0 %v11190_v8  ;;  %v5400_v8 = vld [vmem:[%s14194_s7 + $0x5d8] sm:$0xff]  ;;  %v11208_v17 = vpack.c.bf16 %v5382_v6, %v5381_v4  ;;  %v9204_v0 = vld.sshfl [vmem:[#allocation6 + $0x18] sm:$0xf pattern:$0x76325410] }
 0x4f6   : > { %11121 = vmatpush3.bf16.msra.mxu1 %v11120_v14  ;;  %v5246_v14 = vld [vmem:[%s14194_s7 + $0x438] sm:$0xff]  ;;  %v11210_v19 = vpack.c.bf16 %v5400_v8, %v5399_v22 }
 0x4f7   : > { %5205 = vmatmul.mubr.f32.vlgmr.msra.gmra.mrb[4].mxu0 %v12777_v24  ;;  %11123 = vmatprep.subr.bf16.mxu1 %v11122_v13  ;;  %v5257_v24 = vld [vmem:[%s14194_s7 + $0x490] sm:$0xff]  ;;  %v5263_v13 = vld [vmem:[%s14194_s7 + $0x4c0] sm:$0xff]  ;;  %v11172_v23 = vpack.c.bf16 %v5246_v14, %v5245_v10  ;;  %v5666_v4 = vld [vmem:[%s14194_s7 + $0x798] sm:$0xff]  ;;  %v5537_v14 = vcombine.low %v12760_v11, %v9204_v0 }
 0x4f8   : > { %11193 = vmatpush3.bf16.msra.mxu0 %v11192_v20  ;;  %5480 = vmatprep.mubr.f32.mxu0 %v5413_v29  ;;  %v11162_v46 = vpack.c.bf16 %v5258_v38, %v5257_v24  ;;  %v5383_v20 = vld [vmem:[%s14194_s7 + $0x550] sm:$0xff]  ;;  %v11174_v27 = vpack.c.bf16 %v5264_v18, %v5263_v13  ;;  %v5248_v29 = vld [vmem:[%s14194_s7 + $0x448] sm:$0xff]  ;;  %v5254_v22 = vld [vmem:[%s14194_s7 + $0x478] sm:$0xff] }
 0x4f9   : > { %11195 = vmatprep.subr.bf16.mxu0 %v11194_v26  ;;  %v5402_v26 = vld [vmem:[%s14194_s7 + $0x5e8] sm:$0xff]  ;;  %v11212_v34 = vpack.c.bf16 %v5384_v21, %v5383_v20  ;;  %v11176_v38 = vpack.c.bf16 %v5248_v29, %v5247_v28  ;;  %v5650_v13 = vld [vmem:[%s14194_s7 + $0x718] sm:$0xff]  ;;  %v5667_v20 = vld [vmem:[%s14194_s7 + $0x7a0] sm:$0xff] }
 0x4fa   : > { %11125 = vmatpush3.bf16.msra.mxu1 %v11124_v30  ;;  %v9208_v30 = vrot.slane %v9206_v2, 9  ;;  %v11214_v35 = vpack.c.bf16 %v5402_v26, %v5401_v25  ;;  %v5386_v24 = vld [vmem:[%s14194_s7 + $0x568] sm:$0xff]  ;;  %v5524_v28 = vld [vmem:[%s14194_s7 + $0x698] sm:$0xff] }
 0x4fb   : > { %11159 = vmatprep.subr.bf16.mxu1 %v11158_v32  ;;  %v5265_v32 = vld [vmem:[%s14194_s7 + $0x4d0] sm:$0xff]  ;;  %v5522_v10 = vld [vmem:[%s14194_s7 + $0x688] sm:$0xff] }
 0x4fc   : > { %11197 = vmatpush3.bf16.msra.mxu0 %v11196_v36  ;;  %v5385_v36 = vld [vmem:[%s14194_s7 + $0x560] sm:$0xff]  ;;  %v11178_v41 = vpack.c.bf16 %v5266_v33, %v5265_v32  ;;  %v5646_v44 = vsel %vm12763_vm2, %v9208_v30, %v5645_v31  ;;  %v5668_v11 = vld [vmem:[%s14194_s7 + $0x7a8] sm:$0xff]  ;;  %v5669_v32 = vld [vmem:[%s14194_s7 + $0x7b0] sm:$0xff] }
 0x4fd   : > { %5073 = vmatmul.mubr.f32.vlgmr.msra.gmra.mrb[6].mxu1 %v12815_v45  ;;  %11199 = vmatprep.subr.bf16.mxu0 %v11198_v39  ;;  %v5398_v45 = vld [vmem:[%s14194_s7 + $0x5c8] sm:$0xff]  ;;  %v5403_v39 = vld [vmem:[%s14194_s7 + $0x5f0] sm:$0xff]  ;;  %v5679_v55 = vcombine.low %v12981_v12, %v5646_v44  ;;  %v5270_v12 = vld [vmem:[%s14194_s7 + $0x4f8] sm:$0xff]  ;;  %v11262_v29 = vpack.c.bf16 %v5668_v11, %v5667_v20 }
 0x4fe   : > { %11161 = vmatpush3.bf16.msra.mxu1 %v11160_v42  ;;  %5346 = vmatprep.mubr.f32.mxu1 %v5279_v49  ;;  %v11206_v3 = vpack.c.bf16 %v5398_v45, %v5397_v58  ;;  %v5249_v42 = vld [vmem:[%s14194_s7 + $0x450] sm:$0xff]  ;;  %v11218_v49 = vpack.c.bf16 %v5404_v40, %v5403_v39  ;;  %v5252_v58 = vld [vmem:[%s14194_s7 + $0x468] sm:$0xff]  ;;  %v5651_v30 = vld [vmem:[%s14194_s7 + $0x720] sm:$0xff] }
 0x4ff   : > { %11163 = vmatprep.subr.bf16.mxu1 %v11162_v46  ;;  %v11216_v46 = vpack.c.bf16 %v5386_v24, %v5385_v36  ;;  %v11180_v51 = vpack.c.bf16 %v5250_v43, %v5249_v42  ;;  %v13193_v2 = vrot.slane %v5679_v55, %v12758_v5  ;;  %v5506_v25 = vld [vmem:[%s14194_s7 + $0x608] sm:$0xff]  ;;  %v5670_v33 = vld [vmem:[%s14194_s7 + $0x7b8] sm:$0xff]  ;;  %v5507_v36 = vld [vmem:[%s14194_s7 + $0x610] sm:$0xff] }
 0x500   : > { %11201 = vmatpush3.bf16.msra.mxu0 %v11200_v50  ;;  %v5387_v50 = vld [vmem:[%s14194_s7 + $0x570] sm:$0xff]  ;;  %v5652_v31 = vld [vmem:[%s14194_s7 + $0x728] sm:$0xff]  ;;  %v5508_v24 = vld [vmem:[%s14194_s7 + $0x618] sm:$0xff]  ;;  %v11266_v42 = vpack.c.bf16 %v5670_v33, %v5669_v32 }
 0x501   : > { %11203 = vmatprep.subr.bf16.mxu0 %v11202_v54  ;;  %v5664_v54 = vld [vmem:[%s14194_s7 + $0x788] sm:$0xff]  ;;  %v11220_v45 = vpack.c.bf16 %v5388_v59, %v5387_v50  ;;  %v5687_v18 = vcombine.high %v13193_v2, %v13193_v2  ;;  %v11264_v39 = vpack.c.bf16 %v5652_v31, %v5651_v30  ;;  %v5525_v40 = vld [vmem:[%s14194_s7 + $0x6a0] sm:$0xff]  ;;  %v5653_v43 = vld [vmem:[%s14194_s7 + $0x730] sm:$0xff] }
 0x502   : > { %11165 = vmatpush3.bf16.msra.mxu1 %v11164_v57  ;;  %v5251_v57 = vld [vmem:[%s14194_s7 + $0x460] sm:$0xff]  ;;  %v11254_v61 = vpack.c.bf16 %v5664_v54, %v5663_v53  ;;  %v5654_v44 = vld [vmem:[%s14194_s7 + $0x738] sm:$0xff]  ;;  %v5510_v50 = vld [vmem:[%s14194_s7 + $0x628] sm:$0xff] }
 0x503   : > { %11167 = vmatprep.subr.bf16.mxu1 %v11166_v60  ;;  %v5269_v60 = vld [vmem:[%s14194_s7 + $0x4f0] sm:$0xff]  ;;  %v11184_v1 = vpack.c.bf16 %v5252_v58, %v5251_v57  ;;  %v11268_v59 = vpack.c.bf16 %v5654_v44, %v5653_v43  ;;  %v5528_v53 = vld [vmem:[%s14194_s7 + $0x6b8] sm:$0xff]  ;;  %v5655_v55 = vld [vmem:[%s14194_s7 + $0x740] sm:$0xff] }
 0x504   : > { %11205 = vmatpush3.bf16.msra.mxu0 %v11204_v63  ;;  %v5648_v63 = vld [vmem:[%s14194_s7 + $0x708] sm:$0xff]  ;;  %v11186_v6 = vpack.c.bf16 %v5270_v12, %v5269_v60  ;;  %v5673_v58 = vld [vmem:[%s14194_s7 + $0x7d0] sm:$0xff]  ;;  %v5520_v44 = vld [vmem:[%s14194_s7 + $0x678] sm:$0xff] }
 0x505   : > { %11207 = vmatprep.subr.bf16.mxu0 %v11206_v3  ;;  %v5665_v3 = vld [vmem:[%s14194_s7 + $0x790] sm:$0xff]  ;;  %v11256_v8 = vpack.c.bf16 %v5648_v63, %v5647_v62  ;;  %v5529_v63 = vld [vmem:[%s14194_s7 + $0x6c0] sm:$0xff]  ;;  %v5530_v0 = vld [vmem:[%s14194_s7 + $0x6c8] sm:$0xff] }
 0x506   : > { %11169 = vmatpush3.bf16.msra.mxu1 %v11168_v7  ;;  %v5253_v7 = vld [vmem:[%s14194_s7 + $0x470] sm:$0xff]  ;;  %v11258_v16 = vpack.c.bf16 %v5666_v4, %v5665_v3  ;;  %v5658_v4 = vld [vmem:[%s14194_s7 + $0x758] sm:$0xff] }
 0x507   : > { %11171 = vmatprep.subr.bf16.mxu1 %v11170_v9  ;;  %v5521_v9 = vld [vmem:[%s14194_s7 + $0x680] sm:$0xff]  ;;  %v5511_v12 = vld [vmem:[%s14194_s7 + $0x630] sm:$0xff] }
 0x508   : > { %11209 = vmatpush3.bf16.msra.mxu0 %v11208_v17  ;;  %v5649_v17 = vld [vmem:[%s14194_s7 + $0x710] sm:$0xff]  ;;  %v11222_v21 = vpack.c.bf16 %v5522_v10, %v5521_v9  ;;  %v5513_v9 = vld [vmem:[%s14194_s7 + $0x640] sm:$0xff]  ;;  %v5514_v10 = vld [vmem:[%s14194_s7 + $0x648] sm:$0xff] }
 0x509   : > { %11211 = vmatprep.subr.bf16.mxu0 %v11210_v19  ;;  %v11188_v19 = vpack.c.bf16 %v5254_v22, %v5253_v7  ;;  %v11260_v26 = vpack.c.bf16 %v5650_v13, %v5649_v17  ;;  %v5657_v3 = vld [vmem:[%s14194_s7 + $0x750] sm:$0xff]  ;;  %v5675_v7 = vld [vmem:[%s14194_s7 + $0x7e0] sm:$0xff]  ;;  %v5676_v22 = vld [vmem:[%s14194_s7 + $0x7e8] sm:$0xff]  ;;  %v11240_v20 = vpack.c.bf16 %v5514_v10, %v5513_v9 }
 0x50a   : > { %11173 = vmatpush3.bf16.msra.mxu1 %v11172_v23  ;;  %v5505_v23 = vld [vmem:[%s14194_s7 + $0x600] sm:$0xff]  ;;  %v5532_v17 = vld [vmem:[%s14194_s7 + $0x6d8] sm:$0xff]  ;;  %v11278_v13 = vpack.c.bf16 %v5676_v22, %v5675_v7  ;;  %v5677_v11 = vld [vmem:[%s14194_s7 + $0x7f0] sm:$0xff] }
 0x50b   : > { %11175 = vmatprep.subr.bf16.mxu1 %v11174_v27  ;;  %v13236_v27 = vrot.slane %v5537_v14, %v12758_v5  ;;  %v11276_v14 = vpack.c.bf16 %v5658_v4, %v5657_v3  ;;  %v5661_v31 = vld [vmem:[%s14194_s7 + $0x770] sm:$0xff]  ;;  %v5788_v4 = vld [vmem:[%s14194_s7 + $0x838] sm:$0xff]  ;;  %v5806_v7 = vld [vmem:[%s14194_s7 + $0x8c8] sm:$0xff] }
 0x50c   : > { %11213 = vmatpush3.bf16.msra.mxu0 %v11212_v34  ;;  %v11224_v34 = vpack.c.bf16 %v5506_v25, %v5505_v23  ;;  %v5515_v25 = vld [vmem:[%s14194_s7 + $0x650] sm:$0xff]  ;;  %v5789_v9 = vld [vmem:[%s14194_s7 + $0x840] sm:$0xff]  ;;  %v5790_v10 = vld [vmem:[%s14194_s7 + $0x848] sm:$0xff] }
 0x50d   : > { %11215 = vmatprep.subr.bf16.mxu0 %v11214_v35  ;;  %v5519_v43 = vld [vmem:[%s14194_s7 + $0x670] sm:$0xff] }
 0x50e   : > { %11177 = vmatpush3.bf16.msra.mxu1 %v11176_v38  ;;  %v5545_v38 = vcombine.high %v13236_v27, %v13236_v27  ;;  %v5787_v3 = vld [vmem:[%s14194_s7 + $0x830] sm:$0xff] }
 0x50f   : > { %11179 = vmatprep.subr.bf16.mxu1 %v11178_v41  ;;  %v5526_v41 = vld [vmem:[%s14194_s7 + $0x6a8] sm:$0xff]  ;;  %v11300_v22 = vpack.c.bf16 %v5788_v4, %v5787_v3  ;;  %v6199_v3 = vld [vmem:[%s14196_s9 + $0x70] sm:$0xff]  ;;  %v6200_v4 = vld [vmem:[%s14196_s9 + $0x78] sm:$0xff] }
 0x510   : > { %11217 = vmatpush3.bf16.msra.mxu0 %v11216_v46  ;;  %v11228_v46 = vpack.c.bf16 %v5508_v24, %v5507_v36  ;;  %v11230_v48 = vpack.c.bf16 %v5526_v41, %v5525_v40  ;;  %v5518_v36 = vld [vmem:[%s14194_s7 + $0x668] sm:$0xff] }
 0x511   : > { %11219 = vmatprep.subr.bf16.mxu0 %v11218_v49  ;;  %v5509_v49 = vld [vmem:[%s14194_s7 + $0x620] sm:$0xff]  ;;  %v9210_v40 = vld.sshfl [vmem:[#allocation6 + $0x18] sm:$0xf0 pattern:$0x76325410] }
 0x512   : > { %11181 = vmatpush3.bf16.msra.mxu1 %v11180_v51  ;;  %v5527_v51 = vld [vmem:[%s14194_s7 + $0x6b0] sm:$0xff]  ;;  %v11232_v57 = vpack.c.bf16 %v5510_v50, %v5509_v49  ;;  %v5781_v50 = vld [vmem:[%s14194_s7 + $0x800] sm:$0xff] }
 0x513   : > { %11183 = vmatprep.subr.bf16.mxu1 %v11182_v56  ;;  %v5656_v56 = vld [vmem:[%s14194_s7 + $0x748] sm:$0xff]  ;;  %v11234_v60 = vpack.c.bf16 %v5528_v53, %v5527_v51 }
 0x514   : > { %11221 = vmatpush3.bf16.msra.mxu0 %v11220_v45  ;;  %v5674_v45 = vld [vmem:[%s14194_s7 + $0x7d8] sm:$0xff]  ;;  %v11272_v62 = vpack.c.bf16 %v5656_v56, %v5655_v55  ;;  %v5783_v55 = vld [vmem:[%s14194_s7 + $0x810] sm:$0xff] }
 0x515   : > { %11255 = vmatprep.subr.bf16.mxu0 %v11254_v61  ;;  %v5512_v61 = vld [vmem:[%s14194_s7 + $0x638] sm:$0xff] }
 0x516   : > { %11185 = vmatpush3.bf16.msra.mxu1 %v11184_v1  ;;  %v11274_v1 = vpack.c.bf16 %v5674_v45, %v5673_v58  ;;  %v5784_v56 = vld [vmem:[%s14194_s7 + $0x818] sm:$0xff]  ;;  %v5801_v58 = vld [vmem:[%s14194_s7 + $0x8a0] sm:$0xff]  ;;  %v5802_v45 = vld [vmem:[%s14194_s7 + $0x8a8] sm:$0xff] }
 0x517   : > { %5481 = vmatmul.mubr.f32.vlgmr.msra.gmra.mrb[6].mxu0 %v12984_v15  ;;  %11187 = vmatprep.subr.bf16.mxu1 %v11186_v6  ;;  %v5523_v15 = vld [vmem:[%s14194_s7 + $0x690] sm:$0xff]  ;;  %v11236_v6 = vpack.c.bf16 %v5512_v61, %v5511_v12  ;;  %v11294_v12 = vpack.c.bf16 %v5802_v45, %v5801_v58  ;;  %v5785_v61 = vld [vmem:[%s14194_s7 + $0x820] sm:$0xff] }
 0x518   : > { %11257 = vmatpush3.bf16.msra.mxu0 %v11256_v8  ;;  %5754 = vmatprep.mubr.f32.mxu0 %v5687_v18  ;;  %v11226_v35 = vpack.c.bf16 %v5524_v28, %v5523_v15  ;;  %v11238_v8 = vpack.c.bf16 %v5530_v0, %v5529_v63  ;;  %v5659_v18 = vld [vmem:[%s14194_s7 + $0x760] sm:$0xff]  ;;  %v5803_v63 = vld [vmem:[%s14194_s7 + $0x8b0] sm:$0xff] }
 0x519   : > { %11259 = vmatprep.subr.bf16.mxu0 %v11258_v16  ;;  %v5531_v16 = vld [vmem:[%s14194_s7 + $0x6d0] sm:$0xff]  ;;  %v5533_v28 = vld [vmem:[%s14194_s7 + $0x6e0] sm:$0xff] }
 0x51a   : > { %11189 = vmatpush3.bf16.msra.mxu1 %v11188_v19  ;;  %v5660_v19 = vld [vmem:[%s14194_s7 + $0x768] sm:$0xff]  ;;  %v11242_v23 = vpack.c.bf16 %v5532_v17, %v5531_v16  ;;  %v5808_v16 = vld [vmem:[%s14194_s7 + $0x8d8] sm:$0xff]  ;;  %v11304_v17 = vpack.c.bf16 %v5790_v10, %v5789_v9  ;;  %v6376_v10 = vld [vmem:[%s14196_s9 + $0xa0] sm:$0xff] }
 0x51b   : > { %11223 = vmatprep.subr.bf16.mxu1 %v11222_v21  ;;  %v5678_v21 = vld [vmem:[%s14194_s7 + $0x7f8] sm:$0xff]  ;;  %v11280_v15 = vpack.c.bf16 %v5660_v19, %v5659_v18  ;;  %v5791_v18 = vld [vmem:[%s14194_s7 + $0x850] sm:$0xff] }
 0x51c   : > { %11261 = vmatpush3.bf16.msra.mxu0 %v11260_v26  ;;  %v5516_v26 = vld [vmem:[%s14194_s7 + $0x658] sm:$0xff]  ;;  %v11282_v30 = vpack.c.bf16 %v5678_v21, %v5677_v11  ;;  %v5810_v11 = vld [vmem:[%s14194_s7 + $0x8e8] sm:$0xff] }
 0x51d   : > { %5347 = vmatmul.mubr.f32.vlgmr.msra.gmra.mrb[8].mxu1 %v13028_v37  ;;  %11263 = vmatprep.subr.bf16.mxu0 %v11262_v29  ;;  %v5672_v37 = vld [vmem:[%s14194_s7 + $0x7c8] sm:$0xff]  ;;  %v11244_v32 = vpack.c.bf16 %v5516_v26, %v5515_v25  ;;  %v5792_v19 = vld [vmem:[%s14194_s7 + $0x858] sm:$0xff]  ;;  %v5793_v25 = vld [vmem:[%s14194_s7 + $0x860] sm:$0xff] }
 0x51e   : > { %11225 = vmatpush3.bf16.msra.mxu1 %v11224_v34  ;;  %5612 = vmatprep.mubr.f32.mxu1 %v5545_v38  ;;  %v11270_v54 = vpack.c.bf16 %v5672_v37, %v5671_v47  ;;  %v5534_v29 = vld [vmem:[%s14194_s7 + $0x6e8] sm:$0xff]  ;;  %v5662_v34 = vld [vmem:[%s14194_s7 + $0x778] sm:$0xff]  ;;  %v5535_v38 = vld [vmem:[%s14194_s7 + $0x6f0] sm:$0xff]  ;;  %v9211_v37 = vcombine.high %v12939_v52, %v9210_v40  ;;  %v11308_v21 = vpack.c.bf16 %v5792_v19, %v5791_v18 }
 0x51f   : > { %11227 = vmatprep.subr.bf16.mxu1 %v11226_v35  ;;  %v11246_v33 = vpack.c.bf16 %v5534_v29, %v5533_v28  ;;  %v5517_v35 = vld [vmem:[%s14194_s7 + $0x660] sm:$0xff]  ;;  %v11284_v24 = vpack.c.bf16 %v5662_v34, %v5661_v31  ;;  %v5798_v47 = vld [vmem:[%s14194_s7 + $0x888] sm:$0xff]  ;;  %v5799_v52 = vld [vmem:[%s14194_s7 + $0x890] sm:$0xff] }
 0x520   : > { %11265 = vmatpush3.bf16.msra.mxu0 %v11264_v39  ;;  %v5536_v39 = vld [vmem:[%s14194_s7 + $0x6f8] sm:$0xff]  ;;  %v11248_v41 = vpack.c.bf16 %v5518_v36, %v5517_v35  ;;  %v13406_v51 = vrot.slane %v9211_v37, %v12758_v5  ;;  %v5794_v26 = vld [vmem:[%s14194_s7 + $0x868] sm:$0xff]  ;;  %v5795_v31 = vld [vmem:[%s14194_s7 + $0x870] sm:$0xff]  ;;  %v11847_v36 = vmov 0.0|0.0  }
 0x521   : > { %11267 = vmatprep.subr.bf16.mxu0 %v11266_v42  ;;  %v11250_v42 = vpack.c.bf16 %v5536_v39, %v5535_v38  ;;  %v5812_v28 = vld [vmem:[%s14194_s7 + $0x8f8] sm:$0xff]  ;;  %v11312_v29 = vpack.c.bf16 %v5794_v26, %v5793_v25  ;;  %v5938_v35 = vld [vmem:[%s14196_s9 + $0x28] sm:$0xff]  ;;  %v5939_v38 = vld [vmem:[%s14196_s9 + $0x30] sm:$0xff] }
 0x522   : > { %11229 = vmatpush3.bf16.msra.mxu1 %v11228_v46  ;;  %v5797_v46 = vld [vmem:[%s14194_s7 + $0x880] sm:$0xff]  ;;  %v5796_v34 = vld [vmem:[%s14194_s7 + $0x878] sm:$0xff]  ;;  %v5933_v37 = vld [vmem:[%s14196_s9 + $0x10] sm:$0xff] }
 0x523   : > { %11231 = vmatprep.subr.bf16.mxu1 %v11230_v48  ;;  %v11252_v48 = vpack.c.bf16 %v5520_v44, %v5519_v43  ;;  %v11286_v49 = vpack.c.bf16 %v5798_v47, %v5797_v46  ;;  %v5940_v39 = vld [vmem:[%s14196_s9 + $0x38] sm:$0xff]  ;;  %v5932_v43 = vld [vmem:[%s14196_s9 + $0x8] sm:$0xff]  ;;  %v6378_v18 = vld [vmem:[%s14196_s9 + $0xb0] sm:$0xff] }
 0x524   : > { %11269 = vmatpush3.bf16.msra.mxu0 %v11268_v59  ;;  %v5782_v59 = vld [vmem:[%s14194_s7 + $0x808] sm:$0xff]  ;;  %v11322_v40 = vpack.c.bf16 %v5940_v39, %v5939_v38  ;;  %v6379_v19 = vld [vmem:[%s14196_s9 + $0xb8] sm:$0xff] }
 0x525   : > { %11271 = vmatprep.subr.bf16.mxu0 %v11270_v54  ;;  %v11288_v53 = vpack.c.bf16 %v5782_v59, %v5781_v50  ;;  %v6108_v59 = vld [vmem:[%s14196_s9 + $0x40] sm:$0xff]  ;;  %v11352_v25 = vpack.c.bf16 %v6379_v19, %v6378_v18  ;;  %v6557_v38 = vld [vmem:[%s14196_s9 + $0xf8] sm:$0xff] }
 0x526   : > { %11233 = vmatpush3.bf16.msra.mxu1 %v11232_v57  ;;  %v5821_v57 = vcombine.high %v13406_v51, %v13406_v51  ;;  %v6646_v19 = vld [vmem:[%s14196_s9 + $0x118] sm:$0xff] }
 0x527   : > { %11235 = vmatprep.subr.bf16.mxu1 %v11234_v60  ;;  %v11292_v60 = vpack.c.bf16 %v5784_v56, %v5783_v55  ;;  %v6110_v56 = vld [vmem:[%s14196_s9 + $0x50] sm:$0xff] }
 0x528   : > { %11273 = vmatpush3.bf16.msra.mxu0 %v11272_v62  ;;  %v5786_v62 = vld [vmem:[%s14194_s7 + $0x828] sm:$0xff] }
 0x529   : > { %11275 = vmatprep.subr.bf16.mxu0 %v11274_v1  ;;  %v11296_v0 = vpack.c.bf16 %v5786_v62, %v5785_v61  ;;  %v6197_v62 = vld [vmem:[%s14196_s9 + $0x60] sm:$0xff] }
 0x52a   : > { %11237 = vmatpush3.bf16.msra.mxu1 %v11236_v6  ;;  %v5805_v6 = vld [vmem:[%s14194_s7 + $0x8c0] sm:$0xff] }
 0x52b   : > { %11239 = vmatprep.subr.bf16.mxu1 %v11238_v8  ;;  %v11302_v8 = vpack.c.bf16 %v5806_v7, %v5805_v6 }
 0x52c   : > { %11277 = vmatpush3.bf16.msra.mxu0 %v11276_v14  ;;  %v5807_v14 = vld [vmem:[%s14194_s7 + $0x8d0] sm:$0xff] }
 0x52d   : > { %11279 = vmatprep.subr.bf16.mxu0 %v11278_v13  ;;  %v11306_v13 = vpack.c.bf16 %v5808_v16, %v5807_v14  ;;  %v6377_v14 = vld [vmem:[%s14196_s9 + $0xa8] sm:$0xff] }
 0x52e   : > { %11241 = vmatpush3.bf16.msra.mxu1 %v11240_v20  ;;  %v5809_v20 = vld [vmem:[%s14194_s7 + $0x8e0] sm:$0xff] }
 0x52f   : > { %11243 = vmatprep.subr.bf16.mxu1 %v11242_v23  ;;  %v11310_v23 = vpack.c.bf16 %v5810_v11, %v5809_v20 }
 0x530   : > { %11281 = vmatpush3.bf16.msra.mxu0 %v11280_v15  ;;  %v5811_v15 = vld [vmem:[%s14194_s7 + $0x8f0] sm:$0xff] }
 0x531   : > { %11283 = vmatprep.subr.bf16.mxu0 %v11282_v30  ;;  %v11314_v30 = vpack.c.bf16 %v5812_v28, %v5811_v15  ;;  %v6465_v28 = vld [vmem:[%s14196_s9 + $0xc0] sm:$0xff] }
 0x532   : > { %11245 = vmatpush3.bf16.msra.mxu1 %v11244_v32  ;;  %v11316_v32 = vpack.c.bf16 %v5796_v34, %v5795_v31  ;;  %v6555_v34 = vld [vmem:[%s14196_s9 + $0xe8] sm:$0xff] }
 0x533   : > { %11247 = vmatprep.subr.bf16.mxu1 %v11246_v33  ;;  %v5937_v33 = vld [vmem:[%s14196_s9 + $0x20] sm:$0xff] }
 0x534   : > { %11285 = vmatpush3.bf16.msra.mxu0 %v11284_v24  ;;  %v11319_v24 = vpack.c.bf16 %v5938_v35, %v5937_v33  ;;  %v6468_v33 = vld [vmem:[%s14196_s9 + $0xd8] sm:$0xff] }
 0x535   : > { %11318 = vmatprep.subr.bf16.mxu0 %v11847_v36 }
 0x536   : > { %11249 = vmatpush3.bf16.msra.mxu1 %v11248_v41  ;;  %v13511_v41 = vld [vmem:[#allocation6] sm:$0xff] }
 0x537   : > { %5755 = vmatmul.mubr.f32.vlgmr.msra.gmra.mrb[8].mxu0 %v13193_v2  ;;  %11251 = vmatprep.subr.bf16.mxu1 %v11250_v42  ;;  %v5800_v2 = vld [vmem:[%s14194_s7 + $0x898] sm:$0xff]  ;;  %5916 = vst.msk [vmem:[#allocation7] sm:$0x3f] %vm5915_vm3, %v13511_v41  ;;  %5917 = vst.msk [vmem:[#allocation7 + $0x8] sm:$0x3f] %vm5915_vm3, %v13511_v41  ;;  %v5931_v42 = vld [vmem:[%s14196_s9] sm:$0xff] }
 0x538   : > { %v11290_v54 = vpack.c.bf16 %v5800_v2, %v5799_v52  ;;  %11320 = vmatpush3.bf16.msra.mxu0 %v11319_v24  ;;  %10384 = vmatprep.mubr.msk.f32.mxu0 %vm11848_vm4, %v13511_v41  ;;  %5919 = vst.msk [vmem:[#allocation7 + $0x20] sm:$0x3f] %vm5915_vm3, %v13511_v41  ;;  %5920 = vst.msk [vmem:[#allocation7 + $0x28] sm:$0x3f] %vm5915_vm3, %v13511_v41  ;;  %v11325_v46 = vpack.c.bf16 %v5932_v43, %v5931_v42  ;;  %v6287_v52 = vld [vmem:[%s14196_s9 + $0x88] sm:$0xff]  ;;  %v6556_v24 = vld [vmem:[%s14196_s9 + $0xf0] sm:$0xff] }
 0x539   : > { %11321 = vmatprep.subr.bf16.mxu0 %v11847_v36  ;;  %5923 = vst.msk [vmem:[#allocation7 + $0x10] sm:$0x3] %vm5922_vm5, %v13511_v41  ;;  %5924 = vst.msk [vmem:[#allocation7 + $0x18] sm:$0x3] %vm5922_vm5, %v13511_v41  ;;  %v6109_v2 = vld [vmem:[%s14196_s9 + $0x48] sm:$0xff] }
 0x53a   : > { %11253 = vmatpush3.bf16.msra.mxu1 %v11252_v48  ;;  %5925 = vst.msk [vmem:[#allocation7 + $0x14] sm:$0x3] %vm5922_vm5, %v13511_v41  ;;  %5926 = vst.msk [vmem:[#allocation7 + $0x1c] sm:$0x3] %vm5922_vm5, %v13511_v41  ;;  %v5934_v48 = vld [vmem:[%s14196_s9 + $0x18] sm:$0xff]  ;;  %v11331_v58 = vpack.c.bf16 %v6109_v2, %v6108_v59 }
 0x53b   : > { %11287 = vmatprep.subr.bf16.mxu1 %v11286_v49  ;;  %v11328_v50 = vpack.c.bf16 %v5934_v48, %v5933_v37  ;;  %8176 = vst.msk [vmem:[#allocation8] sm:$0xf] %vm8175_vm7, %v13511_v41  ;;  %8178 = vst.msk [vmem:[#allocation8 + $0xc] sm:$0xf] %vm8175_vm7, %v13511_v41 }
 0x53c   : > { %11323 = vmatpush3.bf16.msra.mxu0 %v11322_v40  ;;  %v11364_v40 = vpack.c.bf16 %v6557_v38, %v6556_v24  ;;  %8181 = vst.msk [vmem:[#allocation8 + $0x4] sm:$0x1] %vm8180_vm8, %v13511_v41  ;;  %8182 = vst.msk [vmem:[#allocation8 + $0x8] sm:$0x1] %vm8180_vm8, %v13511_v41 }
 0x53d   : > { %5613 = vmatmul.mubr.f32.vlgmr.msra.gmra.mrb[10].mxu1 %v13236_v27  ;;  %v5804_v27 = vld [vmem:[%s14194_s7 + $0x8b8] sm:$0xff]  ;;  %11324 = vmatprep.subr.bf16.mxu0 %v11847_v36  ;;  %8183 = vst.msk [vmem:[#allocation8 + $0x7] sm:$0x1] %vm8180_vm8, %v13511_v41  ;;  %8184 = vst.msk [vmem:[#allocation8 + $0xb] sm:$0x1] %vm8180_vm8, %v13511_v41 }
 0x53e   : > { %11289 = vmatpush3.bf16.msra.mxu1 %v11288_v53  ;;  %5888 = vmatprep.mubr.f32.mxu1 %v5821_v57  ;;  %v11298_v1 = vpack.c.bf16 %v5804_v27, %v5803_v63  ;;  %v11734_v44 = vld [vmem:[#allocation7 + $0x1] ss:$8 sps:$4 sm:$0x33]   ;;  %v6198_v63 = vld [vmem:[%s14196_s9 + $0x68] sm:$0xff] }
 0x53f   : > { %11291 = vmatprep.subr.bf16.mxu1 %v11290_v54  ;;  %v5950_v47 = vrot.slane %v11734_v44, %v12758_v5  ;;  %v11735_v49 = vld [vmem:[#allocation7] ss:$8 sps:$4 sm:$0x33]   ;;  %v11736_v61 = vld [vmem:[#allocation7 + $0x2] ss:$8 sps:$4 sm:$0x33]   ;;  %v11337_v6 = vpack.c.bf16 %v6198_v63, %v6197_v62 }
 0x540   : > { %v6288_v54 = vld [vmem:[%s14196_s9 + $0x90] sm:$0xff]  ;;  %v6033_v55 = vrot.slane %v11735_v49, %v12758_v5  ;;  %v6289_v57 = vld [vmem:[%s14196_s9 + $0x98] sm:$0xff] }
 0x541   : > { %10385 = vmatmul.mubr.msk.f32.vlgmr.msra.gmra.mrb[10].mxu0 %vm5951_vm6, %v5950_v47  ;;  %v11346_v45 = vpack.c.bf16 %v6289_v57, %v6288_v54  ;;  %v11737_v7 = vld [vmem:[#allocation7 + $0x3] ss:$8 sps:$4 sm:$0x33]  }
 0x542   : > { %11293 = vmatpush3.bf16.msra.mxu1 %v11292_v60  ;;  %11326 = vmatpush3.bf16.msra.mxu0 %v11325_v46  ;;  %v6111_v60 = vld [vmem:[%s14196_s9 + $0x58] sm:$0xff] }
 0x543   : > { %11295 = vmatprep.subr.bf16.mxu1 %v11294_v12  ;;  %10395 = vmatprep.mubr.msk.f32.mxu0 %vm11848_vm4, %v13511_v41  ;;  %v11738_v12 = vld [vmem:[#allocation7 + $0x4] ss:$8 sps:$4 sm:$0x33]  }
 0x544   : > { %11327 = vmatprep.subr.bf16.mxu0 %v11847_v36  ;;  %v6299_v27 = vrot.slane %v11738_v12, %v12758_v5 }
 0x546   : > { %11297 = vmatpush3.bf16.msra.mxu1 %v11296_v0  ;;  %11329 = vmatpush3.bf16.msra.mxu0 %v11328_v50  ;;  %v11334_v0 = vpack.c.bf16 %v6111_v60, %v6110_v56 }
 0x547   : > { %11299 = vmatprep.subr.bf16.mxu1 %v11298_v1  ;;  %11330 = vmatprep.subr.bf16.mxu0 %v11847_v36  ;;  %v6121_v1 = vrot.slane %v11736_v61, %v12758_v5 }
 0x549   : > { %10396 = vmatmul.mubr.msk.f32.vlgmr.msra.gmra.mrb[12].mxu0 %vm5951_vm6, %v6033_v55 }
 0x54a   : > { %11301 = vmatpush3.bf16.msra.mxu1 %v11300_v22  ;;  %11332 = vmatpush3.bf16.msra.mxu0 %v11331_v58 }
 0x54b   : > { %11303 = vmatprep.subr.bf16.mxu1 %v11302_v8  ;;  %10406 = vmatprep.mubr.msk.f32.mxu0 %vm11848_vm4, %v13511_v41  ;;  %v11340_v8 = vpack.c.bf16 %v6200_v4, %v6199_v3 }
 0x54c   : > { %11333 = vmatprep.subr.bf16.mxu0 %v11847_v36 }
 0x54e   : > { %11305 = vmatpush3.bf16.msra.mxu1 %v11304_v17  ;;  %11335 = vmatpush3.bf16.msra.mxu0 %v11334_v0  ;;  %v6210_v17 = vrot.slane %v11737_v7, %v12758_v5 }
 0x54f   : > { %11307 = vmatprep.subr.bf16.mxu1 %v11306_v13  ;;  %11336 = vmatprep.subr.bf16.mxu0 %v11847_v36  ;;  %v11349_v13 = vpack.c.bf16 %v6377_v14, %v6376_v10  ;;  %v6732_v10 = vld [vmem:[%s14196_s9 + $0x120] sm:$0xff]  ;;  %v6733_v14 = vld [vmem:[%s14196_s9 + $0x128] sm:$0xff] }
 0x551   : > { %10407 = vmatmul.mubr.msk.f32.vlgmr.msra.gmra.mrb[14].mxu0 %vm5951_vm6, %v6121_v1  ;;  %v9212_v1 = vld [vmem:[%s14195_s8] ss:$0 sm:$0xff] }
 0x552   : > { %11309 = vmatpush3.bf16.msra.mxu1 %v11308_v21  ;;  %11338 = vmatpush3.bf16.msra.mxu0 %v11337_v6  ;;  %v11739_v21 = vld [vmem:[#allocation7 + $0x8] ss:$8 sps:$4 sm:$0x33]  }
 0x553   : > { %11311 = vmatprep.subr.bf16.mxu1 %v11310_v23  ;;  %10417 = vmatprep.mubr.msk.f32.mxu0 %vm11848_vm4, %v13511_v41  ;;  %v6389_v15 = vrot.slane %v11739_v21, %v12758_v5  ;;  %v6734_v21 = vld [vmem:[%s14196_s9 + $0x130] sm:$0xff] }
 0x554   : > { %11339 = vmatprep.subr.bf16.mxu0 %v11847_v36 }
 0x556   : > { %11313 = vmatpush3.bf16.msra.mxu1 %v11312_v29  ;;  %11341 = vmatpush3.bf16.msra.mxu0 %v11340_v8  ;;  %v6466_v29 = vld [vmem:[%s14196_s9 + $0xc8] sm:$0xff]  ;;  %v6643_v8 = vld [vmem:[%s14196_s9 + $0x100] sm:$0xff] }
 0x557   : > { %11315 = vmatprep.subr.bf16.mxu1 %v11314_v30  ;;  %11348 = vmatprep.subr.bf16.mxu0 %v11847_v36  ;;  %v6554_v30 = vld [vmem:[%s14196_s9 + $0xe0] sm:$0xff]  ;;  %v11355_v31 = vpack.c.bf16 %v6466_v29, %v6465_v28 }
 0x558   : > { %v11361_v35 = vpack.c.bf16 %v6555_v34, %v6554_v30  ;;  %v6821_v28 = vld [vmem:[%s14196_s9 + $0x140] sm:$0xff] }
 0x559   : > { %10418 = vmatmul.mubr.msk.f32.vlgmr.msra.gmra.mrb[16].mxu0 %vm5951_vm6, %v6210_v17  ;;  %v6645_v17 = vld [vmem:[%s14196_s9 + $0x110] sm:$0xff]  ;;  %v6910_v34 = vld [vmem:[%s14196_s9 + $0x160] sm:$0xff] }
 0x55a   : > { %11317 = vmatpush3.bf16.msra.mxu1 %v11316_v32  ;;  %11350 = vmatpush3.bf16.msra.mxu0 %v11349_v13  ;;  %v6467_v32 = vld [vmem:[%s14196_s9 + $0xd0] sm:$0xff] }
 0x55b   : > { %11342 = vmatprep.subr.bf16.mxu1 %v11847_v36  ;;  %10439 = vmatprep.mubr.msk.f32.mxu0 %vm11848_vm4, %v13511_v41  ;;  %v11358_v39 = vpack.c.bf16 %v6468_v33, %v6467_v32  ;;  %v6911_v32 = vld [vmem:[%s14196_s9 + $0x168] sm:$0xff] }
 0x55c   : > { %11351 = vmatprep.subr.bf16.mxu0 %v11847_v36  ;;  %v11385_v38 = vpack.c.bf16 %v6911_v32, %v6910_v34  ;;  %v7534_v34 = vld [vmem:[%s14196_s9 + $0x240] sm:$0xff]  ;;  %v7535_v32 = vld [vmem:[%s14196_s9 + $0x248] sm:$0xff] }
 0x55d   : > { %5889 = vmatmul.mubr.f32.vlgmr.msra.gmra.mrb[12].mxu1 %v13406_v51  ;;  %v6286_v51 = vld [vmem:[%s14196_s9 + $0x80] sm:$0xff] }
 0x55e   : > { %10428 = vmatprep.mubr.msk.f32.mxu1 %vm11848_vm4, %v13511_v41  ;;  %v11343_v53 = vpack.c.bf16 %v6287_v52, %v6286_v51  ;;  %11353 = vmatpush3.bf16.msra.mxu0 %v11352_v25 }
 0x55f   : > { %11360 = vmatprep.subr.bf16.mxu0 %v11847_v36 }
 0x560   : > { %11344 = vmatpush3.bf16.msra.mxu1 %v11343_v53 }
 0x561   : > { %11345 = vmatprep.subr.bf16.mxu1 %v11847_v36  ;;  %10440 = vmatmul.mubr.msk.f32.vlgmr.msra.gmra.mrb[18].mxu0 %vm5951_vm6, %v6389_v15  ;;  %v11743_v15 = vld [vmem:[#allocation7 + $0xc] ss:$8 sps:$4 sm:$0x33]  }
 0x562   : > { %10461 = vmatprep.mubr.msk.f32.mxu0 %vm11848_vm4, %v13511_v41  ;;  %11362 = vmatpush3.bf16.msra.mxu0 %v11361_v35  ;;  %v6745_v33 = vrot.slane %v11743_v15, %v12758_v5  ;;  %v7447_v15 = vld [vmem:[%s14196_s9 + $0x230] sm:$0xff] }
 0x563   : > { %11363 = vmatprep.subr.bf16.mxu0 %v11847_v36 }
 0x564   : > { %11347 = vmatpush3.bf16.msra.mxu1 %v11346_v45 }
 0x565   : > { %11354 = vmatprep.subr.bf16.mxu1 %v11847_v36 }
 0x566   : > { %11365 = vmatpush3.bf16.msra.mxu0 %v11364_v40  ;;  %v6824_v40 = vld [vmem:[%s14196_s9 + $0x158] sm:$0xff] }
 0x567   : > { %10429 = vmatmul.mubr.msk.f32.vlgmr.msra.gmra.mrb[14].mxu1 %vm5951_vm6, %v6299_v27  ;;  %11372 = vmatprep.subr.bf16.mxu0 %v11847_v36 }
 0x568   : > { %10450 = vmatprep.mubr.msk.f32.mxu1 %vm11848_vm4, %v13511_v41  ;;  %11356 = vmatpush3.bf16.msra.mxu1 %v11355_v31  ;;  %v6822_v31 = vld [vmem:[%s14196_s9 + $0x148] sm:$0xff] }
 0x569   : > { %11357 = vmatprep.subr.bf16.mxu1 %v11847_v36  ;;  %v11379_v35 = vpack.c.bf16 %v6822_v31, %v6821_v28  ;;  %v7448_v28 = vld [vmem:[%s14196_s9 + $0x238] sm:$0xff] }
 0x56c   : > { %11359 = vmatpush3.bf16.msra.mxu1 %v11358_v39  ;;  %v6823_v39 = vld [vmem:[%s14196_s9 + $0x150] sm:$0xff] }
 0x56d   : > { %11366 = vmatprep.subr.bf16.mxu1 %v11847_v36 }
 0x5aa   : > { %v9549_v22 = vpop.f32.mrb[2].mxu0 }
 0x5ab   : > { %v9550_v9 = vpop.f32.mrb[3].mxu0 }
 0x5ac   : > { %v9551_v16 = vadd.f32 %v9550_v9, %v9549_v22  ;;  %v6644_v9 = vld [vmem:[%s14196_s9 + $0x108] sm:$0xff] }
 0x5ad   : > { %v11367_v18 = vpack.c.bf16 %v6644_v9, %v6643_v8  ;;  %v7270_v8 = vld [vmem:[%s14196_s9 + $0x1f8] sm:$0xff]  ;;  %v11748_v9 = vld [vmem:[#allocation7 + $0x14] ss:$8 sps:$4 sm:$0x33]  }
 0x5b0   : > { %v9514_v20 = vpop.f32.mrb[4].mxu1 }
 0x5b1   : > { %v9515_v11 = vpop.f32.mrb[5].mxu1 }
 0x5b2   : > { %v9516_v23 = vadd.f32 %v9515_v11, %v9514_v20  ;;  %v11373_v11 = vpack.c.bf16 %v6733_v14, %v6732_v10  ;;  %v11749_v14 = vld [vmem:[#allocation7 + $0x18] ss:$8 sps:$4 sm:$0x33]  }
 0x5b4   : > { %v4942_v26 = vadd.f32 %v9551_v16, %v9516_v23  ;;  %v6735_v23 = vld [vmem:[%s14196_s9 + $0x138] sm:$0xff] }
 0x5b5   : > { %v11376_v29 = vpack.c.bf16 %v6735_v23, %v6734_v21 }
 0x5ca   : > { %v9619_v42 = vpop.f32.mrb[4].mxu0 }
 0x5cb   : > { %v9620_v43 = vpop.f32.mrb[5].mxu0 }
 0x5cc   : > { %v9621_v44 = vadd.f32 %v9620_v43, %v9619_v42  ;;  %v6912_v42 = vld [vmem:[%s14196_s9 + $0x170] sm:$0xff]  ;;  %v6913_v43 = vld [vmem:[%s14196_s9 + $0x178] sm:$0xff] }
 0x5d0   : > { %v9584_v46 = vpop.f32.mrb[6].mxu1 }
 0x5d1   : > { %v9585_v47 = vpop.f32.mrb[7].mxu1 }
 0x5d2   : > { %v9586_v37 = vadd.f32 %v9585_v47, %v9584_v46  ;;  %v11382_v46 = vpack.c.bf16 %v6824_v40, %v6823_v39  ;;  %v11388_v47 = vpack.c.bf16 %v6913_v43, %v6912_v42  ;;  %v7536_v43 = vld [vmem:[%s14196_s9 + $0x250] sm:$0xff] }
 0x5d4   : > { %v5078_v48 = vadd.f32 %v9586_v37, %v4942_v26  ;;  %v11370_v26 = vpack.c.bf16 %v6646_v19, %v6645_v17  ;;  %v6999_v37 = vld [vmem:[%s14196_s9 + $0x180] sm:$0xff]  ;;  %v7446_v19 = vld [vmem:[%s14196_s9 + $0x228] sm:$0xff] }
 0x5d5   : > { %v7356_v17 = vld [vmem:[%s14196_s9 + $0x200] sm:$0xff] }
 0x5d6   : > { %v5210_v49 = vadd.f32 %v9621_v44, %v5078_v48  ;;  %v11744_v44 = vld [vmem:[#allocation7 + $0x10] ss:$8 sps:$4 sm:$0x33]  }
 0x5d7   : > { %v7000_v48 = vld [vmem:[%s14196_s9 + $0x188] sm:$0xff] }
 0x5ea   : > { %v9689_v50 = vpop.f32.mrb[6].mxu0 }
 0x5eb   : > { %v9690_v59 = vpop.f32.mrb[7].mxu0 }
 0x5ec   : > { %v9691_v51 = vadd.f32 %v9690_v59, %v9689_v50  ;;  %v7088_v50 = vld [vmem:[%s14196_s9 + $0x1a0] sm:$0xff]  ;;  %v7089_v59 = vld [vmem:[%s14196_s9 + $0x1a8] sm:$0xff] }
 0x5f0   : > { %v9654_v52 = vpop.f32.mrb[8].mxu1 }
 0x5f1   : > { %v9655_v2 = vpop.f32.mrb[9].mxu1 }
 0x5f2   : > { %v9656_v53 = vadd.f32 %v9655_v2, %v9654_v52  ;;  %v11391_v52 = vpack.c.bf16 %v7000_v48, %v6999_v37  ;;  %v11397_v2 = vpack.c.bf16 %v7089_v59, %v7088_v50  ;;  %v7625_v37 = vld [vmem:[%s14196_s9 + $0x270] sm:$0xff]  ;;  %v7626_v48 = vld [vmem:[%s14196_s9 + $0x278] sm:$0xff] }
 0x5f3   : > { %v11753_v50 = vld [vmem:[#allocation7 + $0x1c] ss:$8 sps:$4 sm:$0x33]   ;;  %v11436_v59 = vpack.c.bf16 %v7626_v48, %v7625_v37 }
 0x5f4   : > { %v5352_v54 = vadd.f32 %v9656_v53, %v5210_v49  ;;  %v7001_v53 = vld [vmem:[%s14196_s9 + $0x190] sm:$0xff] }
 0x5f6   : > { %v5486_v55 = vadd.f32 %v9691_v51, %v5352_v54  ;;  %v6834_v51 = vrot.slane %v11744_v44, %v12758_v5  ;;  %v7002_v54 = vld [vmem:[%s14196_s9 + $0x198] sm:$0xff] }
 0x5f7   : > { %v7537_v44 = vld [vmem:[%s14196_s9 + $0x258] sm:$0xff] }
 0x60a   : > { %v9759_v56 = vpop.f32.mrb[8].mxu0 }
 0x60b   : > { %v9760_v57 = vpop.f32.mrb[9].mxu0 }
 0x60c   : > { %v9761_v58 = vadd.f32 %v9760_v57, %v9759_v56  ;;  %v7090_v56 = vld [vmem:[%s14196_s9 + $0x1b0] sm:$0xff]  ;;  %v7091_v57 = vld [vmem:[%s14196_s9 + $0x1b8] sm:$0xff] }
 0x610   : > { %v9724_v45 = vpop.f32.mrb[10].mxu1 }
 0x611   : > { %v9725_v60 = vpop.f32.mrb[11].mxu1 }
 0x612   : > { %v9726_v12 = vadd.f32 %v9725_v60, %v9724_v45  ;;  %v11400_v45 = vpack.c.bf16 %v7091_v57, %v7090_v56  ;;  %v7636_v56 = vrot.slane %v11753_v50, %v12758_v5  ;;  %v8196_v50 = vld [vmem:[%s14198_s11 + $0x28] sm:$0xff] }
 0x614   : > { %v5618_v61 = vadd.f32 %v9726_v12, %v5486_v55  ;;  %v7177_v12 = vld [vmem:[%s14196_s9 + $0x1c0] sm:$0xff]  ;;  %v6020_v39 = vpop.f32.mrb[10].mxu0 }
 0x616   : > { %v5760_v62 = vadd.f32 %v9761_v58, %v5618_v61  ;;  %v11394_v58 = vpack.c.bf16 %v7002_v54, %v7001_v53  ;;  %v7178_v61 = vld [vmem:[%s14196_s9 + $0x1c8] sm:$0xff]  ;;  %v7801_v53 = vld [vmem:[%s14196_s9 + $0x2a0] sm:$0xff] }
 0x617   : > { %v7802_v54 = vld [vmem:[%s14196_s9 + $0x2a8] sm:$0xff] }
 0x630   : > { %v9794_v63 = vpop.f32.mrb[12].mxu1 }
 0x631   : > { %v9795_v27 = vpop.f32.mrb[13].mxu1 }
 0x632   : > { %v9796_v0 = vadd.f32 %v9795_v27, %v9794_v63  ;;  %v7267_v63 = vld [vmem:[%s14196_s9 + $0x1e0] sm:$0xff]  ;;  %v7268_v27 = vld [vmem:[%s14196_s9 + $0x1e8] sm:$0xff] }
 0x634   : > { %v5894_v3 = vadd.f32 %v9796_v0, %v5760_v62  ;;  %v11403_v0 = vpack.c.bf16 %v7178_v61, %v7177_v12  ;;  %v7715_v12 = vld [vmem:[%s14196_s9 + $0x298] sm:$0xff] }
 0x636   : > { %v5902_v4 = vadd.f32 %v9212_v1, %v5894_v3  ;;  %v11409_v3 = vpack.c.bf16 %v7268_v27, %v7267_v63  ;;  %v7803_v63 = vld [vmem:[%s14196_s9 + $0x2b0] sm:$0xff]  ;;  %v7804_v27 = vld [vmem:[%s14196_s9 + $0x2b8] sm:$0xff] }
 0x638   : > { %v5903_v6 = vmax.f32 %v5902_v4, 0.0  ;;  %v7179_v4 = vld [vmem:[%s14196_s9 + $0x1d0] sm:$0xff] }
 0x63a   : > { %v5911_v7 = vrot.slane %v5903_v6, %v12758_v5  ;;  %v7180_v6 = vld [vmem:[%s14196_s9 + $0x1d8] sm:$0xff] }
 0x63b   : > { %v11406_v10 = vpack.c.bf16 %v7180_v6, %v7179_v4  ;;  %v11755_v4 = vld [vmem:[#allocation7 + $0x21] ss:$8 sps:$4 sm:$0x33]  }
 0x63c   : > { %v5912_v22 = vcombine.high %v5911_v7, %v5911_v7  ;;  %5927 = vst.msk [vmem:[#allocation7 + $0x12] sm:$0x3] %vm5922_vm5, %v5911_v7 }
 0x63e   : > { %5928 = vst.msk [vmem:[#allocation7 + $0x1a] sm:$0x3] %vm5922_vm5, %v5912_v22  ;;  %v7269_v22 = vld [vmem:[%s14196_s9 + $0x1f0] sm:$0xff] }
 0x643   : > { %v11740_v16 = vld [vmem:[#allocation7 + $0x9] ss:$8 sps:$4 sm:$0x33]   ;;  %v11742_v30 = vld [vmem:[#allocation7 + $0xb] ss:$8 sps:$4 sm:$0x33]  }
 0x644   : > { %v11741_v13 = vld [vmem:[#allocation7 + $0xa] ss:$8 sps:$4 sm:$0x33]   ;;  %v6478_v20 = vrot.slane %v11740_v16, %v12758_v5  ;;  %v6656_v24 = vrot.slane %v11742_v30, %v12758_v5  ;;  %v11412_v16 = vpack.c.bf16 %v7270_v8, %v7269_v22  ;;  %v11424_v30 = vpack.c.bf16 %v7448_v28, %v7447_v15  ;;  %v7891_v8 = vld [vmem:[%s14196_s9 + $0x2c8] sm:$0xff] }
 0x645   : > { %v6567_v25 = vrot.slane %v11741_v13, %v12758_v5  ;;  %v11745_v49 = vld [vmem:[#allocation7 + $0x11] ss:$8 sps:$4 sm:$0x33]   ;;  %v11747_v62 = vld [vmem:[#allocation7 + $0x13] ss:$8 sps:$4 sm:$0x33]  }
 0x646   : > { %10451 = vmatmul.mubr.msk.f32.vlgmr.msra.gmra.mrb[16].mxu1 %vm5951_vm6, %v6478_v20  ;;  %v6923_v55 = vrot.slane %v11745_v49, %v12758_v5  ;;  %v11746_v60 = vld [vmem:[#allocation7 + $0x12] ss:$8 sps:$4 sm:$0x33]   ;;  %v7101_v7 = vrot.slane %v11747_v62, %v12758_v5  ;;  %v7190_v20 = vrot.slane %v11748_v9, %v12758_v5  ;;  %v11430_v49 = vpack.c.bf16 %v7537_v44, %v7536_v43  ;;  %v11757_v28 = vld [vmem:[#allocation7 + $0x23] ss:$8 sps:$4 sm:$0x33]  }
 0x647   : > { %10462 = vmatmul.mubr.msk.f32.vlgmr.msra.gmra.mrb[20].mxu0 %vm5951_vm6, %v6567_v25  ;;  %11368 = vmatpush3.bf16.msra.mxu1 %v11367_v18  ;;  %v7012_v1 = vrot.slane %v11746_v60, %v12758_v5  ;;  %v7357_v13 = vld [vmem:[%s14196_s9 + $0x208] sm:$0xff]  ;;  %v7445_v18 = vld [vmem:[%s14196_s9 + $0x220] sm:$0xff]  ;;  %v7358_v25 = vld [vmem:[%s14196_s9 + $0x210] sm:$0xff] }
 0x648   : > { %11374 = vmatpush3.bf16.msra.mxu0 %v11373_v11  ;;  %11369 = vmatprep.subr.bf16.mxu1 %v11847_v36  ;;  %v7280_v11 = vrot.slane %v11749_v14, %v12758_v5  ;;  %v11415_v21 = vpack.c.bf16 %v7357_v13, %v7356_v17  ;;  %v11421_v23 = vpack.c.bf16 %v7446_v19, %v7445_v18  ;;  %v11750_v31 = vld [vmem:[#allocation7 + $0x19] ss:$8 sps:$4 sm:$0x33]   ;;  %v7890_v22 = vld [vmem:[%s14196_s9 + $0x2c0] sm:$0xff] }
 0x649   : > { %11375 = vmatprep.subr.bf16.mxu0 %v11847_v36  ;;  %10472 = vmatprep.mubr.msk.f32.mxu1 %vm11848_vm4, %v13511_v41  ;;  %v7369_v40 = vrot.slane %v11750_v31, %v12758_v5  ;;  %v7714_v60 = vld [vmem:[%s14196_s9 + $0x290] sm:$0xff]  ;;  %v7979_v9 = vld [vmem:[%s14196_s9 + $0x2e0] sm:$0xff]  ;;  %v7814_v17 = vrot.slane %v11755_v4, %v12758_v5  ;;  %v8069_v31 = vld [vmem:[%s14196_s9 + $0x308] sm:$0xff] }
 0x64a   : > { %10483 = vmatprep.mubr.msk.f32.mxu0 %vm11848_vm4, %v13511_v41  ;;  %v7892_v19 = vld [vmem:[%s14196_s9 + $0x2d0] sm:$0xff] }
 0x64b   : > { %11371 = vmatpush3.bf16.msra.mxu1 %v11370_v26  ;;  %v7359_v26 = vld [vmem:[%s14196_s9 + $0x218] sm:$0xff] }
 0x64c   : > { %11377 = vmatpush3.bf16.msra.mxu0 %v11376_v29  ;;  %11378 = vmatprep.subr.bf16.mxu1 %v11847_v36  ;;  %v11418_v29 = vpack.c.bf16 %v7359_v26, %v7358_v25  ;;  %v7982_v25 = vld [vmem:[%s14196_s9 + $0x2f8] sm:$0xff] }
 0x64d   : > { %11384 = vmatprep.subr.bf16.mxu0 %v11847_v36  ;;  %v11756_v26 = vld [vmem:[#allocation7 + $0x22] ss:$8 sps:$4 sm:$0x33]  }
 0x64e   : > { %10473 = vmatmul.mubr.msk.f32.vlgmr.msra.gmra.mrb[18].mxu1 %vm5951_vm6, %v6656_v24  ;;  %v7624_v24 = vld [vmem:[%s14196_s9 + $0x268] sm:$0xff] }
 0x64f   : > { %10484 = vmatmul.mubr.msk.f32.vlgmr.msra.gmra.mrb[22].mxu0 %vm5951_vm6, %v6745_v33  ;;  %11380 = vmatpush3.bf16.msra.mxu1 %v11379_v35  ;;  %v11751_v33 = vld [vmem:[#allocation7 + $0x1a] ss:$8 sps:$4 sm:$0x33]   ;;  %v7623_v35 = vld [vmem:[%s14196_s9 + $0x260] sm:$0xff] }
 0x650   : > { %11386 = vmatpush3.bf16.msra.mxu0 %v11385_v38  ;;  %11381 = vmatprep.subr.bf16.mxu1 %v11847_v36  ;;  %v11427_v38 = vpack.c.bf16 %v7535_v32, %v7534_v34  ;;  %v11433_v42 = vpack.c.bf16 %v7624_v24, %v7623_v35  ;;  %v7903_v34 = vrot.slane %v11756_v26, %v12758_v5  ;;  %v8070_v24 = vld [vmem:[%s14196_s9 + $0x310] sm:$0xff] }
 0x651   : > { %11387 = vmatprep.subr.bf16.mxu0 %v11847_v36  ;;  %10494 = vmatprep.mubr.msk.f32.mxu1 %vm11848_vm4, %v13511_v41 }
 0x652   : > { %10505 = vmatprep.mubr.msk.f32.mxu0 %vm11848_vm4, %v13511_v41 }
 0x653   : > { %11383 = vmatpush3.bf16.msra.mxu1 %v11382_v46  ;;  %v10386_v46 = vpop.f32.mrb[11].mxu0 }
 0x654   : > { %11389 = vmatpush3.bf16.msra.mxu0 %v11388_v47  ;;  %11390 = vmatprep.subr.bf16.mxu1 %v11847_v36  ;;  %v7458_v47 = vrot.slane %v11751_v33, %v12758_v5  ;;  %v6102_v57 = vpop.f32.mrb[12].mxu0  ;;  %v7992_v33 = vrot.slane %v11757_v28, %v12758_v5 }
 0x655   : > { %11396 = vmatprep.subr.bf16.mxu0 %v11847_v36  ;;  %v6103_v61 = vadd.f32 %v6102_v57, %v6020_v39  ;;  %v10397_v62 = vpop.f32.mrb[13].mxu0 }
 0x656   : > { %10495 = vmatmul.mubr.msk.f32.vlgmr.msra.gmra.mrb[20].mxu1 %vm5951_vm6, %v6834_v51  ;;  %v11752_v51 = vld [vmem:[#allocation7 + $0x1b] ss:$8 sps:$4 sm:$0x33]   ;;  %v6190_v13 = vpop.f32.mrb[14].mxu0 }
 0x657   : > { %10506 = vmatmul.mubr.msk.f32.vlgmr.msra.gmra.mrb[24].mxu0 %vm5951_vm6, %v6923_v55  ;;  %11392 = vmatpush3.bf16.msra.mxu1 %v11391_v52  ;;  %v7712_v52 = vld [vmem:[%s14196_s9 + $0x280] sm:$0xff] }
 0x658   : > { %11398 = vmatpush3.bf16.msra.mxu0 %v11397_v2  ;;  %11393 = vmatprep.subr.bf16.mxu1 %v11847_v36  ;;  %v7713_v2 = vld [vmem:[%s14196_s9 + $0x288] sm:$0xff] }
 0x659   : > { %11399 = vmatprep.subr.bf16.mxu0 %v11847_v36  ;;  %10516 = vmatprep.mubr.msk.f32.mxu1 %vm11848_vm4, %v13511_v41  ;;  %v11439_v55 = vpack.c.bf16 %v7713_v2, %v7712_v52  ;;  %v8190_v52 = vld [vmem:[%s14198_s11 + $0x8] sm:$0xff]  ;;  %v8197_v2 = vld [vmem:[%s14198_s11 + $0x30] sm:$0xff] }
 0x65a   : > { %10527 = vmatprep.mubr.msk.f32.mxu0 %vm11848_vm4, %v13511_v41 }
 0x65b   : > { %11395 = vmatpush3.bf16.msra.mxu1 %v11394_v58  ;;  %v7547_v58 = vrot.slane %v11752_v51, %v12758_v5 }
 0x65c   : > { %11401 = vmatpush3.bf16.msra.mxu0 %v11400_v45  ;;  %11402 = vmatprep.subr.bf16.mxu1 %v11847_v36  ;;  %v11445_v45 = vpack.c.bf16 %v7802_v54, %v7801_v53  ;;  %v8198_v53 = vld [vmem:[%s14198_s11 + $0x38] sm:$0xff] }
 0x65d   : > { %11408 = vmatprep.subr.bf16.mxu0 %v11847_v36  ;;  %v11472_v57 = vpack.c.bf16 %v8198_v53, %v8197_v2  ;;  %v9238_v2 = vld [vmem:[%s14197_s10] ss:$0 sm:$0xff] }
 0x65e   : > { %10517 = vmatmul.mubr.msk.f32.vlgmr.msra.gmra.mrb[22].mxu1 %vm5951_vm6, %v7012_v1  ;;  %v6368_v1 = vpop.f32.mrb[14].mxu1 }
 0x65f   : > { %10528 = vmatmul.mubr.msk.f32.vlgmr.msra.gmra.mrb[26].mxu0 %vm5951_vm6, %v7101_v7  ;;  %11404 = vmatpush3.bf16.msra.mxu1 %v11403_v0  ;;  %v11754_v0 = vld [vmem:[#allocation7 + $0x20] ss:$8 sps:$4 sm:$0x33]   ;;  %v10430_v6 = vpop.f32.mrb[15].mxu1  ;;  %v11448_v7 = vpack.c.bf16 %v7804_v27, %v7803_v63 }
 0x660   : > { %11410 = vmatpush3.bf16.msra.mxu0 %v11409_v3  ;;  %11405 = vmatprep.subr.bf16.mxu1 %v11847_v36  ;;  %v11442_v3 = vpack.c.bf16 %v7715_v12, %v7714_v60  ;;  %v7725_v14 = vrot.slane %v11754_v0, %v12758_v5 }
 0x661   : > { %11411 = vmatprep.subr.bf16.mxu0 %v11847_v36  ;;  %10538 = vmatprep.mubr.msk.f32.mxu1 %vm11848_vm4, %v13511_v41 }
 0x662   : > { %10549 = vmatprep.mubr.msk.f32.mxu0 %vm11848_vm4, %v13511_v41 }
 0x663   : > { %11407 = vmatpush3.bf16.msra.mxu1 %v11406_v10  ;;  %v7980_v10 = vld [vmem:[%s14196_s9 + $0x2e8] sm:$0xff] }
 0x664   : > { %11413 = vmatpush3.bf16.msra.mxu0 %v11412_v16  ;;  %11414 = vmatprep.subr.bf16.mxu1 %v11847_v36  ;;  %v11451_v16 = vpack.c.bf16 %v7891_v8, %v7890_v22  ;;  %v11457_v18 = vpack.c.bf16 %v7980_v10, %v7979_v9 }
 0x665   : > { %11420 = vmatprep.subr.bf16.mxu0 %v11847_v36 }
 0x666   : > { %10539 = vmatmul.mubr.msk.f32.vlgmr.msra.gmra.mrb[24].mxu1 %vm5951_vm6, %v7190_v20  ;;  %v7893_v20 = vld [vmem:[%s14196_s9 + $0x2d8] sm:$0xff] }
 0x667   : > { %10550 = vmatmul.mubr.msk.f32.vlgmr.msra.gmra.mrb[28].mxu0 %vm5951_vm6, %v7280_v11  ;;  %11416 = vmatpush3.bf16.msra.mxu1 %v11415_v21  ;;  %v6194_v11 = vadd.f32 %v6190_v13, %v6103_v61  ;;  %v10408_v21 = vpop.f32.mrb[15].mxu0  ;;  %v11454_v15 = vpack.c.bf16 %v7893_v20, %v7892_v19 }
 0x668   : > { %11422 = vmatpush3.bf16.msra.mxu0 %v11421_v23  ;;  %11417 = vmatprep.subr.bf16.mxu1 %v11847_v36  ;;  %v7981_v23 = vld [vmem:[%s14196_s9 + $0x2f0] sm:$0xff]  ;;  %v6279_v35 = vpop.f32.mrb[16].mxu0 }
 0x669   : > { %11423 = vmatprep.subr.bf16.mxu0 %v11847_v36  ;;  %10560 = vmatprep.mubr.msk.f32.mxu1 %vm11848_vm4, %v13511_v41  ;;  %v6283_v39 = vadd.f32 %v6279_v35, %v6194_v11 }
 0x66a   : > { %10571 = vmatprep.mubr.msk.f32.mxu0 %vm11848_vm4, %v13511_v41 }
 0x66b   : > { %11419 = vmatpush3.bf16.msra.mxu1 %v11418_v29  ;;  %v11460_v29 = vpack.c.bf16 %v7982_v25, %v7981_v23  ;;  %v6372_v43 = vadd.f32 %v6368_v1, %v6283_v39 }
 0x66c   : > { %11425 = vmatpush3.bf16.msra.mxu0 %v11424_v30  ;;  %11426 = vmatprep.subr.bf16.mxu1 %v11847_v36  ;;  %v8068_v30 = vld [vmem:[%s14196_s9 + $0x300] sm:$0xff] }
 0x66d   : > { %11432 = vmatprep.subr.bf16.mxu0 %v11847_v36  ;;  %v11463_v32 = vpack.c.bf16 %v8069_v31, %v8068_v30 }
 0x66e   : > { %10561 = vmatmul.mubr.msk.f32.vlgmr.msra.gmra.mrb[26].mxu1 %vm5951_vm6, %v7369_v40  ;;  %v10419_v40 = vpop.f32.mrb[17].mxu0 }
 0x66f   : > { %10572 = vmatmul.mubr.msk.f32.vlgmr.msra.gmra.mrb[30].mxu0 %vm5951_vm6, %v7458_v47  ;;  %11428 = vmatpush3.bf16.msra.mxu1 %v11427_v38  ;;  %v8071_v38 = vld [vmem:[%s14196_s9 + $0x318] sm:$0xff]  ;;  %v6458_v47 = vpop.f32.mrb[18].mxu0 }
 0x670   : > { %11434 = vmatpush3.bf16.msra.mxu0 %v11433_v42  ;;  %11429 = vmatprep.subr.bf16.mxu1 %v11847_v36  ;;  %v11758_v42 = vld [vmem:[#allocation7 + $0x24] ss:$8 sps:$4 sm:$0x33]   ;;  %v11466_v44 = vpack.c.bf16 %v8071_v38, %v8070_v24  ;;  %v6462_v37 = vadd.f32 %v6458_v47, %v6372_v43  ;;  %v10441_v48 = vpop.f32.mrb[19].mxu0 }
 0x671   : > { %11435 = vmatprep.subr.bf16.mxu0 %v11847_v36  ;;  %10582 = vmatprep.mubr.msk.f32.mxu1 %vm11848_vm4, %v13511_v41  ;;  %v8081_v46 = vrot.slane %v11758_v42, %v12758_v5 }
 0x672   : > { %10593 = vmatprep.mubr.msk.f32.mxu0 %vm11848_vm4, %v13511_v41 }
 0x673   : > { %11431 = vmatpush3.bf16.msra.mxu1 %v11430_v49  ;;  %v8195_v49 = vld [vmem:[%s14198_s11 + $0x20] sm:$0xff] }
 0x674   : > { %11437 = vmatpush3.bf16.msra.mxu0 %v11436_v59  ;;  %11438 = vmatprep.subr.bf16.mxu1 %v11847_v36  ;;  %v8189_v59 = vld [vmem:[%s14198_s11] sm:$0xff]  ;;  %v11469_v51 = vpack.c.bf16 %v8196_v50, %v8195_v49 }
 0x675   : > { %11444 = vmatprep.subr.bf16.mxu0 %v11847_v36  ;;  %v11475_v54 = vpack.c.bf16 %v8190_v52, %v8189_v59 }
 0x676   : > { %10583 = vmatmul.mubr.msk.f32.vlgmr.msra.gmra.mrb[28].mxu1 %vm5951_vm6, %v7547_v58 }
 0x677   : > { %11440 = vmatpush3.bf16.msra.mxu1 %v11439_v55  ;;  %10594 = vmatmul.mubr.msk.f32.vlgmr.msra.gmra.mrb[32].mxu0 %vm5951_vm6, %v7636_v56  ;;  %v8191_v55 = vld [vmem:[%s14198_s11 + $0x10] sm:$0xff]  ;;  %v8192_v56 = vld [vmem:[%s14198_s11 + $0x18] sm:$0xff] }
 0x678   : > { %11446 = vmatpush3.bf16.msra.mxu0 %v11445_v45  ;;  %11441 = vmatprep.subr.bf16.mxu1 %v11847_v36  ;;  %v11478_v58 = vpack.c.bf16 %v8192_v56, %v8191_v55 }
 0x679   : > { %11447 = vmatprep.subr.bf16.mxu0 %v11847_v36  ;;  %10604 = vmatprep.mubr.msk.f32.mxu1 %vm11848_vm4, %v13511_v41 }
 0x67a   : > { %10615 = vmatprep.mubr.msk.f32.mxu0 %vm11848_vm4, %v13511_v41 }
 0x67b   : > { %11443 = vmatpush3.bf16.msra.mxu1 %v11442_v3 }
 0x67c   : > { %11449 = vmatpush3.bf16.msra.mxu0 %v11448_v7  ;;  %11450 = vmatprep.subr.bf16.mxu1 %v11847_v36 }
 0x67d   : > { %11456 = vmatprep.subr.bf16.mxu0 %v11847_v36 }
 0x67e   : > { %10605 = vmatmul.mubr.msk.f32.vlgmr.msra.gmra.mrb[30].mxu1 %vm5951_vm6, %v7725_v14 }
 0x67f   : > { %11452 = vmatpush3.bf16.msra.mxu1 %v11451_v16  ;;  %10616 = vmatmul.mubr.msk.f32.vlgmr.msra.gmra.mrb[34].mxu0 %vm5951_vm6, %v7814_v17 }
 0x680   : > { %11458 = vmatpush3.bf16.msra.mxu0 %v11457_v18  ;;  %11453 = vmatprep.subr.bf16.mxu1 %v11847_v36 }
 0x681   : > { %11459 = vmatprep.subr.bf16.mxu0 %v11847_v36  ;;  %10626 = vmatprep.mubr.msk.f32.mxu1 %vm11848_vm4, %v13511_v41 }
 0x682   : > { %10637 = vmatprep.mubr.msk.f32.mxu0 %vm11848_vm4, %v13511_v41 }
 0x683   : > { %11455 = vmatpush3.bf16.msra.mxu1 %v11454_v15 }
 0x684   : > { %11461 = vmatpush3.bf16.msra.mxu0 %v11460_v29  ;;  %11462 = vmatprep.subr.bf16.mxu1 %v11847_v36 }
 0x685   : > { %11468 = vmatprep.subr.bf16.mxu0 %v11847_v36 }
 0x686   : > { %10627 = vmatmul.mubr.msk.f32.vlgmr.msra.gmra.mrb[32].mxu1 %vm5951_vm6, %v7903_v34 }
 0x687   : > { %11464 = vmatpush3.bf16.msra.mxu1 %v11463_v32  ;;  %10638 = vmatmul.mubr.msk.f32.vlgmr.msra.gmra.mrb[36].mxu0 %vm5951_vm6, %v7992_v33 }
 0x688   : > { %11465 = vmatprep.subr.bf16.mxu1 %v11847_v36  ;;  %10648 = vmatprep.mubr.msk.f32.mxu1 %vm11848_vm4, %v13511_v41 }
 0x689   : > { %10659 = vmatprep.mubr.msk.f32.mxu0 %vm11848_vm4, %v13511_v41  ;;  %11470 = vmatpush3.bf16.msra.mxu0 %v11469_v51 }
 0x68a   : > { %11471 = vmatprep.subr.bf16.mxu0 %v11847_v36 }
 0x68b   : > { %11467 = vmatpush3.bf16.msra.mxu1 %v11466_v44 }
 0x68c   : > { %11474 = vmatprep.subr.bf16.mxu1 %v11847_v36 }
 0x68d   : > { %11473 = vmatpush3.bf16.msra.mxu0 %v11472_v57 }
 0x68e   : > { %10649 = vmatmul.mubr.msk.f32.vlgmr.msra.gmra.mrb[34].mxu1 %vm5951_vm6, %v8081_v46  ;;  %11480 = vmatprep.subr.bf16.mxu0 %v11847_v36 }
 0x68f   : > { %10670 = vmatprep.mubr.msk.f32.mxu1 %vm11848_vm4, %v13511_v41  ;;  %11476 = vmatpush3.bf16.msra.mxu1 %v11475_v54 }
 0x690   : > { %11477 = vmatprep.subr.bf16.mxu1 %v11847_v36 }
 0x693   : > { %11479 = vmatpush3.bf16.msra.mxu1 %v11478_v58 }
 0x694   : > { %11486 = vmatprep.subr.bf16.mxu1 %v11847_v36 }
 0x719   : > { %v6547_v45 = vpop.f32.mrb[16].mxu1 }
 0x71a   : > { %v6551_v60 = vadd.f32 %v6547_v45, %v6462_v37  ;;  %v6636_v12 = vpop.f32.mrb[20].mxu0  ;;  %v10452_v61 = vpop.f32.mrb[17].mxu1  ;;  %v8365_v45 = vld [vmem:[%s14198_s11 + $0x40] sm:$0xff] }
 0x71b   : > { %v10463_v62 = vpop.f32.mrb[21].mxu0  ;;  %v8455_v61 = vld [vmem:[%s14198_s11 + $0x68] sm:$0xff] }
 0x71c   : > { %v6640_v63 = vadd.f32 %v6636_v12, %v6551_v60  ;;  %v8366_v60 = vld [vmem:[%s14198_s11 + $0x48] sm:$0xff]  ;;  %v8454_v12 = vld [vmem:[%s14198_s11 + $0x60] sm:$0xff] }
 0x721   : > { %v6725_v27 = vpop.f32.mrb[18].mxu1 }
 0x722   : > { %v6729_v0 = vadd.f32 %v6725_v27, %v6640_v63  ;;  %v10474_v1 = vpop.f32.mrb[19].mxu1  ;;  %v6814_v3 = vpop.f32.mrb[22].mxu0  ;;  %v8367_v63 = vld [vmem:[%s14198_s11 + $0x50] sm:$0xff] }
 0x723   : > { %v10485_v4 = vpop.f32.mrb[23].mxu0  ;;  %v8368_v1 = vld [vmem:[%s14198_s11 + $0x58] sm:$0xff] }
 0x724   : > { %v6818_v6 = vadd.f32 %v6814_v3, %v6729_v0  ;;  %v11481_v0 = vpack.c.bf16 %v8366_v60, %v8365_v45  ;;  %v11487_v3 = vpack.c.bf16 %v8455_v61, %v8454_v12  ;;  %v8456_v4 = vld [vmem:[%s14198_s11 + $0x70] sm:$0xff] }
 0x729   : > { %v6903_v7 = vpop.f32.mrb[20].mxu1 }
 0x72a   : > { %v6907_v22 = vadd.f32 %v6903_v7, %v6818_v6  ;;  %v6992_v8 = vpop.f32.mrb[24].mxu0  ;;  %v10496_v9 = vpop.f32.mrb[21].mxu1  ;;  %v8457_v6 = vld [vmem:[%s14198_s11 + $0x78] sm:$0xff]  ;;  %v11484_v7 = vpack.c.bf16 %v8368_v1, %v8367_v63 }
 0x72b   : > { %v10507_v10 = vpop.f32.mrb[25].mxu0 }
 0x72c   : > { %v6996_v14 = vadd.f32 %v6992_v8, %v6907_v22  ;;  %v8543_v22 = vld [vmem:[%s14198_s11 + $0x80] sm:$0xff]  ;;  %v11490_v8 = vpack.c.bf16 %v8457_v6, %v8456_v4  ;;  %v8544_v10 = vld [vmem:[%s14198_s11 + $0x88] sm:$0xff] }
 0x731   : > { %v7081_v16 = vpop.f32.mrb[22].mxu1 }
 0x732   : > { %v7085_v41 = vadd.f32 %v7081_v16, %v6996_v14  ;;  %v7170_v17 = vpop.f32.mrb[26].mxu0  ;;  %v10518_v13 = vpop.f32.mrb[23].mxu1  ;;  %v14046_v14 = vld [vmem:[#allocation6] sm:$0xff] }
 0x733   : > { %v10529_v18 = vpop.f32.mrb[27].mxu0  ;;  %v11493_v13 = vpack.c.bf16 %v8544_v10, %v8543_v22  ;;  %v9248_v22 = vld [vmem:[%s14199_s12] ss:$0 sm:$0xff] }
 0x734   : > { %v7174_v19 = vadd.f32 %v7170_v17, %v7085_v41  ;;  %v8632_v41 = vld [vmem:[%s14198_s11 + $0xa0] sm:$0xff]  ;;  %v8633_v17 = vld [vmem:[%s14198_s11 + $0xa8] sm:$0xff] }
 0x735   : > { %v11499_v18 = vpack.c.bf16 %v8633_v17, %v8632_v41 }
 0x739   : > { %v7259_v20 = vpop.f32.mrb[24].mxu1 }
 0x73a   : > { %v7263_v11 = vadd.f32 %v7259_v20, %v7174_v19  ;;  %v10540_v21 = vpop.f32.mrb[25].mxu1  ;;  %v7349_v23 = vpop.f32.mrb[28].mxu0  ;;  %v8545_v19 = vld [vmem:[%s14198_s11 + $0x90] sm:$0xff]  ;;  %v8546_v20 = vld [vmem:[%s14198_s11 + $0x98] sm:$0xff] }
 0x73b   : > { %v10551_v25 = vpop.f32.mrb[29].mxu0  ;;  %v8635_v21 = vld [vmem:[%s14198_s11 + $0xb8] sm:$0xff] }
 0x73c   : > { %v7353_v26 = vadd.f32 %v7349_v23, %v7263_v11  ;;  %v8634_v11 = vld [vmem:[%s14198_s11 + $0xb0] sm:$0xff]  ;;  %v11496_v23 = vpack.c.bf16 %v8546_v20, %v8545_v19 }
 0x73d   : > { %v11502_v25 = vpack.c.bf16 %v8635_v21, %v8634_v11 }
 0x741   : > { %v7438_v15 = vpop.f32.mrb[26].mxu1 }
 0x742   : > { %v7442_v28 = vadd.f32 %v7438_v15, %v7353_v26  ;;  %v7527_v29 = vpop.f32.mrb[30].mxu0  ;;  %v10562_v30 = vpop.f32.mrb[27].mxu1  ;;  %v8722_v15 = vld [vmem:[%s14198_s11 + $0xc0] sm:$0xff] }
 0x743   : > { %v10573_v31 = vpop.f32.mrb[31].mxu0  ;;  %v8811_v30 = vld [vmem:[%s14198_s11 + $0xe0] sm:$0xff] }
 0x744   : > { %v7531_v34 = vadd.f32 %v7527_v29, %v7442_v28  ;;  %v8723_v28 = vld [vmem:[%s14198_s11 + $0xc8] sm:$0xff] }
 0x745   : > { %v8812_v31 = vld [vmem:[%s14198_s11 + $0xe8] sm:$0xff] }
 0x749   : > { %v7616_v32 = vpop.f32.mrb[28].mxu1 }
 0x74a   : > { %v7620_v33 = vadd.f32 %v7616_v32, %v7531_v34  ;;  %v10584_v35 = vpop.f32.mrb[29].mxu1  ;;  %v7705_v24 = vpop.f32.mrb[32].mxu0  ;;  %v11505_v34 = vpack.c.bf16 %v8723_v28, %v8722_v15  ;;  %v11511_v32 = vpack.c.bf16 %v8812_v31, %v8811_v30 }
 0x74b   : > { %v10595_v38 = vpop.f32.mrb[33].mxu0  ;;  %v8725_v35 = vld [vmem:[%s14198_s11 + $0xd8] sm:$0xff] }
 0x74c   : > { %v7709_v39 = vadd.f32 %v7705_v24, %v7620_v33  ;;  %v8724_v33 = vld [vmem:[%s14198_s11 + $0xd0] sm:$0xff]  ;;  %v8814_v38 = vld [vmem:[%s14198_s11 + $0xf8] sm:$0xff] }
 0x74d   : > { %v8813_v24 = vld [vmem:[%s14198_s11 + $0xf0] sm:$0xff] }
 0x751   : > { %v7794_v40 = vpop.f32.mrb[30].mxu1 }
 0x752   : > { %v7798_v42 = vadd.f32 %v7794_v40, %v7709_v39  ;;  %v10606_v43 = vpop.f32.mrb[31].mxu1  ;;  %v7883_v44 = vpop.f32.mrb[34].mxu0  ;;  %v11508_v39 = vpack.c.bf16 %v8725_v35, %v8724_v33  ;;  %v11514_v40 = vpack.c.bf16 %v8814_v38, %v8813_v24 }
 0x753   : > { %v10617_v46 = vpop.f32.mrb[35].mxu0  ;;  %v8900_v43 = vld [vmem:[%s14198_s11 + $0x100] sm:$0xff] }
 0x754   : > { %v7887_v47 = vadd.f32 %v7883_v44, %v7798_v42  ;;  %v8901_v44 = vld [vmem:[%s14198_s11 + $0x108] sm:$0xff] }
 0x759   : > { %v7972_v37 = vpop.f32.mrb[32].mxu1 }
 0x75a   : > { %v7976_v48 = vadd.f32 %v7972_v37, %v7887_v47  ;;  %v10628_v49 = vpop.f32.mrb[33].mxu1  ;;  %v8061_v50 = vpop.f32.mrb[36].mxu0  ;;  %v11517_v47 = vpack.c.bf16 %v8901_v44, %v8900_v43  ;;  %v8902_v37 = vld [vmem:[%s14198_s11 + $0x110] sm:$0xff] }
 0x75b   : > { %v10639_v59 = vpop.f32.mrb[37].mxu0 }
 0x75c   : > { %v8065_v51 = vadd.f32 %v8061_v50, %v7976_v48  ;;  %v8903_v48 = vld [vmem:[%s14198_s11 + $0x118] sm:$0xff] }
 0x75d   : > { %v11520_v49 = vpack.c.bf16 %v8903_v48, %v8902_v37 }
 0x761   : > { %v8150_v52 = vpop.f32.mrb[34].mxu1 }
 0x762   : > { %v8154_v53 = vadd.f32 %v8150_v52, %v8065_v51  ;;  %v10650_v54 = vpop.f32.mrb[35].mxu1 }
 0x764   : > { %v8162_v55 = vadd.f32 %v9238_v2, %v8154_v53 }
 0x766   : > { %v8163_v56 = vmax.f32 %v8162_v55, 0.0 }
 0x768   : > { %v8171_v57 = vrot.slane %v8163_v56, %v12758_v5 }
 0x76a   : > { %v8172_v58 = vcombine.high %v8171_v57, %v8171_v57  ;;  %8185 = vst.msk [vmem:[#allocation8 + $0x5] sm:$0x3] %vm5922_vm5, %v8171_v57 }
 0x76c   : > { %8186 = vst.msk [vmem:[#allocation8 + $0x9] sm:$0x3] %vm5922_vm5, %v8172_v58 }
 0x771   : > { %v11771_v62 = vld.sshfl [vmem:[#allocation8 + $0x1] sm:$0xf pattern:$0x76325410] }
 0x772   : > { %v11772_v27 = vld.sshfl [vmem:[#allocation8] sm:$0xf pattern:$0x76325410]  ;;  %10660 = vmatmul.mubr.msk.f32.vlgmr.msra.gmra.mrb[38].mxu0 %vm5951_vm6, %v11771_v62 }
 0x773   : > { %10671 = vmatmul.mubr.msk.f32.vlgmr.msra.gmra.mrb[36].mxu1 %vm5951_vm6, %v11772_v27  ;;  %11482 = vmatpush3.bf16.msra.mxu0 %v11481_v0  ;;  %v11773_v9 = vld.sshfl [vmem:[#allocation8 + $0x2] sm:$0xf pattern:$0x76325410] }
 0x774   : > { %11488 = vmatpush3.bf16.msra.mxu1 %v11487_v3  ;;  %11483 = vmatprep.subr.bf16.mxu0 %v11847_v36  ;;  %v11774_v16 = vld.sshfl [vmem:[#allocation8 + $0x4] sm:$0xf pattern:$0x76325410] }
 0x775   : > { %11489 = vmatprep.subr.bf16.mxu1 %v11847_v36  ;;  %10681 = vmatprep.mubr.msk.f32.mxu0 %vm11848_vm4, %v14046_v14  ;;  %v11775_v26 = vld.sshfl [vmem:[#allocation8 + $0x5] sm:$0xf pattern:$0x76325410] }
 0x776   : > { %10692 = vmatprep.mubr.msk.f32.mxu1 %vm11848_vm4, %v14046_v14  ;;  %v11776_v29 = vld.sshfl [vmem:[#allocation8 + $0x6] sm:$0xf pattern:$0x76325410] }
 0x777   : > { %11485 = vmatpush3.bf16.msra.mxu0 %v11484_v7  ;;  %v11777_v42 = vld.sshfl [vmem:[#allocation8 + $0x8] sm:$0xf pattern:$0x76325410] }
 0x778   : > { %11491 = vmatpush3.bf16.msra.mxu1 %v11490_v8  ;;  %11492 = vmatprep.subr.bf16.mxu0 %v11847_v36  ;;  %v11778_v46 = vld.sshfl [vmem:[#allocation8 + $0x9] sm:$0xf pattern:$0x76325410] }
 0x779   : > { %11498 = vmatprep.subr.bf16.mxu1 %v11847_v36  ;;  %v11779_v50 = vld.sshfl [vmem:[#allocation8 + $0xa] sm:$0xf pattern:$0x76325410] }
 0x77a   : > { %10682 = vmatmul.mubr.msk.f32.vlgmr.msra.gmra.mrb[40].mxu0 %vm5951_vm6, %v11773_v9 }
 0x77b   : > { %10693 = vmatmul.mubr.msk.f32.vlgmr.msra.gmra.mrb[38].mxu1 %vm5951_vm6, %v11774_v16  ;;  %11494 = vmatpush3.bf16.msra.mxu0 %v11493_v13 }
 0x77c   : > { %11500 = vmatpush3.bf16.msra.mxu1 %v11499_v18  ;;  %11495 = vmatprep.subr.bf16.mxu0 %v11847_v36 }
 0x77d   : > { %11501 = vmatprep.subr.bf16.mxu1 %v11847_v36  ;;  %10703 = vmatprep.mubr.msk.f32.mxu0 %vm11848_vm4, %v14046_v14 }
 0x77e   : > { %10714 = vmatprep.mubr.msk.f32.mxu1 %vm11848_vm4, %v14046_v14 }
 0x77f   : > { %11497 = vmatpush3.bf16.msra.mxu0 %v11496_v23 }
 0x780   : > { %11503 = vmatpush3.bf16.msra.mxu1 %v11502_v25  ;;  %11504 = vmatprep.subr.bf16.mxu0 %v11847_v36 }
 0x781   : > { %11510 = vmatprep.subr.bf16.mxu1 %v11847_v36 }
 0x782   : > { %10704 = vmatmul.mubr.msk.f32.vlgmr.msra.gmra.mrb[42].mxu0 %vm5951_vm6, %v11775_v26 }
 0x783   : > { %10715 = vmatmul.mubr.msk.f32.vlgmr.msra.gmra.mrb[40].mxu1 %vm5951_vm6, %v11776_v29  ;;  %11506 = vmatpush3.bf16.msra.mxu0 %v11505_v34 }
 0x784   : > { %11512 = vmatpush3.bf16.msra.mxu1 %v11511_v32  ;;  %11507 = vmatprep.subr.bf16.mxu0 %v11847_v36 }
 0x785   : > { %11513 = vmatprep.subr.bf16.mxu1 %v11847_v36  ;;  %10725 = vmatprep.mubr.msk.f32.mxu0 %vm11848_vm4, %v14046_v14 }
 0x786   : > { %10736 = vmatprep.mubr.msk.f32.mxu1 %vm11848_vm4, %v14046_v14 }
 0x787   : > { %11509 = vmatpush3.bf16.msra.mxu0 %v11508_v39 }
 0x788   : > { %11515 = vmatpush3.bf16.msra.mxu1 %v11514_v40  ;;  %11516 = vmatprep.subr.bf16.mxu0 %v11847_v36 }
 0x78a   : > { %10726 = vmatmul.mubr.msk.f32.vlgmr.msra.gmra.mrb[44].mxu0 %vm5951_vm6, %v11777_v42 }
 0x78b   : > { %10737 = vmatmul.mubr.msk.f32.vlgmr.msra.gmra.mrb[42].mxu1 %vm5951_vm6, %v11778_v46  ;;  %11518 = vmatpush3.bf16.msra.mxu0 %v11517_v47 }
 0x78c   : > { %11519 = vmatprep.subr.bf16.mxu0 %v11847_v36  ;;  %10747 = vmatprep.mubr.msk.f32.mxu0 %vm11848_vm4, %v14046_v14 }
 0x78f   : > { %11521 = vmatpush3.bf16.msra.mxu0 %v11520_v49 }
 0x792   : > { %10748 = vmatmul.mubr.msk.f32.vlgmr.msra.gmra.mrb[46].mxu0 %vm5951_vm6, %v11779_v50 }
 0x845   : > { %v8277_v59 = vpop.f32.mrb[38].mxu0 }
 0x846   : > { %v8359_v51 = vpop.f32.mrb[36].mxu1  ;;  %v10661_v52 = vpop.f32.mrb[39].mxu0 }
 0x847   : > { %v8360_v2 = vadd.f32 %v8359_v51, %v8277_v59  ;;  %v10672_v53 = vpop.f32.mrb[37].mxu1 }
 0x84d   : > { %v8447_v54 = vpop.f32.mrb[40].mxu0 }
 0x84e   : > { %v8451_v55 = vadd.f32 %v8447_v54, %v8360_v2  ;;  %v8536_v56 = vpop.f32.mrb[38].mxu1  ;;  %v10683_v57 = vpop.f32.mrb[41].mxu0 }
 0x84f   : > { %v10694_v58 = vpop.f32.mrb[39].mxu1 }
 0x850   : > { %v8540_v45 = vadd.f32 %v8536_v56, %v8451_v55 }
 0x855   : > { %v8625_v36 = vpop.f32.mrb[42].mxu0 }
 0x856   : > { %v8629_v60 = vadd.f32 %v8625_v36, %v8540_v45  ;;  %v8714_v12 = vpop.f32.mrb[40].mxu1  ;;  %v10705_v61 = vpop.f32.mrb[43].mxu0 }
 0x857   : > { %v10716_v62 = vpop.f32.mrb[41].mxu1 }
 0x858   : > { %v8718_v63 = vadd.f32 %v8714_v12, %v8629_v60 }
 0x85d   : > { %v8804_v27 = vpop.f32.mrb[44].mxu0 }
 0x85e   : > { %v8808_v0 = vadd.f32 %v8804_v27, %v8718_v63  ;;  %v8893_v1 = vpop.f32.mrb[42].mxu1  ;;  %v10727_v3 = vpop.f32.mrb[45].mxu0 }
 0x85f   : > { %v10738_v4 = vpop.f32.mrb[43].mxu1 }
 0x860   : > { %v8897_v6 = vadd.f32 %v8893_v1, %v8808_v0 }
 0x865   : > { %v8982_v7 = vpop.f32.mrb[46].mxu0 }
 0x866   : > { %v8986_v8 = vadd.f32 %v8982_v7, %v8897_v6  ;;  %v10749_v9 = vpop.f32.mrb[47].mxu0 }
 0x868   : > { %v8994_v10 = vadd.f32 %v9248_v22, %v8986_v8 }
 0x86a   : > { %v8995_v14 = vmax.f32 %v8994_v10, 0.0 }
 0x86c   : > { %v9003_v16 = vrot.slane %v8995_v14, %v12758_v5 }
 0x86e   : > { %v9004_v41 = vcombine.high %v9003_v16, %v9003_v16  ;;  %9008 = vst.msk [vmem:[%s433_s15] sm:$0x3] %vm9007_vm9, %v9003_v16 }
 0x870   : > { %9009 = vst.msk [vmem:[%s433_s15 + $0x2] sm:$0x3] %vm9007_vm9, %v9004_v41 }
 0x871   : > { %11793 = shalt.err (!%p11790_p3)
}
 0x872   : > { %s11794_s20 = scalar_lea.hbm %s14142_s21, 64  ;;  %s11798_s30 = scalar_lea.hbm %s14200_s13, 128 }
 0x873   : > { %p11795_p4 = scmp.ne.s32.totalorder %s14142_s21, %s11794_s20  ;;  %p11799_p9 = scmp.lt.u32.totalorder %s14142_s21, %s14200_s13 }
 0x874   : > { %p11800_p10 = scmp.lt.u32.totalorder %s11798_s30, %s11794_s20  ;;  %p11802_p12 = scmp.lt.u32.totalorder %s11794_s20, %s14142_s21 }
 0x875   : > { %p11796_p7 = pnand %p11795_p4, %p11960_p5 }
 0x876   : > { %p11801_p11 = por %p11800_p10, %p11799_p9 }
 0x877   : > { %p11797_p8 = pneg %p11796_p7 }
 0x878   : > { %p11803_p13 = por %p11802_p12, %p11801_p11 }
 0x87a   : > { %p11804_p0 = pnand %p11803_p13, %p11797_p8 }
 0x87c   : > { %11807 = shalt.err (!%p11804_p0)
}
 0x87d   : > { %s11850_s29 = smov 32   ;;  %s11851_s22 = smov 2  }
 0x87e   : > { %11602 = dma.vmem_to_hbm [thread:$0]  (%p11960_p5), %s14144_s16, 64, %s14142_s21, %s14146_s1, %s11850_s29, %s11850_s29, %s11851_s22  }
 0x87f PF: > { %p11608_p1 = scmp.ge.s32.totalorder %s11842_s28, 2  ;;  %s9039_s23 = sand.u32 1, %s11830_s25  }
 0x880   : > { %s9040_s20 = scalar_lea.sflag [#allocation10], %s9039_s23 }
 0x881   : > { %p11605_p2 = pnand %p11608_p1, %p11964_p6 }
 0x883   : > { %11825 = dma.done.wait (!%p11605_p2), %s9040_s20, 64  }
 0x884   : > { %11827 = vsyncadd (!%p11605_p2), %s9040_s20, 4294967232  ;;  %s14210_s24 = sld [smem:[#allocation12_spill]]  ;;  %p23_p3 = scmp.ge.s32.totalorder %s11947_s14, 4  }
 0x885   : > { %s14211_s25 = smov %s11834_s26  ;;  %s14212_s26 = smov %s11838_s27 }
 0x886   : > { %s14214_s28 = smov %s11947_s14  ;;  %25 = sbr.rel (!%p23_p3) target bundleno = 6 (0x6), region = 138 }
 0x88a   : > { %s14213_s27 = smov %s14210_s24 }
 0x88d   :  { %9045 = vsyncpa [#allocation10], 1 }
 0x88e   :  { %9047 = vsyncpa [#allocation10 + $0x1], 1 }

</bundles_post_ra>
